<compile_context>
chip_gen: v5e
topology: v5e:2x2
jax: 0.10.0
libtpu: 0.0.40
codegen_flags: <defaults>
</compile_context>

<pallas_src>
import functools

import jax
import jax.numpy as jnp
from jax.experimental import pallas as pl
from jax.experimental.pallas import tpu as pltpu


# ------------------------------- fused kernel ----------------------------------


def _bottleneck_fused_kernel(x_hbm, w1_ref, b1_ref, w2_ref, b2_ref, w3_ref, b3_ref,
                             o_ref, x_buf, h1_buf, dma_sem,
                             *, W, Cin, P, Cout, TH, d):
    """One (batch, row-tile) grid step of the fused bottleneck.

    x_hbm   : (N, H, W, Cin) full input, raw HBM ref (memory_space=pl.ANY)
    w1_ref  : (Cin, P)   bf16 (bn1 scale folded)    b1_ref: (1, P)    f32
    w2_ref  : (9*P, P)   bf16 (bn2 scale folded, im2col (ky,kx,ci) order)   b2_ref: (1, P) f32
    w3_ref  : (P, Cout)  bf16 (bn3 scale folded)    b3_ref: (1, Cout) f32
    o_ref   : (1, TH, W, Cout) output tile
    x_buf   : VMEM (2, TH+2d, W, Cin)  double-buffered input rows incl. row halo (also residual)
    h1_buf  : VMEM (TH+2d, W+2d, P) bf16   conv1 output incl. conv2 zero padding
    dma_sem : DMA semaphores (2, 3)  -- per slot: central / top-halo / bottom-halo
    """
    n = pl.program_id(0)
    t = pl.program_id(1)
    T = pl.num_programs(1)
    Hb = TH + 2 * d
    slot = t & 1

    # -------------------- input DMA helpers (rows + dilation halo) --------------------
    def central(tt, s):
        return pltpu.make_async_copy(x_hbm.at[n, pl.ds(tt * TH, TH), :, :],
                                     x_buf.at[s, pl.ds(d, TH), :, :], dma_sem.at[s, 0])

    def top(tt, s):
        return pltpu.make_async_copy(x_hbm.at[n, pl.ds(tt * TH - d, d), :, :],
                                     x_buf.at[s, pl.ds(0, d), :, :], dma_sem.at[s, 1])

    def bottom(tt, s):
        return pltpu.make_async_copy(x_hbm.at[n, pl.ds(tt * TH + TH, d), :, :],
                                     x_buf.at[s, pl.ds(TH + d, d), :, :], dma_sem.at[s, 2])

    def issue(tt, s):
        central(tt, s).start()

        @pl.when(tt > 0)
        def _():
            top(tt, s).start()

        @pl.when(tt < T - 1)
        def _():
            bottom(tt, s).start()

    def wait(tt, s):
        central(tt, s).wait()

        @pl.when(tt > 0)
        def _():
            top(tt, s).wait()

        @pl.when(tt < T - 1)
        def _():
            bottom(tt, s).wait()

    # First row-tile of each image has no prefetch to rely on: fetch it now (exposed once/image).
    @pl.when(t == 0)
    def _():
        issue(t, slot)

    # Cross-step prefetch: pull tile (n, t+1) into the other slot while this tile computes.
    @pl.when(t + 1 < T)
    def _():
        issue(t + 1, 1 - slot)

    # conv2's width zero-padding columns of h1_buf: written once per core (scratch persists and
    # nothing else ever touches these columns), overlapping the only exposed DMA (t == 0).
    @pl.when(t == 0)
    def _():
        h1_buf[:, 0:d, :] = jnp.zeros((Hb, d, P), h1_buf.dtype)
        h1_buf[:, d + W:, :] = jnp.zeros((Hb, d, P), h1_buf.dtype)

    wait(t, slot)

    # ---- conv1 (1x1) + bn1 + relu on real + halo rows; result kept as bf16 in VMEM ----
    xin = x_buf[slot].astype(jnp.bfloat16).reshape(Hb * W, Cin)
    y1 = jnp.dot(xin, w1_ref[...], preferred_element_type=jnp.float32)
    y1 = jnp.maximum(y1 + b1_ref[...], 0.0)
    h1_buf[:, d:d + W, :] = y1.astype(jnp.bfloat16).reshape(Hb, W, P)

    # Halo rows outside the image must be conv2's *zero padding*, not conv1(stale rows).
    @pl.when(t == 0)
    def _():
        h1_buf[0:d, :, :] = jnp.zeros((d, W + 2 * d, P), h1_buf.dtype)

    @pl.when(t == T - 1)
    def _():
        h1_buf[TH + d:, :, :] = jnp.zeros((d, W + 2 * d, P), h1_buf.dtype)

    # ---- conv2 (3x3, dilation d, stride 1) + bn2 + relu : single im2col matmul, K = 9*P ----
    taps = [h1_buf[ky * d:ky * d + TH, kx * d:kx * d + W, :]      # 9 x (TH, W, P) bf16 ref loads
            for ky in range(3) for kx in range(3)]
    im2col = jnp.concatenate(taps, axis=-1).reshape(TH * W, 9 * P)
    y2 = jnp.dot(im2col, w2_ref[...], preferred_element_type=jnp.float32)
    h2 = jnp.maximum(y2 + b2_ref[...], 0.0).astype(jnp.bfloat16)

    # ---- conv3 (1x1) + bn3 + identity residual + relu_inplace ----
    y3 = jnp.dot(h2, w3_ref[...], preferred_element_type=jnp.float32)
    res = x_buf[slot, pl.ds(d, TH), :, :].astype(jnp.float32).reshape(TH * W, Cout)
    y3 = jnp.maximum(y3 + b3_ref[...] + res, 0.0)
    o_ref[...] = y3.reshape(1, TH, W, Cout).astype(o_ref.dtype)


# --------------------------------- wrapper --------------------------------------


def _vmem_limit_bytes():
    try:
        cap = int(pltpu.get_tpu_info().vmem_capacity_bytes)
    except Exception:
        cap = 64 * 1024 * 1024      # conservative (v7x-sized) fallback
    # ~22% headroom for compiler temporaries / pipeline bookkeeping; never ask for > ~112 MiB.
    return min(int(cap * 0.78), 112 * 1024 * 1024)


def _vmem_bytes_estimate(TH, W, Cin, P, Cout, d, x_itemsize):
    Hb = TH + 2 * d
    x_buf = 2 * Hb * W * Cin * x_itemsize           # double-buffered input rows + halo
    h1 = Hb * (W + 2 * d) * P * 2                   # bf16 conv1 output incl. zero pad
    im2col = TH * W * 9 * P * 2                     # compiler-staged im2col operand (bf16)
    live = TH * W * max(9 * P, Cout) * 4            # f32 matmul result / epilogue values
    out = 2 * TH * W * Cout * x_itemsize            # double-buffered output block
    weights = (Cin * P + 9 * P * P + P * Cout) * 2 + (2 * P + Cout) * 4
    return x_buf + h1 + im2col + live + out + 2 * weights + (2 << 20)


def _pick_row_tile(H, W, Cin, P, Cout, d, x_itemsize, budget, requested=None):
    """Largest divisor of H that covers the dilation halo and fits the VMEM budget."""
    if requested is not None:
        assert 1 <= requested <= H and H % requested == 0, "row_tile must divide H"
        assert requested >= d, "row tile must cover one dilation halo"
        return requested
    for cand in range(H, 0, -1):
        if H % cand or cand < d:
            continue
        if _vmem_bytes_estimate(cand, W, Cin, P, Cout, d, x_itemsize) <= budget:
            return cand
    # TODO(synk): H with no divisor >= d that fits VMEM (huge W / prime H) needs a masked-tail
    # grid (pl.cdiv rows + pl.when row masking); not implemented here.
    raise ValueError("no row tile divides H and fits the VMEM budget")


def bottleneck_forward_nhwc(x, p, *, stride=1, dilation=1, multi_grid=1, row_tile=None):
    """Fused Bottleneck.forward (downsample=None, identity residual), NHWC layout."""
    assert stride == 1, "identity residual (downsample=None) requires stride == 1"
    # TODO(synk): the strided / downsample residual branch is not implemented here.
    N, H, W, Cin = x.shape
    d = dilation * multi_grid
    P = p["w1"].shape[1]
    Cout = p["w3"].shape[1]
    assert Cout == Cin, "identity residual requires inplanes == planes * expansion"

    # Fold BN scale into the conv weights once (outside the kernel); keep the shift as a bias.
    w1 = (p["w1"] * p["s1"]).astype(jnp.bfloat16)                               # (Cin, P)
    w2 = (p["w2"] * p["s2"].reshape(1, 1, 1, P)).astype(jnp.bfloat16)           # (3,3,P,P) HWIO
    w2 = w2.reshape(9 * P, P)                                                   # (ky,kx,ci) im2col order
    w3 = (p["w3"] * p["s3"]).astype(jnp.bfloat16)                               # (P, Cout)
    b1 = p["b1"].astype(jnp.float32)
    b2 = p["b2"].astype(jnp.float32)
    b3 = p["b3"].astype(jnp.float32)

    vmem_limit = _vmem_limit_bytes()
    TH = _pick_row_tile(H, W, Cin, P, Cout, d, x.dtype.itemsize,
                        int(0.75 * vmem_limit), row_tile)
    T = H // TH
    Hb = TH + 2 * d

    kernel = functools.partial(_bottleneck_fused_kernel,
                               W=W, Cin=Cin, P=P, Cout=Cout, TH=TH, d=d)
    c2 = lambda n_, t_: (0, 0)

    return pl.pallas_call(
        kernel,
        out_shape=jax.ShapeDtypeStruct((N, H, W, Cout), x.dtype),
        grid_spec=pltpu.PrefetchScalarGridSpec(
            num_scalar_prefetch=0,
            grid=(N, T),
            in_specs=[
                pl.BlockSpec(memory_space=pl.ANY),          # x: manual (prefetched) halo DMA
                pl.BlockSpec((Cin, P), c2),                 # w1 (bn1 scale folded)
                pl.BlockSpec((1, P), c2),                   # b1
                pl.BlockSpec((9 * P, P), c2),               # w2 (bn2 scale folded, im2col layout)
                pl.BlockSpec((1, P), c2),                   # b2
                pl.BlockSpec((P, Cout), c2),                # w3 (bn3 scale folded)
                pl.BlockSpec((1, Cout), c2),                # b3
            ],
            out_specs=pl.BlockSpec((1, TH, W, Cout), lambda n_, t_: (n_, t_, 0, 0)),
            scratch_shapes=[
                pltpu.VMEM((2, Hb, W, Cin), x.dtype),            # 2-slot input rows + halo
                pltpu.VMEM((Hb, W + 2 * d, P), jnp.bfloat16),    # conv1 out + conv2 zero pad
                pltpu.SemaphoreType.DMA((2, 3)),                 # per-slot central/top/bottom
            ]),
        compiler_params=pltpu.CompilerParams(
            # The row-tile axis carries prefetch state across steps -> must stay sequential
            # per core ("arbitrary"); batch stays "parallel" for v7x's two TensorCores.
            dimension_semantics=("parallel", "arbitrary"),
            vmem_limit_bytes=vmem_limit),
    )(x, w1, b1, w2, b2, w3, b3)


def bottleneck_forward_nchw(x_nchw, p, **kw):
    """Convenience wrapper for NCHW callers (prefer the NHWC entry point: no transposes)."""
    out = bottleneck_forward_nhwc(jnp.transpose(x_nchw, (0, 2, 3, 1)), p, **kw)
    return jnp.transpose(out, (0, 3, 1, 2))


# ---------------------------- pure-JAX reference ---------------------------------


def bottleneck_ref_nhwc(x, p, *, stride=1, dilation=1, multi_grid=1):
    d = dilation * multi_grid

    def conv(inp, w_hwio, s, dil, pad):
        return jax.lax.conv_general_dilated(
            inp, w_hwio, window_strides=(s, s), padding=((pad, pad), (pad, pad)),
            rhs_dilation=(dil, dil), dimension_numbers=("NHWC", "HWIO", "NHWC"),
            precision=jax.lax.Precision.HIGHEST)

    def bn(y, scale, shift):
        return y * scale.reshape(1, 1, 1, -1) + shift.reshape(1, 1, 1, -1)

    out = jax.nn.relu(bn(conv(x, p["w1"][None, None], 1, 1, 0), p["s1"], p["b1"]))
    out = jax.nn.relu(bn(conv(out, p["w2"], stride, d, d), p["s2"], p["b2"]))
    out = bn(conv(out, p["w3"][None, None], 1, 1, 0), p["s3"], p["b3"])
    return jax.nn.relu(out + x)


# ------------------------------- parameter init ----------------------------------


def init_params(key, inplanes, planes, eps=1e-5):
    expansion = 4
    ks = jax.random.split(key, 16)

    def conv_init(k, shape, fan_in):
        return jax.random.normal(k, shape, jnp.float32) / jnp.sqrt(jnp.float32(fan_in))

    def bn_init(kg, kb, km, kv, c):
        gamma = 1.0 + 0.1 * jax.random.normal(kg, (c,), jnp.float32)
        beta = 0.1 * jax.random.normal(kb, (c,), jnp.float32)
        mean = 0.1 * jax.random.normal(km, (c,), jnp.float32)
        var = 0.5 + jax.random.uniform(kv, (c,), jnp.float32)
        scale = gamma / jnp.sqrt(var + eps)
        shift = beta - mean * scale
        return scale.reshape(1, c), shift.reshape(1, c)

    p = {}
    p["w1"] = conv_init(ks[0], (inplanes, planes), inplanes)           # 1x1: (Cin, Cout)
    p["w2"] = conv_init(ks[1], (3, 3, planes, planes), 9 * planes)     # 3x3: HWIO
    p["w3"] = conv_init(ks[2], (planes, planes * expansion), planes)   # 1x1: (Cin, Cout)
    p["s1"], p["b1"] = bn_init(ks[3], ks[4], ks[5], ks[6], planes)
    p["s2"], p["b2"] = bn_init(ks[7], ks[8], ks[9], ks[10], planes)
    p["s3"], p["b3"] = bn_init(ks[11], ks[12], ks[13], ks[14], planes * expansion)
    return p


# ------------------------------------ main ----------------------------------------


if __name__ == "__main__":
    key = jax.random.PRNGKey(0)
    kx_, kp_ = jax.random.split(key)

    N, H, W = 2, 16, 16
    planes = 32
    inplanes = planes * 4            # identity residual (downsample=None) requires this

    x = jax.random.normal(kx_, (N, H, W, inplanes), jnp.float32)   # NHWC
    params = init_params(kp_, inplanes, planes)

    ref = bottleneck_ref_nhwc(x, params, stride=1, dilation=1, multi_grid=1)

    # Multi-row-tile path: exercises halo DMAs, cross-step prefetch, boundary zeroing.
    out = bottleneck_forward_nhwc(x, params, stride=1, dilation=1, multi_grid=1, row_tile=8)
    out = jax.block_until_ready(out)
    assert out.shape == ref.shape == (N, H, W, inplanes)
    err = float(jnp.max(jnp.abs(out - ref)))
    assert err < 1.5e-1, f"mismatch vs reference (row_tile=8, max abs err = {err})"

    # Auto row-tile path (VMEM-budget-driven tile; single tile per image at this small size).
    out2 = jax.block_until_ready(
        bottleneck_forward_nhwc(x, params, stride=1, dilation=1, multi_grid=1))
    err2 = float(jnp.max(jnp.abs(out2 - ref)))
    assert err2 < 1.5e-1, f"mismatch vs reference (auto tile, max abs err = {err2})"

    print("KERNEL_OK")
</pallas_src>

<mosaic_0001>
module attributes {stable_mosaic.version = 11 : i64} {
  func.func @_bottleneck_fused_kernel(%arg0: i32, %arg1: i32, %arg2: memref<2x16x16x128xf32, #tpu.memory_space<any>>, %arg3: memref<128x32xbf16, #tpu.memory_space<vmem>>, %arg4: memref<1x32xf32, #tpu.memory_space<vmem>>, %arg5: memref<288x32xbf16, #tpu.memory_space<vmem>>, %arg6: memref<1x32xf32, #tpu.memory_space<vmem>>, %arg7: memref<32x128xbf16, #tpu.memory_space<vmem>>, %arg8: memref<1x128xf32, #tpu.memory_space<vmem>>, %arg9: memref<1x8x16x128xf32, #tpu.memory_space<vmem>>, %arg10: memref<2x10x16x128xf32, #tpu.memory_space<vmem>>, %arg11: memref<10x18x32xbf16, #tpu.memory_space<vmem>>, %arg12: memref<2x3x!tpu.dma_semaphore, #tpu.memory_space<semaphore_mem>>) attributes {dimension_semantics = [#tpu.dimension_semantics<parallel>, #tpu.dimension_semantics<arbitrary>], iteration_bounds = array<i64: 2, 2>, scalar_prefetch = 0 : i64, scratch_operands = 3 : i64, tpu.core_type = #tpu.core_type<tc>, window_params = [{}, {pipeline_mode = #tpu.pipeline_mode<synchronous>, transform_indices = @transform_1, window_bounds = array<i64: 128, 32>}, {pipeline_mode = #tpu.pipeline_mode<synchronous>, transform_indices = @transform_2, window_bounds = array<i64: 1, 32>}, {pipeline_mode = #tpu.pipeline_mode<synchronous>, transform_indices = @transform_3, window_bounds = array<i64: 288, 32>}, {pipeline_mode = #tpu.pipeline_mode<synchronous>, transform_indices = @transform_4, window_bounds = array<i64: 1, 32>}, {pipeline_mode = #tpu.pipeline_mode<synchronous>, transform_indices = @transform_5, window_bounds = array<i64: 32, 128>}, {pipeline_mode = #tpu.pipeline_mode<synchronous>, transform_indices = @transform_6, window_bounds = array<i64: 1, 128>}, {transform_indices = @transform_7, window_bounds = array<i64: 1, 8, 16, 128>}]} {
    %c1_i32 = arith.constant 1 : i32
    %0 = arith.andi %arg1, %c1_i32 : i32
    %c0_i32 = arith.constant 0 : i32
    %1 = arith.cmpi eq, %arg1, %c0_i32 : i32
    %2 = arith.extui %1 : i1 to i32
    %c0_i32_0 = arith.constant 0 : i32
    %3 = arith.cmpi ne, %2, %c0_i32_0 : i32
    scf.if %3 {
      %c8_i32_73 = arith.constant 8 : i32
      %78 = arith.muli %arg1, %c8_i32_73 : i32
      %c0_i32_74 = arith.constant 0 : i32
      %c0_i32_75 = arith.constant 0 : i32
      %c0_i32_76 = arith.constant 0 : i32
      %79 = tpu.memref_slice %arg2[%arg0, %78, %c0_i32_75, %c0_i32_76] : memref<2x16x16x128xf32, #tpu.memory_space<any>> -> memref<1x8x16x128xf32, #tpu.memory_space<any>>
      %80 = tpu.memref_squeeze %79 : memref<1x8x16x128xf32, #tpu.memory_space<any>> -> memref<8x16x128xf32, #tpu.memory_space<any>>
      %c1_i32_77 = arith.constant 1 : i32
      %c0_i32_78 = arith.constant 0 : i32
      %c0_i32_79 = arith.constant 0 : i32
      %81 = tpu.memref_slice %arg10[%0, %c1_i32_77, %c0_i32_78, %c0_i32_79] : memref<2x10x16x128xf32, #tpu.memory_space<vmem>> -> memref<1x8x16x128xf32, #tpu.memory_space<vmem>>
      %82 = tpu.memref_squeeze %81 : memref<1x8x16x128xf32, #tpu.memory_space<vmem>> -> memref<8x16x128xf32, #tpu.memory_space<vmem>>
      %83 = tpu.memref_slice %arg12[%0, %c0_i32_74] : memref<2x3x!tpu.dma_semaphore, #tpu.memory_space<semaphore_mem>> -> memref<1x1x!tpu.dma_semaphore, #tpu.memory_space<semaphore_mem>>
      %84 = tpu.memref_squeeze %83 : memref<1x1x!tpu.dma_semaphore, #tpu.memory_space<semaphore_mem>> -> memref<!tpu.dma_semaphore, #tpu.memory_space<semaphore_mem>>
      tpu.enqueue_dma source(%80 : memref<8x16x128xf32, #tpu.memory_space<any>>) target(%82 : memref<8x16x128xf32, #tpu.memory_space<vmem>>) target_semaphore(%84 : memref<!tpu.dma_semaphore, #tpu.memory_space<semaphore_mem>>)
      %c0_i32_80 = arith.constant 0 : i32
      %85 = arith.cmpi sgt, %arg1, %c0_i32_80 : i32
      %86 = arith.extui %85 : i1 to i32
      %c0_i32_81 = arith.constant 0 : i32
      %87 = arith.cmpi ne, %86, %c0_i32_81 : i32
      scf.if %87 {
        %c8_i32_84 = arith.constant 8 : i32
        %91 = arith.muli %arg1, %c8_i32_84 : i32
        %c1_i32_85 = arith.constant 1 : i32
        %92 = arith.subi %91, %c1_i32_85 : i32
        %c1_i32_86 = arith.constant 1 : i32
        %c0_i32_87 = arith.constant 0 : i32
        %c0_i32_88 = arith.constant 0 : i32
        %93 = tpu.memref_slice %arg2[%arg0, %92, %c0_i32_87, %c0_i32_88] : memref<2x16x16x128xf32, #tpu.memory_space<any>> -> memref<1x1x16x128xf32, #tpu.memory_space<any>>
        %94 = tpu.memref_squeeze %93 : memref<1x1x16x128xf32, #tpu.memory_space<any>> -> memref<1x16x128xf32, #tpu.memory_space<any>>
        %c0_i32_89 = arith.constant 0 : i32
        %c0_i32_90 = arith.constant 0 : i32
        %c0_i32_91 = arith.constant 0 : i32
        %95 = tpu.memref_slice %arg10[%0, %c0_i32_89, %c0_i32_90, %c0_i32_91] : memref<2x10x16x128xf32, #tpu.memory_space<vmem>> -> memref<1x1x16x128xf32, #tpu.memory_space<vmem>>
        %96 = tpu.memref_squeeze %95 : memref<1x1x16x128xf32, #tpu.memory_space<vmem>> -> memref<1x16x128xf32, #tpu.memory_space<vmem>>
        %97 = tpu.memref_slice %arg12[%0, %c1_i32_86] : memref<2x3x!tpu.dma_semaphore, #tpu.memory_space<semaphore_mem>> -> memref<1x1x!tpu.dma_semaphore, #tpu.memory_space<semaphore_mem>>
        %98 = tpu.memref_squeeze %97 : memref<1x1x!tpu.dma_semaphore, #tpu.memory_space<semaphore_mem>> -> memref<!tpu.dma_semaphore, #tpu.memory_space<semaphore_mem>>
        tpu.enqueue_dma source(%94 : memref<1x16x128xf32, #tpu.memory_space<any>>) target(%96 : memref<1x16x128xf32, #tpu.memory_space<vmem>>) target_semaphore(%98 : memref<!tpu.dma_semaphore, #tpu.memory_space<semaphore_mem>>)
      } else {
      }
      %c1_i32_82 = arith.constant 1 : i32
      %88 = arith.cmpi slt, %arg1, %c1_i32_82 : i32
      %89 = arith.extui %88 : i1 to i32
      %c0_i32_83 = arith.constant 0 : i32
      %90 = arith.cmpi ne, %89, %c0_i32_83 : i32
      scf.if %90 {
        %c8_i32_84 = arith.constant 8 : i32
        %91 = arith.muli %arg1, %c8_i32_84 : i32
        %c8_i32_85 = arith.constant 8 : i32
        %92 = arith.addi %91, %c8_i32_85 : i32
        %c2_i32_86 = arith.constant 2 : i32
        %c0_i32_87 = arith.constant 0 : i32
        %c0_i32_88 = arith.constant 0 : i32
        %93 = tpu.memref_slice %arg2[%arg0, %92, %c0_i32_87, %c0_i32_88] : memref<2x16x16x128xf32, #tpu.memory_space<any>> -> memref<1x1x16x128xf32, #tpu.memory_space<any>>
        %94 = tpu.memref_squeeze %93 : memref<1x1x16x128xf32, #tpu.memory_space<any>> -> memref<1x16x128xf32, #tpu.memory_space<any>>
        %c9_i32 = arith.constant 9 : i32
        %c0_i32_89 = arith.constant 0 : i32
        %c0_i32_90 = arith.constant 0 : i32
        %95 = tpu.memref_slice %arg10[%0, %c9_i32, %c0_i32_89, %c0_i32_90] : memref<2x10x16x128xf32, #tpu.memory_space<vmem>> -> memref<1x1x16x128xf32, #tpu.memory_space<vmem>>
        %96 = tpu.memref_squeeze %95 : memref<1x1x16x128xf32, #tpu.memory_space<vmem>> -> memref<1x16x128xf32, #tpu.memory_space<vmem>>
        %97 = tpu.memref_slice %arg12[%0, %c2_i32_86] : memref<2x3x!tpu.dma_semaphore, #tpu.memory_space<semaphore_mem>> -> memref<1x1x!tpu.dma_semaphore, #tpu.memory_space<semaphore_mem>>
        %98 = tpu.memref_squeeze %97 : memref<1x1x!tpu.dma_semaphore, #tpu.memory_space<semaphore_mem>> -> memref<!tpu.dma_semaphore, #tpu.memory_space<semaphore_mem>>
        tpu.enqueue_dma source(%94 : memref<1x16x128xf32, #tpu.memory_space<any>>) target(%96 : memref<1x16x128xf32, #tpu.memory_space<vmem>>) target_semaphore(%98 : memref<!tpu.dma_semaphore, #tpu.memory_space<semaphore_mem>>)
      } else {
      }
    } else {
    }
    %c1_i32_1 = arith.constant 1 : i32
    %4 = arith.addi %arg1, %c1_i32_1 : i32
    %c2_i32 = arith.constant 2 : i32
    %5 = arith.cmpi slt, %4, %c2_i32 : i32
    %6 = arith.extui %5 : i1 to i32
    %c0_i32_2 = arith.constant 0 : i32
    %7 = arith.cmpi ne, %6, %c0_i32_2 : i32
    scf.if %7 {
      %c1_i32_73 = arith.constant 1 : i32
      %78 = arith.addi %arg1, %c1_i32_73 : i32
      %c1_i32_74 = arith.constant 1 : i32
      %79 = arith.subi %c1_i32_74, %0 : i32
      %c8_i32_75 = arith.constant 8 : i32
      %80 = arith.muli %78, %c8_i32_75 : i32
      %c0_i32_76 = arith.constant 0 : i32
      %c0_i32_77 = arith.constant 0 : i32
      %c0_i32_78 = arith.constant 0 : i32
      %81 = tpu.memref_slice %arg2[%arg0, %80, %c0_i32_77, %c0_i32_78] : memref<2x16x16x128xf32, #tpu.memory_space<any>> -> memref<1x8x16x128xf32, #tpu.memory_space<any>>
      %82 = tpu.memref_squeeze %81 : memref<1x8x16x128xf32, #tpu.memory_space<any>> -> memref<8x16x128xf32, #tpu.memory_space<any>>
      %c1_i32_79 = arith.constant 1 : i32
      %c0_i32_80 = arith.constant 0 : i32
      %c0_i32_81 = arith.constant 0 : i32
      %83 = tpu.memref_slice %arg10[%79, %c1_i32_79, %c0_i32_80, %c0_i32_81] : memref<2x10x16x128xf32, #tpu.memory_space<vmem>> -> memref<1x8x16x128xf32, #tpu.memory_space<vmem>>
      %84 = tpu.memref_squeeze %83 : memref<1x8x16x128xf32, #tpu.memory_space<vmem>> -> memref<8x16x128xf32, #tpu.memory_space<vmem>>
      %85 = tpu.memref_slice %arg12[%79, %c0_i32_76] : memref<2x3x!tpu.dma_semaphore, #tpu.memory_space<semaphore_mem>> -> memref<1x1x!tpu.dma_semaphore, #tpu.memory_space<semaphore_mem>>
      %86 = tpu.memref_squeeze %85 : memref<1x1x!tpu.dma_semaphore, #tpu.memory_space<semaphore_mem>> -> memref<!tpu.dma_semaphore, #tpu.memory_space<semaphore_mem>>
      tpu.enqueue_dma source(%82 : memref<8x16x128xf32, #tpu.memory_space<any>>) target(%84 : memref<8x16x128xf32, #tpu.memory_space<vmem>>) target_semaphore(%86 : memref<!tpu.dma_semaphore, #tpu.memory_space<semaphore_mem>>)
      %c0_i32_82 = arith.constant 0 : i32
      %87 = arith.cmpi sgt, %78, %c0_i32_82 : i32
      %88 = arith.extui %87 : i1 to i32
      %c0_i32_83 = arith.constant 0 : i32
      %89 = arith.cmpi ne, %88, %c0_i32_83 : i32
      scf.if %89 {
        %c8_i32_86 = arith.constant 8 : i32
        %93 = arith.muli %78, %c8_i32_86 : i32
        %c1_i32_87 = arith.constant 1 : i32
        %94 = arith.subi %93, %c1_i32_87 : i32
        %c1_i32_88 = arith.constant 1 : i32
        %c0_i32_89 = arith.constant 0 : i32
        %c0_i32_90 = arith.constant 0 : i32
        %95 = tpu.memref_slice %arg2[%arg0, %94, %c0_i32_89, %c0_i32_90] : memref<2x16x16x128xf32, #tpu.memory_space<any>> -> memref<1x1x16x128xf32, #tpu.memory_space<any>>
        %96 = tpu.memref_squeeze %95 : memref<1x1x16x128xf32, #tpu.memory_space<any>> -> memref<1x16x128xf32, #tpu.memory_space<any>>
        %c0_i32_91 = arith.constant 0 : i32
        %c0_i32_92 = arith.constant 0 : i32
        %c0_i32_93 = arith.constant 0 : i32
        %97 = tpu.memref_slice %arg10[%79, %c0_i32_91, %c0_i32_92, %c0_i32_93] : memref<2x10x16x128xf32, #tpu.memory_space<vmem>> -> memref<1x1x16x128xf32, #tpu.memory_space<vmem>>
        %98 = tpu.memref_squeeze %97 : memref<1x1x16x128xf32, #tpu.memory_space<vmem>> -> memref<1x16x128xf32, #tpu.memory_space<vmem>>
        %99 = tpu.memref_slice %arg12[%79, %c1_i32_88] : memref<2x3x!tpu.dma_semaphore, #tpu.memory_space<semaphore_mem>> -> memref<1x1x!tpu.dma_semaphore, #tpu.memory_space<semaphore_mem>>
        %100 = tpu.memref_squeeze %99 : memref<1x1x!tpu.dma_semaphore, #tpu.memory_space<semaphore_mem>> -> memref<!tpu.dma_semaphore, #tpu.memory_space<semaphore_mem>>
        tpu.enqueue_dma source(%96 : memref<1x16x128xf32, #tpu.memory_space<any>>) target(%98 : memref<1x16x128xf32, #tpu.memory_space<vmem>>) target_semaphore(%100 : memref<!tpu.dma_semaphore, #tpu.memory_space<semaphore_mem>>)
      } else {
      }
      %c1_i32_84 = arith.constant 1 : i32
      %90 = arith.cmpi slt, %78, %c1_i32_84 : i32
      %91 = arith.extui %90 : i1 to i32
      %c0_i32_85 = arith.constant 0 : i32
      %92 = arith.cmpi ne, %91, %c0_i32_85 : i32
      scf.if %92 {
        %c8_i32_86 = arith.constant 8 : i32
        %93 = arith.muli %78, %c8_i32_86 : i32
        %c8_i32_87 = arith.constant 8 : i32
        %94 = arith.addi %93, %c8_i32_87 : i32
        %c2_i32_88 = arith.constant 2 : i32
        %c0_i32_89 = arith.constant 0 : i32
        %c0_i32_90 = arith.constant 0 : i32
        %95 = tpu.memref_slice %arg2[%arg0, %94, %c0_i32_89, %c0_i32_90] : memref<2x16x16x128xf32, #tpu.memory_space<any>> -> memref<1x1x16x128xf32, #tpu.memory_space<any>>
        %96 = tpu.memref_squeeze %95 : memref<1x1x16x128xf32, #tpu.memory_space<any>> -> memref<1x16x128xf32, #tpu.memory_space<any>>
        %c9_i32 = arith.constant 9 : i32
        %c0_i32_91 = arith.constant 0 : i32
        %c0_i32_92 = arith.constant 0 : i32
        %97 = tpu.memref_slice %arg10[%79, %c9_i32, %c0_i32_91, %c0_i32_92] : memref<2x10x16x128xf32, #tpu.memory_space<vmem>> -> memref<1x1x16x128xf32, #tpu.memory_space<vmem>>
        %98 = tpu.memref_squeeze %97 : memref<1x1x16x128xf32, #tpu.memory_space<vmem>> -> memref<1x16x128xf32, #tpu.memory_space<vmem>>
        %99 = tpu.memref_slice %arg12[%79, %c2_i32_88] : memref<2x3x!tpu.dma_semaphore, #tpu.memory_space<semaphore_mem>> -> memref<1x1x!tpu.dma_semaphore, #tpu.memory_space<semaphore_mem>>
        %100 = tpu.memref_squeeze %99 : memref<1x1x!tpu.dma_semaphore, #tpu.memory_space<semaphore_mem>> -> memref<!tpu.dma_semaphore, #tpu.memory_space<semaphore_mem>>
        tpu.enqueue_dma source(%96 : memref<1x16x128xf32, #tpu.memory_space<any>>) target(%98 : memref<1x16x128xf32, #tpu.memory_space<vmem>>) target_semaphore(%100 : memref<!tpu.dma_semaphore, #tpu.memory_space<semaphore_mem>>)
      } else {
      }
    } else {
    }
    %c0_i32_3 = arith.constant 0 : i32
    %8 = arith.cmpi eq, %arg1, %c0_i32_3 : i32
    %9 = arith.extui %8 : i1 to i32
    %c0_i32_4 = arith.constant 0 : i32
    %10 = arith.cmpi ne, %9, %c0_i32_4 : i32
    scf.if %10 {
      %cst_73 = arith.constant 0.000000e+00 : bf16
      %78 = vector.broadcast %cst_73 : bf16 to vector<10x1x32xbf16>
      %c0_74 = arith.constant 0 : index
      %c0_75 = arith.constant 0 : index
      %c0_76 = arith.constant 0 : index
      %79 = vector.load %arg11[%c0_74, %c0_75, %c0_76] : memref<10x18x32xbf16, #tpu.memory_space<vmem>>, vector<10x1x32xbf16>
      tpu.vector_store %arg11[%c0_74, %c0_75, %c0_76], %78 {strides = array<i32>} : memref<10x18x32xbf16, #tpu.memory_space<vmem>>, vector<10x1x32xbf16>,
      %cst_77 = arith.constant 0.000000e+00 : bf16
      %80 = vector.broadcast %cst_77 : bf16 to vector<10x1x32xbf16>
      %c0_78 = arith.constant 0 : index
      %c17 = arith.constant 17 : index
      %c0_79 = arith.constant 0 : index
      %81 = vector.load %arg11[%c0_78, %c17, %c0_79] : memref<10x18x32xbf16, #tpu.memory_space<vmem>>, vector<10x1x32xbf16>
      tpu.vector_store %arg11[%c0_78, %c17, %c0_79], %80 {strides = array<i32>} : memref<10x18x32xbf16, #tpu.memory_space<vmem>>, vector<10x1x32xbf16>,
    } else {
    }
    %c8_i32 = arith.constant 8 : i32
    %11 = arith.muli %arg1, %c8_i32 : i32
    %c0_i32_5 = arith.constant 0 : i32
    %c0_i32_6 = arith.constant 0 : i32
    %c0_i32_7 = arith.constant 0 : i32
    %12 = tpu.memref_slice %arg2[%arg0, %11, %c0_i32_6, %c0_i32_7] : memref<2x16x16x128xf32, #tpu.memory_space<any>> -> memref<1x8x16x128xf32, #tpu.memory_space<any>>
    %13 = tpu.memref_squeeze %12 : memref<1x8x16x128xf32, #tpu.memory_space<any>> -> memref<8x16x128xf32, #tpu.memory_space<any>>
    %c1_i32_8 = arith.constant 1 : i32
    %c0_i32_9 = arith.constant 0 : i32
    %c0_i32_10 = arith.constant 0 : i32
    %14 = tpu.memref_slice %arg10[%0, %c1_i32_8, %c0_i32_9, %c0_i32_10] : memref<2x10x16x128xf32, #tpu.memory_space<vmem>> -> memref<1x8x16x128xf32, #tpu.memory_space<vmem>>
    %15 = tpu.memref_squeeze %14 : memref<1x8x16x128xf32, #tpu.memory_space<vmem>> -> memref<8x16x128xf32, #tpu.memory_space<vmem>>
    %16 = tpu.memref_slice %arg12[%0, %c0_i32_5] : memref<2x3x!tpu.dma_semaphore, #tpu.memory_space<semaphore_mem>> -> memref<1x1x!tpu.dma_semaphore, #tpu.memory_space<semaphore_mem>>
    %17 = tpu.memref_squeeze %16 : memref<1x1x!tpu.dma_semaphore, #tpu.memory_space<semaphore_mem>> -> memref<!tpu.dma_semaphore, #tpu.memory_space<semaphore_mem>>
    tpu.wait_dma2 semaphore(%17 : memref<!tpu.dma_semaphore, #tpu.memory_space<semaphore_mem>>) src(%13 : memref<8x16x128xf32, #tpu.memory_space<any>>) dst(%15 : memref<8x16x128xf32, #tpu.memory_space<vmem>>)
    %c0_i32_11 = arith.constant 0 : i32
    %18 = arith.cmpi sgt, %arg1, %c0_i32_11 : i32
    %19 = arith.extui %18 : i1 to i32
    %c0_i32_12 = arith.constant 0 : i32
    %20 = arith.cmpi ne, %19, %c0_i32_12 : i32
    scf.if %20 {
      %c8_i32_73 = arith.constant 8 : i32
      %78 = arith.muli %arg1, %c8_i32_73 : i32
      %c1_i32_74 = arith.constant 1 : i32
      %79 = arith.subi %78, %c1_i32_74 : i32
      %c1_i32_75 = arith.constant 1 : i32
      %c0_i32_76 = arith.constant 0 : i32
      %c0_i32_77 = arith.constant 0 : i32
      %80 = tpu.memref_slice %arg2[%arg0, %79, %c0_i32_76, %c0_i32_77] : memref<2x16x16x128xf32, #tpu.memory_space<any>> -> memref<1x1x16x128xf32, #tpu.memory_space<any>>
      %81 = tpu.memref_squeeze %80 : memref<1x1x16x128xf32, #tpu.memory_space<any>> -> memref<1x16x128xf32, #tpu.memory_space<any>>
      %c0_i32_78 = arith.constant 0 : i32
      %c0_i32_79 = arith.constant 0 : i32
      %c0_i32_80 = arith.constant 0 : i32
      %82 = tpu.memref_slice %arg10[%0, %c0_i32_78, %c0_i32_79, %c0_i32_80] : memref<2x10x16x128xf32, #tpu.memory_space<vmem>> -> memref<1x1x16x128xf32, #tpu.memory_space<vmem>>
      %83 = tpu.memref_squeeze %82 : memref<1x1x16x128xf32, #tpu.memory_space<vmem>> -> memref<1x16x128xf32, #tpu.memory_space<vmem>>
      %84 = tpu.memref_slice %arg12[%0, %c1_i32_75] : memref<2x3x!tpu.dma_semaphore, #tpu.memory_space<semaphore_mem>> -> memref<1x1x!tpu.dma_semaphore, #tpu.memory_space<semaphore_mem>>
      %85 = tpu.memref_squeeze %84 : memref<1x1x!tpu.dma_semaphore, #tpu.memory_space<semaphore_mem>> -> memref<!tpu.dma_semaphore, #tpu.memory_space<semaphore_mem>>
      tpu.wait_dma2 semaphore(%85 : memref<!tpu.dma_semaphore, #tpu.memory_space<semaphore_mem>>) src(%81 : memref<1x16x128xf32, #tpu.memory_space<any>>) dst(%83 : memref<1x16x128xf32, #tpu.memory_space<vmem>>)
    } else {
    }
    %c1_i32_13 = arith.constant 1 : i32
    %21 = arith.cmpi slt, %arg1, %c1_i32_13 : i32
    %22 = arith.extui %21 : i1 to i32
    %c0_i32_14 = arith.constant 0 : i32
    %23 = arith.cmpi ne, %22, %c0_i32_14 : i32
    scf.if %23 {
      %c8_i32_73 = arith.constant 8 : i32
      %78 = arith.muli %arg1, %c8_i32_73 : i32
      %c8_i32_74 = arith.constant 8 : i32
      %79 = arith.addi %78, %c8_i32_74 : i32
      %c2_i32_75 = arith.constant 2 : i32
      %c0_i32_76 = arith.constant 0 : i32
      %c0_i32_77 = arith.constant 0 : i32
      %80 = tpu.memref_slice %arg2[%arg0, %79, %c0_i32_76, %c0_i32_77] : memref<2x16x16x128xf32, #tpu.memory_space<any>> -> memref<1x1x16x128xf32, #tpu.memory_space<any>>
      %81 = tpu.memref_squeeze %80 : memref<1x1x16x128xf32, #tpu.memory_space<any>> -> memref<1x16x128xf32, #tpu.memory_space<any>>
      %c9_i32 = arith.constant 9 : i32
      %c0_i32_78 = arith.constant 0 : i32
      %c0_i32_79 = arith.constant 0 : i32
      %82 = tpu.memref_slice %arg10[%0, %c9_i32, %c0_i32_78, %c0_i32_79] : memref<2x10x16x128xf32, #tpu.memory_space<vmem>> -> memref<1x1x16x128xf32, #tpu.memory_space<vmem>>
      %83 = tpu.memref_squeeze %82 : memref<1x1x16x128xf32, #tpu.memory_space<vmem>> -> memref<1x16x128xf32, #tpu.memory_space<vmem>>
      %84 = tpu.memref_slice %arg12[%0, %c2_i32_75] : memref<2x3x!tpu.dma_semaphore, #tpu.memory_space<semaphore_mem>> -> memref<1x1x!tpu.dma_semaphore, #tpu.memory_space<semaphore_mem>>
      %85 = tpu.memref_squeeze %84 : memref<1x1x!tpu.dma_semaphore, #tpu.memory_space<semaphore_mem>> -> memref<!tpu.dma_semaphore, #tpu.memory_space<semaphore_mem>>
      tpu.wait_dma2 semaphore(%85 : memref<!tpu.dma_semaphore, #tpu.memory_space<semaphore_mem>>) src(%81 : memref<1x16x128xf32, #tpu.memory_space<any>>) dst(%83 : memref<1x16x128xf32, #tpu.memory_space<vmem>>)
    } else {
    }
    %24 = arith.index_cast %0 : i32 to index
    %c0 = arith.constant 0 : index
    %c0_15 = arith.constant 0 : index
    %c0_16 = arith.constant 0 : index
    %25 = vector.load %arg10[%24, %c0, %c0_15, %c0_16] : memref<2x10x16x128xf32, #tpu.memory_space<vmem>>, vector<1x10x16x128xf32>
    %26 = vector.shape_cast %25 : vector<1x10x16x128xf32> to vector<10x16x128xf32>
    %27 = arith.truncf %26 : vector<10x16x128xf32> to vector<10x16x128xbf16>
    %28 = vector.shape_cast %27 : vector<10x16x128xbf16> to vector<160x128xbf16>
    %c0_17 = arith.constant 0 : index
    %c0_18 = arith.constant 0 : index
    %29 = vector.load %arg3[%c0_17, %c0_18] : memref<128x32xbf16, #tpu.memory_space<vmem>>, vector<128x32xbf16>
    %cst = arith.constant dense<0.000000e+00> : vector<160x32xf32>
    %30 = tpu.matmul %28, %29, %cst {dimension_numbers = #tpu.dot_dimension_numbers<[1], [0], [0], [1], [0, 0, 1, 1], [], []>} : vector<160x128xbf16>, vector<128x32xbf16>, vector<160x32xf32> -> vector<160x32xf32>
    %c0_19 = arith.constant 0 : index
    %c0_20 = arith.constant 0 : index
    %31 = vector.load %arg4[%c0_19, %c0_20] : memref<1x32xf32, #tpu.memory_space<vmem>>, vector<1x32xf32>
    %32 = vector.broadcast %31 : vector<1x32xf32> to vector<160x32xf32>
    %33 = arith.addf %30, %32 : vector<160x32xf32>
    %cst_21 = arith.constant 0.000000e+00 : f32
    %34 = vector.broadcast %cst_21 : f32 to vector<160x32xf32>
    %35 = arith.maximumf %33, %34 : vector<160x32xf32>
    %36 = arith.truncf %35 : vector<160x32xf32> to vector<160x32xbf16>
    %37 = vector.shape_cast %36 : vector<160x32xbf16> to vector<10x16x32xbf16>
    %c0_22 = arith.constant 0 : index
    %c1 = arith.constant 1 : index
    %c0_23 = arith.constant 0 : index
    %38 = vector.load %arg11[%c0_22, %c1, %c0_23] : memref<10x18x32xbf16, #tpu.memory_space<vmem>>, vector<10x16x32xbf16>
    tpu.vector_store %arg11[%c0_22, %c1, %c0_23], %37 {strides = array<i32>} : memref<10x18x32xbf16, #tpu.memory_space<vmem>>, vector<10x16x32xbf16>,
    %c0_i32_24 = arith.constant 0 : i32
    %39 = arith.cmpi eq, %arg1, %c0_i32_24 : i32
    %40 = arith.extui %39 : i1 to i32
    %c0_i32_25 = arith.constant 0 : i32
    %41 = arith.cmpi ne, %40, %c0_i32_25 : i32
    scf.if %41 {
      %cst_73 = arith.constant 0.000000e+00 : bf16
      %78 = vector.broadcast %cst_73 : bf16 to vector<1x18x32xbf16>
      %c0_74 = arith.constant 0 : index
      %c0_75 = arith.constant 0 : index
      %c0_76 = arith.constant 0 : index
      %79 = vector.load %arg11[%c0_74, %c0_75, %c0_76] : memref<10x18x32xbf16, #tpu.memory_space<vmem>>, vector<1x18x32xbf16>
      tpu.vector_store %arg11[%c0_74, %c0_75, %c0_76], %78 {strides = array<i32>} : memref<10x18x32xbf16, #tpu.memory_space<vmem>>, vector<1x18x32xbf16>,
    } else {
    }
    %c1_i32_26 = arith.constant 1 : i32
    %42 = arith.cmpi eq, %arg1, %c1_i32_26 : i32
    %43 = arith.extui %42 : i1 to i32
    %c0_i32_27 = arith.constant 0 : i32
    %44 = arith.cmpi ne, %43, %c0_i32_27 : i32
    scf.if %44 {
      %cst_73 = arith.constant 0.000000e+00 : bf16
      %78 = vector.broadcast %cst_73 : bf16 to vector<1x18x32xbf16>
      %c9 = arith.constant 9 : index
      %c0_74 = arith.constant 0 : index
      %c0_75 = arith.constant 0 : index
      %79 = vector.load %arg11[%c9, %c0_74, %c0_75] : memref<10x18x32xbf16, #tpu.memory_space<vmem>>, vector<1x18x32xbf16>
      tpu.vector_store %arg11[%c9, %c0_74, %c0_75], %78 {strides = array<i32>} : memref<10x18x32xbf16, #tpu.memory_space<vmem>>, vector<1x18x32xbf16>,
    } else {
    }
    %c0_28 = arith.constant 0 : index
    %c0_29 = arith.constant 0 : index
    %c0_30 = arith.constant 0 : index
    %45 = vector.load %arg11[%c0_28, %c0_29, %c0_30] : memref<10x18x32xbf16, #tpu.memory_space<vmem>>, vector<8x16x32xbf16>
    %c0_31 = arith.constant 0 : index
    %c1_32 = arith.constant 1 : index
    %c0_33 = arith.constant 0 : index
    %46 = vector.load %arg11[%c0_31, %c1_32, %c0_33] : memref<10x18x32xbf16, #tpu.memory_space<vmem>>, vector<8x16x32xbf16>
    %c0_34 = arith.constant 0 : index
    %c2 = arith.constant 2 : index
    %c0_35 = arith.constant 0 : index
    %47 = vector.load %arg11[%c0_34, %c2, %c0_35] : memref<10x18x32xbf16, #tpu.memory_space<vmem>>, vector<8x16x32xbf16>
    %c1_36 = arith.constant 1 : index
    %c0_37 = arith.constant 0 : index
    %c0_38 = arith.constant 0 : index
    %48 = vector.load %arg11[%c1_36, %c0_37, %c0_38] : memref<10x18x32xbf16, #tpu.memory_space<vmem>>, vector<8x16x32xbf16>
    %c1_39 = arith.constant 1 : index
    %c1_40 = arith.constant 1 : index
    %c0_41 = arith.constant 0 : index
    %49 = vector.load %arg11[%c1_39, %c1_40, %c0_41] : memref<10x18x32xbf16, #tpu.memory_space<vmem>>, vector<8x16x32xbf16>
    %c1_42 = arith.constant 1 : index
    %c2_43 = arith.constant 2 : index
    %c0_44 = arith.constant 0 : index
    %50 = vector.load %arg11[%c1_42, %c2_43, %c0_44] : memref<10x18x32xbf16, #tpu.memory_space<vmem>>, vector<8x16x32xbf16>
    %c2_45 = arith.constant 2 : index
    %c0_46 = arith.constant 0 : index
    %c0_47 = arith.constant 0 : index
    %51 = vector.load %arg11[%c2_45, %c0_46, %c0_47] : memref<10x18x32xbf16, #tpu.memory_space<vmem>>, vector<8x16x32xbf16>
    %c2_48 = arith.constant 2 : index
    %c1_49 = arith.constant 1 : index
    %c0_50 = arith.constant 0 : index
    %52 = vector.load %arg11[%c2_48, %c1_49, %c0_50] : memref<10x18x32xbf16, #tpu.memory_space<vmem>>, vector<8x16x32xbf16>
    %c2_51 = arith.constant 2 : index
    %c2_52 = arith.constant 2 : index
    %c0_53 = arith.constant 0 : index
    %53 = vector.load %arg11[%c2_51, %c2_52, %c0_53] : memref<10x18x32xbf16, #tpu.memory_space<vmem>>, vector<8x16x32xbf16>
    %54 = tpu.concatenate %45, %46, %47, %48, %49, %50, %51, %52, %53 in 2 : vector<8x16x32xbf16>, vector<8x16x32xbf16>, vector<8x16x32xbf16>, vector<8x16x32xbf16>, vector<8x16x32xbf16>, vector<8x16x32xbf16>, vector<8x16x32xbf16>, vector<8x16x32xbf16>, vector<8x16x32xbf16> -> vector<8x16x288xbf16>
    %55 = vector.shape_cast %54 : vector<8x16x288xbf16> to vector<128x288xbf16>
    %c0_54 = arith.constant 0 : index
    %c0_55 = arith.constant 0 : index
    %56 = vector.load %arg5[%c0_54, %c0_55] : memref<288x32xbf16, #tpu.memory_space<vmem>>, vector<288x32xbf16>
    %cst_56 = arith.constant dense<0.000000e+00> : vector<128x32xf32>
    %57 = tpu.matmul %55, %56, %cst_56 {dimension_numbers = #tpu.dot_dimension_numbers<[1], [0], [0], [1], [0, 0, 1, 1], [], []>} : vector<128x288xbf16>, vector<288x32xbf16>, vector<128x32xf32> -> vector<128x32xf32>
    %c0_57 = arith.constant 0 : index
    %c0_58 = arith.constant 0 : index
    %58 = vector.load %arg6[%c0_57, %c0_58] : memref<1x32xf32, #tpu.memory_space<vmem>>, vector<1x32xf32>
    %59 = vector.broadcast %58 : vector<1x32xf32> to vector<128x32xf32>
    %60 = arith.addf %57, %59 : vector<128x32xf32>
    %cst_59 = arith.constant 0.000000e+00 : f32
    %61 = vector.broadcast %cst_59 : f32 to vector<128x32xf32>
    %62 = arith.maximumf %60, %61 : vector<128x32xf32>
    %63 = arith.truncf %62 : vector<128x32xf32> to vector<128x32xbf16>
    %c0_60 = arith.constant 0 : index
    %c0_61 = arith.constant 0 : index
    %64 = vector.load %arg7[%c0_60, %c0_61] : memref<32x128xbf16, #tpu.memory_space<vmem>>, vector<32x128xbf16>
    %cst_62 = arith.constant dense<0.000000e+00> : vector<128x128xf32>
    %65 = tpu.matmul %63, %64, %cst_62 {dimension_numbers = #tpu.dot_dimension_numbers<[1], [0], [0], [1], [0, 0, 1, 1], [], []>} : vector<128x32xbf16>, vector<32x128xbf16>, vector<128x128xf32> -> vector<128x128xf32>
    %66 = arith.index_cast %0 : i32 to index
    %c1_63 = arith.constant 1 : index
    %c0_64 = arith.constant 0 : index
    %c0_65 = arith.constant 0 : index
    %67 = vector.load %arg10[%66, %c1_63, %c0_64, %c0_65] : memref<2x10x16x128xf32, #tpu.memory_space<vmem>>, vector<1x8x16x128xf32>
    %68 = vector.shape_cast %67 : vector<1x8x16x128xf32> to vector<8x16x128xf32>
    %69 = vector.shape_cast %68 : vector<8x16x128xf32> to vector<128x128xf32>
    %c0_66 = arith.constant 0 : index
    %c0_67 = arith.constant 0 : index
    %70 = vector.load %arg8[%c0_66, %c0_67] : memref<1x128xf32, #tpu.memory_space<vmem>>, vector<1x128xf32>
    %71 = vector.broadcast %70 : vector<1x128xf32> to vector<128x128xf32>
    %72 = arith.addf %65, %71 : vector<128x128xf32>
    %73 = arith.addf %72, %69 : vector<128x128xf32>
    %cst_68 = arith.constant 0.000000e+00 : f32
    %74 = vector.broadcast %cst_68 : f32 to vector<128x128xf32>
    %75 = arith.maximumf %73, %74 : vector<128x128xf32>
    %76 = vector.shape_cast %75 : vector<128x128xf32> to vector<1x8x16x128xf32>
    %c0_69 = arith.constant 0 : index
    %c0_70 = arith.constant 0 : index
    %c0_71 = arith.constant 0 : index
    %c0_72 = arith.constant 0 : index
    %77 = vector.load %arg9[%c0_69, %c0_70, %c0_71, %c0_72] : memref<1x8x16x128xf32, #tpu.memory_space<vmem>>, vector<1x8x16x128xf32>
    tpu.vector_store %arg9[%c0_69, %c0_70, %c0_71, %c0_72], %76 {strides = array<i32>} : memref<1x8x16x128xf32, #tpu.memory_space<vmem>>, vector<1x8x16x128xf32>,
    return
  }
  func.func @transform_1(%arg0: i32, %arg1: i32) -> (i32, i32) {
    %c0_i32 = arith.constant 0 : i32
    %c0_i32_0 = arith.constant 0 : i32
    %c0_i32_1 = arith.constant 0 : i32
    return %c0_i32, %c0_i32_0 : i32, i32
  }
  func.func @transform_2(%arg0: i32, %arg1: i32) -> (i32, i32) {
    %c0_i32 = arith.constant 0 : i32
    %c0_i32_0 = arith.constant 0 : i32
    %c0_i32_1 = arith.constant 0 : i32
    return %c0_i32, %c0_i32_0 : i32, i32
  }
  func.func @transform_3(%arg0: i32, %arg1: i32) -> (i32, i32) {
    %c0_i32 = arith.constant 0 : i32
    %c0_i32_0 = arith.constant 0 : i32
    %c0_i32_1 = arith.constant 0 : i32
    return %c0_i32, %c0_i32_0 : i32, i32
  }
  func.func @transform_4(%arg0: i32, %arg1: i32) -> (i32, i32) {
    %c0_i32 = arith.constant 0 : i32
    %c0_i32_0 = arith.constant 0 : i32
    %c0_i32_1 = arith.constant 0 : i32
    return %c0_i32, %c0_i32_0 : i32, i32
  }
  func.func @transform_5(%arg0: i32, %arg1: i32) -> (i32, i32) {
    %c0_i32 = arith.constant 0 : i32
    %c0_i32_0 = arith.constant 0 : i32
    %c0_i32_1 = arith.constant 0 : i32
    return %c0_i32, %c0_i32_0 : i32, i32
  }
  func.func @transform_6(%arg0: i32, %arg1: i32) -> (i32, i32) {
    %c0_i32 = arith.constant 0 : i32
    %c0_i32_0 = arith.constant 0 : i32
    %c0_i32_1 = arith.constant 0 : i32
    return %c0_i32, %c0_i32_0 : i32, i32
  }
  func.func @transform_7(%arg0: i32, %arg1: i32) -> (i32, i32, i32, i32) {
    %c0_i32 = arith.constant 0 : i32
    %c0_i32_0 = arith.constant 0 : i32
    %c0_i32_1 = arith.constant 0 : i32
    return %arg0, %arg1, %c0_i32, %c0_i32_0 : i32, i32, i32, i32
  }
}

</mosaic_0001>

<bundles_post_ra>
// kernel: tpu_custom_call.1
= control target key start
LH: loop header
LB: loop body
LE: loop exit
PB: predicated region body
PF: predicated region fallthrough
CT: control target
= control target key end

     0   :  { %s4489_s0 = inlined_call_operand.hbm [shape: f32[2,16,16,128], index: 0, kind: input, shape index: {}]   ;;  %s4490_s1 = inlined_call_operand.vmem [shape: bf16[128,32], index: 1, kind: input, shape index: {}]   ;;  %s4491_s2 = inlined_call_operand.vmem [shape: f32[1,32], index: 2, kind: input, shape index: {}]   ;;  %s4492_s3 = inlined_call_operand.vmem [shape: bf16[288,32], index: 3, kind: input, shape index: {}]   ;;  %s4493_s4 = inlined_call_operand.vmem [shape: f32[1,32], index: 4, kind: input, shape index: {}]   ;;  %s4494_s5 = inlined_call_operand.vmem [shape: bf16[32,128], index: 5, kind: input, shape index: {}]   ;;  %s4495_s6 = inlined_call_operand.vmem [shape: f32[1,128], index: 6, kind: input, shape index: {}]   ;;  %s4496_s7 = inlined_call_operand.hbm [shape: f32[2,16,16,128], index: 7, kind: output, shape index: {}]  }
   0x1   :  { %4515 = sst [smem:[#allocation37_spill]] %s4496_s7 }
   0x2   :  { %12 = vsyncpa [#allocation6], 0 }
   0x3   :  { %14 = vsyncpa [#allocation6 + $0x1], 0  ;;  %s3489_s24 = smov 0   ;;  %s3491_s25 = smov 0  }
   0x4   :  { %s3493_s26 = smov 0   ;;  %s3495_s27 = smov 0  }
   0x5   :  { %s3497_s28 = smov 0   ;;  %s3499_s29 = smov 0  }
   0x6   :  { %s3501_s30 = smov 0   ;;  %s3503_s8 = smov 0  }
   0x7 LB: > { %4516 = sst [smem:[#allocation25_spill]] %s3412_s24  ;;  %s2703_s9 = sadd.s32 4294967295, %s3440_s8   ;;  %s3440_s8 = sphi %s3503_s8, %s20_s8   ;;  %s3436_s30 = sphi %s3501_s30, %s4562_s30   ;;  %s3432_s29 = sphi %s3499_s29, %s4561_s29   ;;  %s3428_s28 = sphi %s3497_s28, %s4560_s28   ;;  %s3424_s27 = sphi %s3495_s27, %s4559_s27   ;;  %s3420_s26 = sphi %s3493_s26, %s4558_s26   ;;  %s3416_s25 = sphi %s3491_s25, %s4557_s25   ;;  %s3412_s24 = sphi %s3489_s24, %s4556_s24  }
   0x8   : > { %4517 = sst [smem:[#allocation26_spill]] %s3416_s25  ;;  %s2704_s10 = sadd.s32 4294967294, %s3440_s8  }
   0x9   : > { %4518 = sst [smem:[#allocation27_spill]] %s3420_s26  ;;  %s29_s11 = sadd.s32 1, %s3432_s29 }
   0xa   : > { %4519 = sst [smem:[#allocation28_spill]] %s3428_s28  ;;  %p30_p0 = scmp.ge.s32.totalorder %s29_s11, 2 }
   0xb   : > { %4520 = sst [smem:[#allocation29_spill]] %s3432_s29  ;;  %s32_s12 = sadd.s32 1, %s3436_s30 }
   0xc   : > { %4521 = sst [smem:[#allocation30_spill]] %s3436_s30  ;;  %p177_p1 = scmp.ne.s32.totalorder %s3420_s26, %s3416_s25 }
   0xd   : > { %4522 = sst [smem:[#allocation31_spill]] %s3440_s8  ;;  %p178_p2 = scmp.eq.s32.totalorder %s2703_s9, 3 }
   0xe   : > { %s4564_s11 = smov (%p30_p0, %s29_s11), 0  ;;  %s4566_s12 = smov (!%p30_p0, %s32_s12), %s3436_s30 }
   0xf   : > { %4523 = sst [smem:[#allocation32_spill]] %s4564_s11  ;;  %s163_s13 = ssub.s32 %s3432_s29, %s4564_s11 }
  0x10   : > { %p3540_p3 = por %p178_p2, %p177_p1  ;;  %p34_p4 = scmp.ge.s32.totalorder %s4566_s12, 2 }
  0x11   : > { %p183_p5 = scmp.ne.s32.totalorder %s3416_s25, %s3412_s24  ;;  %p184_p6 = scmp.eq.s32.totalorder %s2704_s10, 3 }
  0x12   : > { %s4524_s14 = scalar_select %p3540_p3, 1, 0 }
  0x13   : > { %p2706_p7 = scmp.ge.s32.totalorder %s3440_s8, 1  ;;  %s4568_s12 = smov (%p34_p4, %s4566_s12), 0 }
  0x14   : > { %4525 = sst [smem:[#allocation33_spill]] %s4524_s14  ;;  %p3549_p8 = por %p184_p6, %p183_p5 }
  0x15   : > { %4526 = sst [smem:[#allocation34_spill]] %s4568_s12  ;;  %p220_p9 = scmp.lt.s32.totalorder %s3440_s8, 5 }
  0x16   : > { %s4527_s15 = scalar_select %p3549_p8, 1, 0 }
  0x17   : > { %s162_s16 = ssub.s32 %s3436_s30, %s4568_s12  ;;  %s167_s17 = sadd.s32 1, %s3420_s26 }
  0x18   : > { %4528 = sst [smem:[#allocation35_spill]] %s4527_s15  ;;  %s164_s18 = sor.u32 %s163_s13, %s162_s16 }
  0x19   : > { %p221_p10 = pnand %p2706_p7, %p220_p9  ;;  %p165_p11 = scmp.eq.s32.totalorder %s164_s18, 0 }
  0x1a   : > { %s4500_s20 = sand.u32 (!%p221_p10), 1, %s3416_s25   ;;  %s3562_s21 = sand.u32 (!%p221_p10), 1, %s3424_s27 }
  0x1b   : > { %s3558_s19 = scalar_select %p165_p11, %s3420_s26, %s167_s17  }
  0x1c   : > { %224 = sbr.rel (%p221_p10) target bundleno = 1168 (0x490), region = 44  ;;  %s3566_s22 = sshll.u32 (!%p221_p10), %s4500_s20, 7 }
  0x1d   : > { %4529 = sst [smem:[#allocation36_spill]] %s3558_s19  ;;  %p2708_p12 = scmp.ne.s32.totalorder (!%p221_p10), %s3424_s27, 0 }
  0x1e   : > { %p3059_p13 = scmp.eq.s32.totalorder (!%p221_p10), %s3424_s27, 0  ;;  %s2893_s23 = sshll.u32 (!%p221_p10), %s3424_s27, 7 }
  0x1f   : > { %s3572_s9 = sshll.u32 (!%p221_p10), %s3428_s28, 8  ;;  %s257_s13 = smul.u32 (!%p221_p10), 160, %s3562_s21 }
  0x20   : > { %s255_s10 = sadd.s32 (!%p221_p10), %s2893_s23, %s3572_s9  ;;  %s260_s12 = smul.u32 (!%p221_p10), 3, %s3562_s21 }
  0x21   : > { %s3579_s18 = scalar_lea.hbm %s4489_s0, %s255_s10  ;;  %s3583_s30 = scalar_lea.vmem [#allocation2], %s257_s13 }
  0x22   : > { %s269_s11 = sshll.u32 %s3579_s18, 4  ;;  %s2598_s20 = scalar_lea.vmem %s3583_s30, 16 [#allocation2]  ;;  %s270_s11 = int_to_ptr.hbm [resolvable:$true] %s269_s11 }
  0x23   : > { %s271_s29 = sshll.u32 %s2598_s20, 4  ;;  %s4507_s19 = sshll.u32 %s3424_s27, 3  ;;  %s272_s29 = int_to_ptr.vmem [resolvable:$true] %s271_s29 }
  0x24   : > { %s3587_s26 = scalar_lea.sflag [#allocation4], %s260_s12  ;;  %s3160_s23 = sshra.s32 %s270_s11, 4  ;;  %s3161_s23 = int_to_ptr.hbm [resolvable:$true] %s3160_s23 }
  0x25   : > { %s3162_s15 = scalar_lea.hbm %s3161_s23, 128  ;;  %s3594_s13 = scalar_lea.hbm %s4489_s0, 512 }
  0x26   : > { %p3163_p0 = scmp.ne.s32.totalorder %s3161_s23, %s3162_s15  ;;  %p3167_p4 = scmp.lt.s32.totalorder %s3161_s23, %s4489_s0 }
  0x27   : > { %p3168_p5 = scmp.lt.s32.totalorder %s3594_s13, %s3162_s15 }
  0x28   : > { %p3164_p1 = pnand %p3163_p0, %p3059_p13 }
  0x29   : > { %p3169_p6 = por %p3168_p5, %p3167_p4 }
  0x2a   : > { %p3165_p2 = pneg %p3164_p1 }
  0x2c   : > { %p3170_p7 = pnand %p3169_p6, %p3165_p2 }
  0x2e   : > { %3173 = shalt.err (!%p3170_p7)  }
  0x2f   : > { %3040 = dma.hbm_to_vmem [thread:$0]  (%p3059_p13), %s270_s11, 2048, %s272_s29, %s3587_s26 }
  0x30   : > { %p4514_p9 = scmp.gt.s32.totalorder %s3424_s27, 0  ;;  %s2713_s24 = sadd.s32 4294967295, %s4507_s19 }
  0x31   : > { %s3607_s12 = scalar_lea.sflag %s3587_s26, 1 [#allocation4]  ;;  %s2714_s15 = sshll.u32 %s2713_s24, 4 }
  0x32   : > { %s295_s20 = sshll.u32 %s3583_s30, 4  ;;  %s281_s23 = sadd.s32 %s2714_s15, %s3572_s9  ;;  %s296_s20 = int_to_ptr.vmem [resolvable:$true] %s295_s20 }
  0x33   : > { %s282_s17 = scalar_lea.hbm %s4489_s0, %s281_s23  ;;  %p3618_p10 = pnand %p4514_p9, %p3059_p13 }
  0x34   : > { %s293_s29 = sshll.u32 %s282_s17, 4  ;;  %s294_s29 = int_to_ptr.hbm [resolvable:$true] %s293_s29 }
  0x35   : > { %s3188_s11 = sshra.s32 %s294_s29, 4  ;;  %p3192_p0 = pneg %p3618_p10  ;;  %s3189_s11 = int_to_ptr.hbm [resolvable:$true] %s3188_s11 }
  0x36   : > { %s3190_s24 = scalar_lea.hbm %s3189_s11, 16  ;;  %p3196_p4 = scmp.lt.s32.totalorder %s3189_s11, %s4489_s0 }
  0x37   : > { %p3191_p11 = scmp.ne.s32.totalorder %s3189_s11, %s3190_s24  ;;  %p3197_p5 = scmp.lt.s32.totalorder %s3594_s13, %s3190_s24 }
  0x39   : > { %p3193_p1 = pnand %p3192_p0, %p3191_p11  ;;  %p3198_p6 = por %p3197_p5, %p3196_p4 }
  0x3b   : > { %p3194_p2 = pneg %p3193_p1 }
  0x3d   : > { %p3199_p7 = pnand %p3198_p6, %p3194_p2 }
  0x3f   : > { %3202 = shalt.err (!%p3199_p7)  }
  0x40   : > { %3043 = dma.hbm_to_vmem [thread:$0]  (!%p3618_p10), %s294_s29, 256, %s296_s20, %s3607_s12 }
  0x41   : > { %p4510_p11 = scmp.lt.s32.totalorder %s3424_s27, 1  ;;  %s2615_s23 = scalar_lea.hbm %s3579_s18, 128 }
  0x42   : > { %s2618_s16 = scalar_lea.vmem %s3583_s30, 144 [#allocation2]  ;;  %s3635_s17 = scalar_lea.sflag %s3587_s26, 2 [#allocation4] }
  0x43   : > { %s318_s11 = sshll.u32 %s2615_s23, 4  ;;  %s320_s24 = sshll.u32 %s2618_s16, 4  ;;  %s3637_s11 = int_to_ptr.hbm [resolvable:$true] %s318_s11  ;;  %s321_s24 = int_to_ptr.vmem [resolvable:$true] %s320_s24 }
  0x44   : > { %p3643_p0 = pnand %p4510_p11, %p3059_p13  ;;  %s3648_s20 = sadd.s32 1, %s3424_s27 }
  0x45   : > { %p3062_p10 = scmp.lt.s32.totalorder %s3648_s20, 2  ;;  %s329_s29 = ssub.s32 1, %s3562_s21 }
  0x46   : > { %s3218_s15 = sshra.s32 %s3637_s11, 4  ;;  %p3222_p2 = pneg %p3643_p0  ;;  %s3219_s15 = int_to_ptr.hbm [resolvable:$true] %s3218_s15 }
  0x47   : > { %s3220_s10 = scalar_lea.hbm %s3219_s15, 16  ;;  %p3226_p13 = scmp.lt.s32.totalorder %s3219_s15, %s4489_s0 }
  0x48   : > { %p3221_p1 = scmp.ne.s32.totalorder %s3219_s15, %s3220_s10  ;;  %p3227_p6 = scmp.lt.s32.totalorder %s3594_s13, %s3220_s10 }
  0x4a   : > { %p3223_p4 = pnand %p3222_p2, %p3221_p1  ;;  %p3228_p7 = por %p3227_p6, %p3226_p13 }
  0x4c   : > { %p3224_p5 = pneg %p3223_p4 }
  0x4e   : > { %p3229_p11 = pnand %p3228_p7, %p3224_p5 }
  0x50   : > { %3232 = shalt.err (!%p3229_p11)  }
  0x51   : > { %3046 = dma.hbm_to_vmem [thread:$0]  (!%p3643_p0), %s3637_s11, 256, %s321_s24, %s3635_s17 }
  0x52   : > { %s335_s21 = smul.u32 160, %s329_s29  ;;  %s4532_s16 = sshll.u32 %s3424_s27, 3 }
  0x53   : > { %s338_s23 = smul.u32 3, %s329_s29  ;;  %s2896_s10 = sadd.s32 8, %s4532_s16 }
  0x54   : > { %s3669_s7 = scalar_lea.vmem [#allocation2], %s335_s21  ;;  %p3063_p1 = scmp.gt.s32.totalorder %s3648_s20, 0 }
  0x55   : > { %s2629_s14 = scalar_lea.vmem %s3669_s7, 16 [#allocation2]  ;;  %s2725_s25 = sadd.s32 4294967295, %s2896_s10 }
  0x56   : > { %s349_s19 = sshll.u32 %s2629_s14, 4  ;;  %s3673_s8 = scalar_lea.sflag [#allocation4], %s338_s23  ;;  %s350_s19 = int_to_ptr.vmem [resolvable:$true] %s349_s19 }
  0x57   : > { %s3250_s28 = scalar_lea.hbm %s3219_s15, 128 }
  0x58   : > { %p3251_p11 = scmp.ne.s32.totalorder %s3219_s15, %s3250_s28  ;;  %p3256_p0 = scmp.lt.s32.totalorder %s3594_s13, %s3250_s28 }
  0x5a   : > { %p3252_p2 = pnand %p3251_p11, %p3062_p10  ;;  %p3257_p5 = por %p3256_p0, %p3226_p13 }
  0x5c   : > { %p3253_p4 = pneg %p3252_p2 }
  0x5e   : > { %p3258_p6 = pnand %p3257_p5, %p3253_p4 }
  0x60   : > { %3261 = shalt.err (!%p3258_p6)  }
  0x61   : > { %3048 = dma.hbm_to_vmem [thread:$0]  (%p3062_p10), %s3637_s11, 2048, %s350_s19, %s3673_s8 }
  0x62   : > { %s2726_s28 = sshll.u32 %s2725_s25, 4  ;;  %s2640_s21 = scalar_lea.sflag %s3673_s8, 1 [#allocation4] }
  0x63   : > { %s359_s23 = sadd.s32 %s2726_s28, %s3572_s9  ;;  %s373_s16 = sshll.u32 %s3669_s7, 4  ;;  %s374_s16 = int_to_ptr.vmem [resolvable:$true] %s373_s16 }
  0x64   : > { %s360_s14 = scalar_lea.hbm %s4489_s0, %s359_s23  ;;  %p3696_p13 = pnand %p3063_p1, %p3062_p10 }
  0x65   : > { %s371_s24 = sshll.u32 %s360_s14, 4  ;;  %p3064_p7 = scmp.lt.s32.totalorder %s3648_s20, 1  ;;  %s372_s24 = int_to_ptr.hbm [resolvable:$true] %s371_s24 }
  0x66   : > { %s2646_s25 = scalar_lea.hbm %s3579_s18, 256  ;;  %s3276_s11 = sshra.s32 %s372_s24, 4  ;;  %s3277_s11 = int_to_ptr.hbm [resolvable:$true] %s3276_s11 }
  0x67   : > { %s3278_s9 = scalar_lea.hbm %s3277_s11, 16  ;;  %p3280_p2 = pneg %p3696_p13 }
  0x68   : > { %p3279_p11 = scmp.ne.s32.totalorder %s3277_s11, %s3278_s9  ;;  %p3284_p5 = scmp.lt.s32.totalorder %s3277_s11, %s4489_s0 }
  0x69   : > { %p3285_p1 = scmp.lt.s32.totalorder %s3594_s13, %s3278_s9 }
  0x6a   : > { %p3281_p4 = pnand %p3280_p2, %p3279_p11 }
  0x6b   : > { %p3286_p6 = por %p3285_p1, %p3284_p5 }
  0x6c   : > { %p3282_p0 = pneg %p3281_p4 }
  0x6e   : > { %p3287_p9 = pnand %p3286_p6, %p3282_p0 }
  0x70   : > { %3290 = shalt.err (!%p3287_p9)  }
  0x71   : > { %3051 = dma.hbm_to_vmem [thread:$0]  (!%p3696_p13), %s372_s24, 256, %s374_s16, %s2640_s21 }
  0x72   : > { %s2649_s18 = scalar_lea.vmem %s3669_s7, 144 [#allocation2]  ;;  %s396_s23 = sshll.u32 %s2646_s25, 4  ;;  %s397_s23 = int_to_ptr.hbm [resolvable:$true] %s396_s23 }
  0x73   : > { %s398_s15 = sshll.u32 %s2649_s18, 4  ;;  %s2652_s10 = scalar_lea.sflag %s3673_s8, 2 [#allocation4]  ;;  %s399_s15 = int_to_ptr.vmem [resolvable:$true] %s398_s15 }
  0x74   : > { %p3052_p11 = pnand %p3064_p7, %p3062_p10  ;;  %s3306_s14 = sshra.s32 %s397_s23, 4  ;;  %s3307_s14 = int_to_ptr.hbm [resolvable:$true] %s3306_s14 }
  0x75   : > { %s3308_s11 = scalar_lea.hbm %s3307_s14, 16  ;;  %p3314_p13 = scmp.lt.s32.totalorder %s3307_s14, %s4489_s0 }
  0x76   : > { %p3309_p9 = scmp.ne.s32.totalorder %s3307_s14, %s3308_s11  ;;  %p3310_p2 = pneg %p3052_p11 }
  0x77   : > { %p3315_p5 = scmp.lt.s32.totalorder %s3594_s13, %s3308_s11 }
  0x78   : > { %p3311_p4 = pnand %p3310_p2, %p3309_p9 }
  0x79   : > { %p3316_p1 = por %p3315_p5, %p3314_p13 }
  0x7a   : > { %p3312_p0 = pneg %p3311_p4 }
  0x7c   : > { %p3317_p6 = pnand %p3316_p1, %p3312_p0 }
  0x7e   : > { %3320 = shalt.err (!%p3317_p6)  }
  0x7f   : > { %3054 = dma.hbm_to_vmem [thread:$0]  (!%p3052_p11), %s397_s23, 256, %s399_s15, %s2652_s10 }
  0x80   : > { %s3721_s7 = scalar_lea.vmem [#allocation5], %s3566_s22  ;;  %404 = sbr.rel (%p2708_p12) target bundleno = 156 (0x9c), region = 96 }
  0x85   : > { %vm405_vm0 = vcmask 253952   ;;  %vm406_vm1 = vsmask.f32 256  ;;  %v408_v0 = vld [vmem:[#allocation3] sm:$0x1] }
  0x86   : > { %vm3726_vm2 = vmand %vm405_vm0, %vm406_vm1  ;;  %v411_v2 = vld [vmem:[#allocation3 + $0xc] sm:$0x1]  ;;  %v414_v3 = vld [vmem:[#allocation3 + $0x18] sm:$0x1]  ;;  %vm438_vm3 = vsmask.f32 7938 }
  0x87   : > { %v409_v4 = vsel %vm3726_vm2, 0, %v408_v0  ;;  %v412_v5 = vsel %vm3726_vm2, 0, %v411_v2  ;;  %v415_v6 = vsel %vm3726_vm2, 0, %v414_v3  ;;  %v417_v7 = vld [vmem:[#allocation3 + $0x24] sm:$0x1]  ;;  %vm3748_vm4 = vmand %vm405_vm0, %vm438_vm3 }
  0x88   : > { %410 = vst [vmem:[#allocation3] sm:$0x1] %v409_v4  ;;  %v418_v8 = vsel %vm3726_vm2, 0, %v417_v7  ;;  %v420_v9 = vld [vmem:[#allocation3 + $0x30] sm:$0x1] }
  0x89   : > { %413 = vst [vmem:[#allocation3 + $0xc] sm:$0x1] %v412_v5  ;;  %v421_v10 = vsel %vm3726_vm2, 0, %v420_v9  ;;  %v423_v11 = vld [vmem:[#allocation3 + $0x3c] sm:$0x1] }
  0x8a   : > { %416 = vst [vmem:[#allocation3 + $0x18] sm:$0x1] %v415_v6  ;;  %v424_v12 = vsel %vm3726_vm2, 0, %v423_v11  ;;  %v426_v13 = vld [vmem:[#allocation3 + $0x48] sm:$0x1] }
  0x8b   : > { %419 = vst [vmem:[#allocation3 + $0x24] sm:$0x1] %v418_v8  ;;  %v427_v14 = vsel %vm3726_vm2, 0, %v426_v13  ;;  %v429_v15 = vld [vmem:[#allocation3 + $0x54] sm:$0x1] }
  0x8c   : > { %422 = vst [vmem:[#allocation3 + $0x30] sm:$0x1] %v421_v10  ;;  %v430_v16 = vsel %vm3726_vm2, 0, %v429_v15  ;;  %v432_v17 = vld [vmem:[#allocation3 + $0x60] sm:$0x1] }
  0x8d   : > { %425 = vst [vmem:[#allocation3 + $0x3c] sm:$0x1] %v424_v12  ;;  %v433_v19 = vsel %vm3726_vm2, 0, %v432_v17  ;;  %v435_v20 = vld [vmem:[#allocation3 + $0x6c] sm:$0x1] }
  0x8e   : > { %428 = vst [vmem:[#allocation3 + $0x48] sm:$0x1] %v427_v14  ;;  %v436_v21 = vsel %vm3726_vm2, 0, %v435_v20  ;;  %v440_v22 = vld [vmem:[#allocation3 + $0x8] sm:$0x1] }
  0x8f   : > { %431 = vst [vmem:[#allocation3 + $0x54] sm:$0x1] %v430_v16  ;;  %v441_v23 = vsel %vm3748_vm4, 0, %v440_v22  ;;  %v443_v24 = vld [vmem:[#allocation3 + $0x14] sm:$0x1] }
  0x90   : > { %434 = vst [vmem:[#allocation3 + $0x60] sm:$0x1] %v433_v19  ;;  %v444_v25 = vsel %vm3748_vm4, 0, %v443_v24  ;;  %v446_v26 = vld [vmem:[#allocation3 + $0x20] sm:$0x1] }
  0x91   : > { %437 = vst [vmem:[#allocation3 + $0x6c] sm:$0x1] %v436_v21  ;;  %v447_v27 = vsel %vm3748_vm4, 0, %v446_v26  ;;  %v449_v28 = vld [vmem:[#allocation3 + $0x2c] sm:$0x1] }
  0x92   : > { %442 = vst [vmem:[#allocation3 + $0x8] sm:$0x1] %v441_v23  ;;  %v450_v29 = vsel %vm3748_vm4, 0, %v449_v28  ;;  %v452_v30 = vld [vmem:[#allocation3 + $0x38] sm:$0x1] }
  0x93   : > { %445 = vst [vmem:[#allocation3 + $0x14] sm:$0x1] %v444_v25  ;;  %v453_v31 = vsel %vm3748_vm4, 0, %v452_v30  ;;  %v455_v32 = vld [vmem:[#allocation3 + $0x44] sm:$0x1] }
  0x94   : > { %448 = vst [vmem:[#allocation3 + $0x20] sm:$0x1] %v447_v27  ;;  %v456_v33 = vsel %vm3748_vm4, 0, %v455_v32  ;;  %v458_v34 = vld [vmem:[#allocation3 + $0x50] sm:$0x1] }
  0x95   : > { %451 = vst [vmem:[#allocation3 + $0x2c] sm:$0x1] %v450_v29  ;;  %v459_v35 = vsel %vm3748_vm4, 0, %v458_v34  ;;  %v461_v36 = vld [vmem:[#allocation3 + $0x5c] sm:$0x1] }
  0x96   : > { %454 = vst [vmem:[#allocation3 + $0x38] sm:$0x1] %v453_v31  ;;  %v462_v37 = vsel %vm3748_vm4, 0, %v461_v36  ;;  %v464_v38 = vld [vmem:[#allocation3 + $0x68] sm:$0x1] }
  0x97   : > { %457 = vst [vmem:[#allocation3 + $0x44] sm:$0x1] %v456_v33  ;;  %v465_v39 = vsel %vm3748_vm4, 0, %v464_v38  ;;  %v467_v40 = vld [vmem:[#allocation3 + $0x74] sm:$0x1] }
  0x98   : > { %460 = vst [vmem:[#allocation3 + $0x50] sm:$0x1] %v459_v35  ;;  %v468_v41 = vsel %vm3748_vm4, 0, %v467_v40 }
  0x99   : > { %463 = vst [vmem:[#allocation3 + $0x5c] sm:$0x1] %v462_v37 }
  0x9a   : > { %466 = vst [vmem:[#allocation3 + $0x68] sm:$0x1] %v465_v39 }
  0x9b   : > { %469 = vst [vmem:[#allocation3 + $0x74] sm:$0x1] %v468_v41 }
  0x9c PF: > { %3396 = dma.done.wait %s3587_s26, 2048 }
  0x9d   : > { %3397 = vsyncadd %s3587_s26, 4294965248  ;;  %p4538_p10 = scmp.gt.s32.totalorder %s3424_s27, 0 }
  0x9f   : > { %3399 = dma.done.wait (%p4538_p10), %s3607_s12, 256  ;;  %p4539_p7 = pmov %p4538_p10 }
  0xa0   : > { %p4540_p11 = scmp.lt.s32.totalorder %s3424_s27, 1 }
  0xa1   : > { %3401 = vsyncadd (%p4539_p7), %s3607_s12, 4294967040 }
  0xa2   : > { %3403 = dma.done.wait (%p4540_p11), %s3635_s17, 256  ;;  %p4541_p9 = pmov %p4540_p11 }
  0xa3   : > { %v2905_v42 = vld [vmem:[%s4490_s1 + $0x38] sm:$0xff]  ;;  %v2904_v43 = vld [vmem:[%s4490_s1 + $0x30] sm:$0xff]  ;;  %v2903_v44 = vld [vmem:[%s4490_s1 + $0x28] sm:$0xff]  ;;  %vm970_vm5 = vcmask 257024   ;;  %vm971_vm6 = vsmask.f32 7938 }
  0xa4   : > { %3405 = vsyncadd (%p4541_p9), %s3635_s17, 4294967040  ;;  %668 = vmatpush.bf16.msra.mxu0 %v2905_v42  ;;  %v2902_v45 = vld [vmem:[%s4490_s1 + $0x20] sm:$0xff]  ;;  %v2901_v46 = vld [vmem:[%s4490_s1 + $0x18] sm:$0xff]  ;;  %vm767_vm8 = vsmask.f32 256  ;;  %vm978_vm10 = vcmask 253952  }
  0xa5   : > { %v2900_v47 = vld [vmem:[%s4490_s1 + $0x10] sm:$0xff]  ;;  %v500_v48 = vld [vmem:[%s3583_s30] sm:$0xff]  ;;  %v501_v49 = vld [vmem:[%s3583_s30 + $0x8] sm:$0xff]  ;;  %vm768_vm9 = vsmask.f32 4368 }
  0xa6   : > { %v520_v50 = vpack.c.bf16 %v500_v48, %v500_v48  ;;  %v521_v51 = vpack.c.bf16 %v501_v49, %v501_v49  ;;  %v2899_v52 = vld [vmem:[%s4490_s1 + $0x8] sm:$0xff]  ;;  %v2898_v55 = vld [vmem:[%s4490_s1] sm:$0xff]  ;;  %v502_v57 = vld [vmem:[%s3583_s30 + $0x10] sm:$0xff] }
  0xa7   : > { %v503_v58 = vld [vmem:[%s3583_s30 + $0x18] sm:$0xff]  ;;  %v522_v59 = vpack.c.bf16 %v502_v57, %v502_v57  ;;  %v504_v0 = vld [vmem:[%s3583_s30 + $0x20] sm:$0xff]  ;;  %v505_v1 = vld [vmem:[%s3583_s30 + $0x28] sm:$0xff] }
  0xa8   : > { %669 = vmatpush.bf16.msra.mxu0 %v2904_v43  ;;  %v580_v53 = vunpack.c.l.b16 %v520_v50  ;;  %v581_v54 = vunpack.c.l.b16 %v521_v51  ;;  %v523_v60 = vpack.c.bf16 %v503_v58, %v503_v58  ;;  %v524_v2 = vpack.c.bf16 %v504_v0, %v504_v0  ;;  %v506_v7 = vld [vmem:[%s3583_s30 + $0x30] sm:$0xff]  ;;  %v507_v8 = vld [vmem:[%s3583_s30 + $0x38] sm:$0xff]  ;;  %v508_v14 = vld [vmem:[%s3583_s30 + $0x40] sm:$0xff] }
  0xa9   : > { %v582_v61 = vunpack.c.l.b16 %v522_v59  ;;  %v525_v3 = vpack.c.bf16 %v505_v1, %v505_v1  ;;  %v526_v9 = vpack.c.bf16 %v506_v7, %v506_v7  ;;  %v527_v10 = vpack.c.bf16 %v507_v8, %v507_v8  ;;  %v509_v15 = vld [vmem:[%s3583_s30 + $0x48] sm:$0xff]  ;;  %v510_v21 = vld [vmem:[%s3583_s30 + $0x50] sm:$0xff]  ;;  %v511_v22 = vld [vmem:[%s3583_s30 + $0x58] sm:$0xff] }
  0xaa   : > { %v600_v56 = vpack.c.b16 %v581_v54, %v580_v53  ;;  %v583_v62 = vunpack.c.l.b16 %v523_v60  ;;  %v584_v4 = vunpack.c.l.b16 %v524_v2  ;;  %v528_v16 = vpack.c.bf16 %v508_v14, %v508_v14  ;;  %v512_v28 = vld [vmem:[%s3583_s30 + $0x60] sm:$0xff]  ;;  %v513_v29 = vld [vmem:[%s3583_s30 + $0x68] sm:$0xff]  ;;  %v514_v35 = vld [vmem:[%s3583_s30 + $0x70] sm:$0xff] }
  0xab   : > { %v585_v5 = vunpack.c.l.b16 %v525_v3  ;;  %v586_v11 = vunpack.c.l.b16 %v526_v9  ;;  %v587_v12 = vunpack.c.l.b16 %v527_v10  ;;  %v529_v17 = vpack.c.bf16 %v509_v15, %v509_v15  ;;  %v515_v36 = vld [vmem:[%s3583_s30 + $0x78] sm:$0xff]  ;;  %v516_v42 = vld [vmem:[%s3583_s30 + $0x80] sm:$0xff]  ;;  %v517_v43 = vld [vmem:[%s3583_s30 + $0x88] sm:$0xff] }
  0xac   : > { %670 = vmatpush.bf16.msra.mxu0 %v2903_v44  ;;  %v601_v63 = vpack.c.b16 %v583_v62, %v582_v61  ;;  %v588_v18 = vunpack.c.l.b16 %v528_v16  ;;  %v530_v23 = vpack.c.bf16 %v510_v21, %v510_v21  ;;  %v531_v24 = vpack.c.bf16 %v511_v22, %v511_v22  ;;  %v3835_v48 = vld [vmem:[%s4491_s2] ss:$0 sm:$0xff]  ;;  %v518_v53 = vld [vmem:[%s3583_s30 + $0x90] sm:$0xff]  ;;  %v519_v54 = vld [vmem:[%s3583_s30 + $0x98] sm:$0xff] }
  0xad   : > { %v602_v6 = vpack.c.b16 %v585_v5, %v584_v4  ;;  %v603_v13 = vpack.c.b16 %v587_v12, %v586_v11  ;;  %v589_v19 = vunpack.c.l.b16 %v529_v17  ;;  %v532_v30 = vpack.c.bf16 %v512_v28, %v512_v28  ;;  %vm3842_vm7 = vmand %vm970_vm5, %vm971_vm6  ;;  %v973_v0 = vld [vmem:[#allocation3] sm:$0xf]  ;;  %v980_v15 = vld [vmem:[#allocation3 + $0x8] sm:$0x1] }
  0xae   : > { %v590_v25 = vunpack.c.l.b16 %v530_v23  ;;  %v591_v26 = vunpack.c.l.b16 %v531_v24  ;;  %v533_v31 = vpack.c.bf16 %v513_v29, %v513_v29  ;;  %v534_v37 = vpack.c.bf16 %v514_v35, %v514_v35  ;;  %vm3848_vm11 = vmor %vm767_vm8, %vm768_vm9  ;;  %v983_v28 = vld [vmem:[#allocation3 + $0xc] sm:$0xf] }
  0xaf   : > { %v604_v20 = vpack.c.b16 %v589_v19, %v588_v18  ;;  %v592_v32 = vunpack.c.l.b16 %v532_v30  ;;  %v535_v38 = vpack.c.bf16 %v515_v36, %v515_v36  ;;  %v536_v44 = vpack.c.bf16 %v516_v42, %v516_v42  ;;  %vm3854_vm12 = vmand %vm978_vm10, %vm767_vm8 }
  0xb0   : > { %671 = vmatpush.bf16.msra.mxu0 %v2902_v45  ;;  %v605_v27 = vpack.c.b16 %v591_v26, %v590_v25  ;;  %v593_v33 = vunpack.c.l.b16 %v533_v31  ;;  %v594_v39 = vunpack.c.l.b16 %v534_v37  ;;  %v537_v45 = vpack.c.bf16 %v517_v43, %v517_v43 }
  0xb1   : > { %v595_v40 = vunpack.c.l.b16 %v535_v38  ;;  %v538_v57 = vpack.c.bf16 %v518_v53, %v518_v53  ;;  %v539_v58 = vpack.c.bf16 %v519_v54, %v519_v54  ;;  %v987_v38 = vld [vmem:[#allocation3 + $0x14] sm:$0x1] }
  0xb2   : > { %v606_v34 = vpack.c.b16 %v593_v33, %v592_v32 }
  0xb3   : > { %v607_v41 = vpack.c.b16 %v595_v40, %v594_v39  ;;  %v598_v3 = vunpack.c.l.b16 %v538_v57  ;;  %v599_v4 = vunpack.c.l.b16 %v539_v58 }
  0xb4   : > { %672 = vmatpush.bf16.msra.mxu0 %v2901_v46  ;;  %v596_v46 = vunpack.c.l.b16 %v536_v44 }
  0xb5   : > { %v609_v8 = vpack.c.b16 %v599_v4, %v598_v3 }
  0xb8   : > { %673 = vmatpush.bf16.msra.mxu0 %v2900_v47  ;;  %v597_v47 = vunpack.c.l.b16 %v537_v45 }
  0xba   : > { %v608_v49 = vpack.c.b16 %v597_v47, %v596_v46 }
  0xbc   : > { %674 = vmatpush.bf16.msra.mxu0 %v2899_v52 }
  0xc0   : > { %675 = vmatpush.bf16.msra.mxu0 %v2898_v55 }
  0xc3   : > { %676 = vmatmul.bf16.vlgmr.msra.gmra.mxu0 %v600_v56 }
  0xd3   : > { %681 = vmatmul.bf16.gmra.mxu0 %v601_v63 }
  0xe3   : > { %686 = vmatmul.bf16.gmra.mxu0 %v602_v6 }
  0xf3   : > { %691 = vmatmul.bf16.gmra.mxu0 %v603_v13 }
 0x103   : > { %696 = vmatmul.bf16.gmra.mxu0 %v604_v20 }
 0x113   : > { %701 = vmatmul.bf16.gmra.mxu0 %v605_v27 }
 0x123   : > { %706 = vmatmul.bf16.gmra.mxu0 %v606_v34 }
 0x133   : > { %711 = vmatmul.bf16.gmra.mxu0 %v607_v41 }
 0x140   : > { %v677_v50 = vpop.f32.mrf.mxu0 }
 0x141   : > { %v678_v51 = vadd.f32 %v3835_v48, %v677_v50 }
 0x143   : > { %v727_v52 = vmax.f32 %v678_v51, 0.0  ;;  %716 = vmatmul.bf16.gmra.mxu0 %v608_v49 }
 0x145   : > { %v747_v55 = vpack.c.bf16 %v727_v52, %v727_v52  ;;  %v990_v52 = vld [vmem:[#allocation3 + $0x18] sm:$0xf] }
 0x147   : > { %v771_v56 = vshrl.u32 %v747_v55, 16  ;;  %v774_v61 = vshll.u32 %v747_v55, 16 }
 0x148   : > { %v679_v59 = vpop.f32.mrf.mxu0 }
 0x149   : > { %v773_v60 = vrot.slane %v771_v56, 7  ;;  %v680_v62 = vadd.f32 %v3835_v48, %v679_v59 }
 0x14b   : > { %v776_v1 = vor.u32 %v774_v61, %v773_v60  ;;  %v728_v2 = vmax.f32 %v680_v62, 0.0  ;;  %v777_v16 = vrot.slane %v773_v60, 4  ;;  %v994_v62 = vld [vmem:[#allocation3 + $0x20] sm:$0x1] }
 0x14d   : > { %v974_v5 = vsel %vm3842_vm7, %v776_v1, %v973_v0  ;;  %v748_v6 = vpack.c.bf16 %v728_v2, %v728_v2 }
 0x14e   : > { %975 = vst [vmem:[#allocation3] sm:$0xf] %v974_v5 }
 0x14f   : > { %v779_v7 = vshrl.u32 %v748_v6, 16  ;;  %v782_v12 = vshll.u32 %v748_v6, 16 }
 0x150   : > { %v682_v9 = vpop.f32.mrf.mxu0 }
 0x151   : > { %v781_v11 = vrot.slane %v779_v7, 7  ;;  %v683_v13 = vadd.f32 %v3835_v48, %v682_v9 }
 0x153   : > { %v784_v17 = vor.u32 %v782_v12, %v781_v11  ;;  %v786_v18 = vrot.slane %v781_v11, 4  ;;  %v729_v19 = vmax.f32 %v683_v13, 0.0  ;;  %721 = vmatmul.bf16.gmra.mxu0 %v609_v8  ;;  %v997_v13 = vld [vmem:[#allocation3 + $0x24] sm:$0xf] }
 0x155   : > { %v785_v20 = vsel %vm3848_vm11, %v777_v16, %v784_v17  ;;  %v981_v21 = vsel %vm3854_vm12, %v786_v18, %v980_v15  ;;  %v749_v22 = vpack.c.bf16 %v729_v19, %v729_v19 }
 0x156   : > { %977 = vst.msk [vmem:[#allocation3 + $0x4] sm:$0xf] %vm970_vm5, %v785_v20 }
 0x157   : > { %982 = vst [vmem:[#allocation3 + $0x8] sm:$0x1] %v981_v21  ;;  %v788_v23 = vshrl.u32 %v749_v22, 16  ;;  %v791_v26 = vshll.u32 %v749_v22, 16 }
 0x158   : > { %v684_v24 = vpop.f32.mrf.mxu0 }
 0x159   : > { %v790_v25 = vrot.slane %v788_v23, 7  ;;  %v685_v27 = vadd.f32 %v3835_v48, %v684_v24  ;;  %v1001_v24 = vld [vmem:[#allocation3 + $0x2c] sm:$0x1] }
 0x15b   : > { %v793_v29 = vor.u32 %v791_v26, %v790_v25  ;;  %v730_v30 = vmax.f32 %v685_v27, 0.0  ;;  %v794_v39 = vrot.slane %v790_v25, 4 }
 0x15d   : > { %v984_v31 = vsel %vm3842_vm7, %v793_v29, %v983_v28  ;;  %v750_v32 = vpack.c.bf16 %v730_v30, %v730_v30 }
 0x15e   : > { %985 = vst [vmem:[#allocation3 + $0xc] sm:$0xf] %v984_v31 }
 0x15f   : > { %v796_v33 = vshrl.u32 %v750_v32, 16  ;;  %v799_v36 = vshll.u32 %v750_v32, 16 }
 0x160   : > { %v687_v34 = vpop.f32.mrf.mxu0 }
 0x161   : > { %v798_v35 = vrot.slane %v796_v33, 7  ;;  %v688_v37 = vadd.f32 %v3835_v48, %v687_v34 }
 0x163   : > { %v801_v40 = vor.u32 %v799_v36, %v798_v35  ;;  %v803_v41 = vrot.slane %v798_v35, 4  ;;  %v731_v42 = vmax.f32 %v688_v37, 0.0  ;;  %v1004_v37 = vld [vmem:[#allocation3 + $0x30] sm:$0xf] }
 0x165   : > { %v802_v43 = vsel %vm3848_vm11, %v794_v39, %v801_v40  ;;  %v988_v44 = vsel %vm3854_vm12, %v803_v41, %v987_v38  ;;  %v751_v45 = vpack.c.bf16 %v731_v42, %v731_v42 }
 0x166   : > { %986 = vst.msk [vmem:[#allocation3 + $0x10] sm:$0xf] %vm970_vm5, %v802_v43 }
 0x167   : > { %989 = vst [vmem:[#allocation3 + $0x14] sm:$0x1] %v988_v44  ;;  %v805_v46 = vshrl.u32 %v751_v45, 16  ;;  %v808_v50 = vshll.u32 %v751_v45, 16 }
 0x168   : > { %v689_v47 = vpop.f32.mrf.mxu0 }
 0x169   : > { %v807_v49 = vrot.slane %v805_v46, 7  ;;  %v690_v51 = vadd.f32 %v3835_v48, %v689_v47  ;;  %v1008_v47 = vld [vmem:[#allocation3 + $0x38] sm:$0x1] }
 0x16b   : > { %v810_v53 = vor.u32 %v808_v50, %v807_v49  ;;  %v732_v54 = vmax.f32 %v690_v51, 0.0  ;;  %v811_v0 = vrot.slane %v807_v49, 4 }
 0x16d   : > { %v991_v55 = vsel %vm3842_vm7, %v810_v53, %v990_v52  ;;  %v752_v56 = vpack.c.bf16 %v732_v54, %v732_v54 }
 0x16e   : > { %992 = vst [vmem:[#allocation3 + $0x18] sm:$0xf] %v991_v55 }
 0x16f   : > { %v813_v57 = vshrl.u32 %v752_v56, 16  ;;  %v816_v60 = vshll.u32 %v752_v56, 16 }
 0x170   : > { %v692_v58 = vpop.f32.mrf.mxu0 }
 0x171   : > { %v815_v59 = vrot.slane %v813_v57, 7  ;;  %v693_v61 = vadd.f32 %v3835_v48, %v692_v58 }
 0x173   : > { %v818_v1 = vor.u32 %v816_v60, %v815_v59  ;;  %v820_v2 = vrot.slane %v815_v59, 4  ;;  %v733_v3 = vmax.f32 %v693_v61, 0.0  ;;  %v1011_v61 = vld [vmem:[#allocation3 + $0x3c] sm:$0xf] }
 0x175   : > { %v819_v4 = vsel %vm3848_vm11, %v811_v0, %v818_v1  ;;  %v995_v5 = vsel %vm3854_vm12, %v820_v2, %v994_v62  ;;  %v753_v6 = vpack.c.bf16 %v733_v3, %v733_v3 }
 0x176   : > { %993 = vst.msk [vmem:[#allocation3 + $0x1c] sm:$0xf] %vm970_vm5, %v819_v4 }
 0x177   : > { %996 = vst [vmem:[#allocation3 + $0x20] sm:$0x1] %v995_v5  ;;  %v822_v7 = vshrl.u32 %v753_v6, 16  ;;  %v825_v11 = vshll.u32 %v753_v6, 16 }
 0x178   : > { %v694_v8 = vpop.f32.mrf.mxu0 }
 0x179   : > { %v824_v9 = vrot.slane %v822_v7, 7  ;;  %v695_v12 = vadd.f32 %v3835_v48, %v694_v8  ;;  %v1015_v8 = vld [vmem:[#allocation3 + $0x44] sm:$0x1] }
 0x17b   : > { %v827_v15 = vor.u32 %v825_v11, %v824_v9  ;;  %v734_v16 = vmax.f32 %v695_v12, 0.0  ;;  %v828_v25 = vrot.slane %v824_v9, 4 }
 0x17d   : > { %v998_v17 = vsel %vm3842_vm7, %v827_v15, %v997_v13  ;;  %v754_v18 = vpack.c.bf16 %v734_v16, %v734_v16 }
 0x17e   : > { %999 = vst [vmem:[#allocation3 + $0x24] sm:$0xf] %v998_v17 }
 0x17f   : > { %v830_v19 = vshrl.u32 %v754_v18, 16  ;;  %v833_v22 = vshll.u32 %v754_v18, 16 }
 0x180   : > { %v697_v20 = vpop.f32.mrf.mxu0 }
 0x181   : > { %v832_v21 = vrot.slane %v830_v19, 7  ;;  %v698_v23 = vadd.f32 %v3835_v48, %v697_v20 }
 0x183   : > { %v835_v26 = vor.u32 %v833_v22, %v832_v21  ;;  %v837_v27 = vrot.slane %v832_v21, 4  ;;  %v735_v28 = vmax.f32 %v698_v23, 0.0  ;;  %v1018_v23 = vld [vmem:[#allocation3 + $0x48] sm:$0xf] }
 0x185   : > { %v836_v29 = vsel %vm3848_vm11, %v828_v25, %v835_v26  ;;  %v1002_v30 = vsel %vm3854_vm12, %v837_v27, %v1001_v24  ;;  %v755_v31 = vpack.c.bf16 %v735_v28, %v735_v28 }
 0x186   : > { %1000 = vst.msk [vmem:[#allocation3 + $0x28] sm:$0xf] %vm970_vm5, %v836_v29 }
 0x187   : > { %1003 = vst [vmem:[#allocation3 + $0x2c] sm:$0x1] %v1002_v30  ;;  %v839_v32 = vshrl.u32 %v755_v31, 16  ;;  %v842_v35 = vshll.u32 %v755_v31, 16 }
 0x188   : > { %v699_v33 = vpop.f32.mrf.mxu0 }
 0x189   : > { %v841_v34 = vrot.slane %v839_v32, 7  ;;  %v700_v36 = vadd.f32 %v3835_v48, %v699_v33  ;;  %v1022_v33 = vld [vmem:[#allocation3 + $0x50] sm:$0x1] }
 0x18b   : > { %v844_v38 = vor.u32 %v842_v35, %v841_v34  ;;  %v736_v39 = vmax.f32 %v700_v36, 0.0  ;;  %v845_v49 = vrot.slane %v841_v34, 4 }
 0x18d   : > { %v1005_v40 = vsel %vm3842_vm7, %v844_v38, %v1004_v37  ;;  %v756_v41 = vpack.c.bf16 %v736_v39, %v736_v39 }
 0x18e   : > { %1006 = vst [vmem:[#allocation3 + $0x30] sm:$0xf] %v1005_v40 }
 0x18f   : > { %v847_v42 = vshrl.u32 %v756_v41, 16  ;;  %v850_v45 = vshll.u32 %v756_v41, 16 }
 0x190   : > { %v702_v43 = vpop.f32.mrf.mxu0 }
 0x191   : > { %v849_v44 = vrot.slane %v847_v42, 7  ;;  %v703_v46 = vadd.f32 %v3835_v48, %v702_v43 }
 0x193   : > { %v852_v50 = vor.u32 %v850_v45, %v849_v44  ;;  %v854_v51 = vrot.slane %v849_v44, 4  ;;  %v737_v52 = vmax.f32 %v703_v46, 0.0  ;;  %v1025_v46 = vld [vmem:[#allocation3 + $0x54] sm:$0xf] }
 0x195   : > { %v853_v53 = vsel %vm3848_vm11, %v845_v49, %v852_v50  ;;  %v1009_v54 = vsel %vm3854_vm12, %v854_v51, %v1008_v47  ;;  %v757_v55 = vpack.c.bf16 %v737_v52, %v737_v52 }
 0x196   : > { %1007 = vst.msk [vmem:[#allocation3 + $0x34] sm:$0xf] %vm970_vm5, %v853_v53 }
 0x197   : > { %1010 = vst [vmem:[#allocation3 + $0x38] sm:$0x1] %v1009_v54  ;;  %v856_v56 = vshrl.u32 %v757_v55, 16  ;;  %v859_v59 = vshll.u32 %v757_v55, 16 }
 0x198   : > { %v704_v57 = vpop.f32.mrf.mxu0 }
 0x199   : > { %v858_v58 = vrot.slane %v856_v56, 7  ;;  %v705_v60 = vadd.f32 %v3835_v48, %v704_v57  ;;  %v1029_v57 = vld [vmem:[#allocation3 + $0x5c] sm:$0x1] }
 0x19b   : > { %v861_v62 = vor.u32 %v859_v59, %v858_v58  ;;  %v738_v0 = vmax.f32 %v705_v60, 0.0  ;;  %v862_v9 = vrot.slane %v858_v58, 4 }
 0x19d   : > { %v1012_v1 = vsel %vm3842_vm7, %v861_v62, %v1011_v61  ;;  %v758_v2 = vpack.c.bf16 %v738_v0, %v738_v0 }
 0x19e   : > { %1013 = vst [vmem:[#allocation3 + $0x3c] sm:$0xf] %v1012_v1 }
 0x19f   : > { %v864_v3 = vshrl.u32 %v758_v2, 16  ;;  %v867_v6 = vshll.u32 %v758_v2, 16 }
 0x1a0   : > { %v707_v4 = vpop.f32.mrf.mxu0 }
 0x1a1   : > { %v866_v5 = vrot.slane %v864_v3, 7  ;;  %v708_v7 = vadd.f32 %v3835_v48, %v707_v4 }
 0x1a3   : > { %v869_v11 = vor.u32 %v867_v6, %v866_v5  ;;  %v871_v12 = vrot.slane %v866_v5, 4  ;;  %v739_v13 = vmax.f32 %v708_v7, 0.0  ;;  %v1032_v7 = vld [vmem:[#allocation3 + $0x60] sm:$0xf] }
 0x1a5   : > { %v870_v15 = vsel %vm3848_vm11, %v862_v9, %v869_v11  ;;  %v1016_v16 = vsel %vm3854_vm12, %v871_v12, %v1015_v8  ;;  %v759_v17 = vpack.c.bf16 %v739_v13, %v739_v13 }
 0x1a6   : > { %1014 = vst.msk [vmem:[#allocation3 + $0x40] sm:$0xf] %vm970_vm5, %v870_v15 }
 0x1a7   : > { %1017 = vst [vmem:[#allocation3 + $0x44] sm:$0x1] %v1016_v16  ;;  %v873_v18 = vshrl.u32 %v759_v17, 16  ;;  %v876_v21 = vshll.u32 %v759_v17, 16 }
 0x1a8   : > { %v709_v19 = vpop.f32.mrf.mxu0 }
 0x1a9   : > { %v875_v20 = vrot.slane %v873_v18, 7  ;;  %v710_v22 = vadd.f32 %v3835_v48, %v709_v19  ;;  %v1036_v19 = vld [vmem:[#allocation3 + $0x68] sm:$0x1] }
 0x1ab   : > { %v878_v24 = vor.u32 %v876_v21, %v875_v20  ;;  %v740_v25 = vmax.f32 %v710_v22, 0.0  ;;  %v879_v34 = vrot.slane %v875_v20, 4 }
 0x1ad   : > { %v1019_v26 = vsel %vm3842_vm7, %v878_v24, %v1018_v23  ;;  %v760_v27 = vpack.c.bf16 %v740_v25, %v740_v25 }
 0x1ae   : > { %1020 = vst [vmem:[#allocation3 + $0x48] sm:$0xf] %v1019_v26 }
 0x1af   : > { %v881_v28 = vshrl.u32 %v760_v27, 16  ;;  %v884_v31 = vshll.u32 %v760_v27, 16 }
 0x1b0   : > { %v712_v29 = vpop.f32.mrf.mxu0 }
 0x1b1   : > { %v883_v30 = vrot.slane %v881_v28, 7  ;;  %v713_v32 = vadd.f32 %v3835_v48, %v712_v29 }
 0x1b3   : > { %v886_v35 = vor.u32 %v884_v31, %v883_v30  ;;  %v888_v36 = vrot.slane %v883_v30, 4  ;;  %v741_v37 = vmax.f32 %v713_v32, 0.0  ;;  %v1039_v32 = vld [vmem:[#allocation3 + $0x6c] sm:$0xf] }
 0x1b5   : > { %v887_v38 = vsel %vm3848_vm11, %v879_v34, %v886_v35  ;;  %v1023_v39 = vsel %vm3854_vm12, %v888_v36, %v1022_v33  ;;  %v761_v40 = vpack.c.bf16 %v741_v37, %v741_v37 }
 0x1b6   : > { %1021 = vst.msk [vmem:[#allocation3 + $0x4c] sm:$0xf] %vm970_vm5, %v887_v38 }
 0x1b7   : > { %1024 = vst [vmem:[#allocation3 + $0x50] sm:$0x1] %v1023_v39  ;;  %v890_v41 = vshrl.u32 %v761_v40, 16  ;;  %v893_v44 = vshll.u32 %v761_v40, 16  ;;  %v1043_v40 = vld [vmem:[#allocation3 + $0x74] sm:$0x1] }
 0x1b8   : > { %v714_v42 = vpop.f32.mrf.mxu0 }
 0x1b9   : > { %v892_v43 = vrot.slane %v890_v41, 7  ;;  %v715_v45 = vadd.f32 %v3835_v48, %v714_v42 }
 0x1bb   : > { %v895_v47 = vor.u32 %v893_v44, %v892_v43  ;;  %v742_v49 = vmax.f32 %v715_v45, 0.0  ;;  %v896_v58 = vrot.slane %v892_v43, 4 }
 0x1bd   : > { %v1026_v50 = vsel %vm3842_vm7, %v895_v47, %v1025_v46  ;;  %v762_v51 = vpack.c.bf16 %v742_v49, %v742_v49 }
 0x1be   : > { %1027 = vst [vmem:[#allocation3 + $0x54] sm:$0xf] %v1026_v50 }
 0x1bf   : > { %v898_v52 = vshrl.u32 %v762_v51, 16  ;;  %v901_v55 = vshll.u32 %v762_v51, 16 }
 0x1c0   : > { %v717_v53 = vpop.f32.mrf.mxu0 }
 0x1c1   : > { %v900_v54 = vrot.slane %v898_v52, 7  ;;  %v718_v56 = vadd.f32 %v3835_v48, %v717_v53 }
 0x1c3   : > { %v903_v59 = vor.u32 %v901_v55, %v900_v54  ;;  %v905_v60 = vrot.slane %v900_v54, 4  ;;  %v743_v61 = vmax.f32 %v718_v56, 0.0 }
 0x1c5   : > { %v904_v62 = vsel %vm3848_vm11, %v896_v58, %v903_v59  ;;  %v1030_v0 = vsel %vm3854_vm12, %v905_v60, %v1029_v57  ;;  %v763_v1 = vpack.c.bf16 %v743_v61, %v743_v61 }
 0x1c6   : > { %1028 = vst.msk [vmem:[#allocation3 + $0x58] sm:$0xf] %vm970_vm5, %v904_v62 }
 0x1c7   : > { %1031 = vst [vmem:[#allocation3 + $0x5c] sm:$0x1] %v1030_v0  ;;  %v907_v2 = vshrl.u32 %v763_v1, 16  ;;  %v910_v5 = vshll.u32 %v763_v1, 16 }
 0x1c8   : > { %v719_v3 = vpop.f32.mrf.mxu0 }
 0x1c9   : > { %v909_v4 = vrot.slane %v907_v2, 7  ;;  %v720_v6 = vadd.f32 %v3835_v48, %v719_v3 }
 0x1cb   : > { %v912_v8 = vor.u32 %v910_v5, %v909_v4  ;;  %v744_v9 = vmax.f32 %v720_v6, 0.0  ;;  %v913_v20 = vrot.slane %v909_v4, 4 }
 0x1cd   : > { %v1033_v11 = vsel %vm3842_vm7, %v912_v8, %v1032_v7  ;;  %v764_v12 = vpack.c.bf16 %v744_v9, %v744_v9 }
 0x1ce   : > { %1034 = vst [vmem:[#allocation3 + $0x60] sm:$0xf] %v1033_v11 }
 0x1cf   : > { %v915_v13 = vshrl.u32 %v764_v12, 16  ;;  %v918_v17 = vshll.u32 %v764_v12, 16 }
 0x1d0   : > { %v722_v15 = vpop.f32.mrf.mxu0 }
 0x1d1   : > { %v917_v16 = vrot.slane %v915_v13, 7  ;;  %v723_v18 = vadd.f32 %v3835_v48, %v722_v15 }
 0x1d3   : > { %v920_v21 = vor.u32 %v918_v17, %v917_v16  ;;  %v922_v22 = vrot.slane %v917_v16, 4  ;;  %v745_v23 = vmax.f32 %v723_v18, 0.0 }
 0x1d5   : > { %v921_v24 = vsel %vm3848_vm11, %v913_v20, %v920_v21  ;;  %v1037_v25 = vsel %vm3854_vm12, %v922_v22, %v1036_v19  ;;  %v765_v26 = vpack.c.bf16 %v745_v23, %v745_v23 }
 0x1d6   : > { %1035 = vst.msk [vmem:[#allocation3 + $0x64] sm:$0xf] %vm970_vm5, %v921_v24 }
 0x1d7   : > { %1038 = vst [vmem:[#allocation3 + $0x68] sm:$0x1] %v1037_v25  ;;  %v924_v27 = vshrl.u32 %v765_v26, 16  ;;  %v927_v30 = vshll.u32 %v765_v26, 16 }
 0x1d8   : > { %v724_v28 = vpop.f32.mrf.mxu0 }
 0x1d9   : > { %v926_v29 = vrot.slane %v924_v27, 7  ;;  %v725_v31 = vadd.f32 %v3835_v48, %v724_v28 }
 0x1db   : > { %v929_v33 = vor.u32 %v927_v30, %v926_v29  ;;  %v746_v34 = vmax.f32 %v725_v31, 0.0  ;;  %v930_v41 = vrot.slane %v926_v29, 4 }
 0x1dd   : > { %v1040_v35 = vsel %vm3842_vm7, %v929_v33, %v1039_v32  ;;  %v766_v36 = vpack.c.bf16 %v746_v34, %v746_v34 }
 0x1de   : > { %1041 = vst [vmem:[#allocation3 + $0x6c] sm:$0xf] %v1040_v35 }
 0x1df   : > { %v932_v37 = vshrl.u32 %v766_v36, 16  ;;  %v935_v39 = vshll.u32 %v766_v36, 16 }
 0x1e1   : > { %v934_v38 = vrot.slane %v932_v37, 7 }
 0x1e3   : > { %v937_v42 = vor.u32 %v935_v39, %v934_v38  ;;  %v939_v43 = vrot.slane %v934_v38, 4  ;;  %1048 = sbr.rel (%p2708_p12) target bundleno = 492 (0x1ec), region = 108 }
 0x1e5   : > { %v938_v44 = vsel %vm3848_vm11, %v930_v41, %v937_v42  ;;  %v1044_v48 = vsel %vm3854_vm12, %v939_v43, %v1043_v40 }
 0x1e6   : > { %1042 = vst.msk [vmem:[#allocation3 + $0x70] sm:$0xf] %vm970_vm5, %v938_v44 }
 0x1e7   : > { %1045 = vst [vmem:[#allocation3 + $0x74] sm:$0x1] %v1044_v48 }
 0x1e8   : > { %v3442_v63 = vmov 0  }
 0x1e9   : > { %1049 = vst.msk [vmem:[#allocation3] sm:$0xf] %vm970_vm5, %v3442_v63 }
 0x1ea   : > { %1050 = vst.msk [vmem:[#allocation3 + $0x4] sm:$0xf] %vm970_vm5, %v3442_v63 }
 0x1eb   : > { %1052 = vst.msk [vmem:[#allocation3 + $0x8] sm:$0x1] %vm978_vm10, %v3442_v63 }
 0x1ec PF: > { %p2767_p2 = scmp.ne.s32.totalorder %s3424_s27, 1 }
 0x1ee   : > { %1056 = sbr.rel (%p2767_p2) target bundleno = 503 (0x1f7), region = 112 }
 0x1f3   : > { %v3443_v10 = vmov 0  }
 0x1f4   : > { %1058 = vst.msk [vmem:[#allocation3 + $0x6c] sm:$0xf] %vm970_vm5, %v3443_v10 }
 0x1f5   : > { %1059 = vst.msk [vmem:[#allocation3 + $0x70] sm:$0xf] %vm970_vm5, %v3443_v10 }
 0x1f6   : > { %1061 = vst.msk [vmem:[#allocation3 + $0x74] sm:$0x1] %vm978_vm10, %v3443_v10 }
 0x1f7 PF: > { %v3952_v14 = vld [vmem:[#allocation3 + $0xc] sm:$0xff]   ;;  %v3954_v46 = vld [vmem:[#allocation3] sm:$0xff]   ;;  %v1078_v47 = vld [vmem:[#allocation3 + $0x8] sm:$0x1]  ;;  %s3444_s11 = smov 96   ;;  %s3445_s29 = smov 64  }
 0x1f8   : > { %v3142_v45 = vld [vmem:[#allocation3 + $0xc] sm:$0xf0]  ;;  %v1208_v49 = vunpack.c.l.b16 %v1078_v47  ;;  %v1111_v50 = vld [vmem:[#allocation3 + $0x14] sm:$0x1]  ;;  %v3143_v51 = vld [vmem:[#allocation3 + $0xc] sm:$0xe]  ;;  %1442 = vrot.lane.b32.xlu1 %v3952_v14, %s3444_s11 }
 0x1f9   : > { %v1226_v52 = vshrl.u32 %v3954_v46, 16  ;;  %v1228_v53 = vshll.u32 %v3954_v46, 16  ;;  %v1466_v54 = vunpack.c.l.b16 %v1111_v50  ;;  %v2985_v55 = vld [vmem:[#allocation3] sm:$0xf0]  ;;  %v2986_v57 = vld [vmem:[#allocation3] sm:$0xe]  ;;  %v3144_v1 = vor.u32 %v3143_v51, %v3142_v45 }
 0x1fa   : > { %v1216_v56 = vpack.c.b16 %v1208_v49, %v1208_v49  ;;  %v3958_v58 = vld [vmem:[#allocation3 + $0xc] sm:$0xff]   ;;  %v3962_v62 = vld [vmem:[#allocation3 + $0x18] sm:$0xff]   ;;  %v2987_v2 = vor.u32 %v2986_v57, %v2985_v55  ;;  %v1079_v3 = vld [vmem:[#allocation3 + $0x14] sm:$0x1]  ;;  %vm1224_vm13 = vsmask.f32 7424 }
 0x1fb   : > { %v3145_v59 = vld [vmem:[#allocation3 + $0xc] sm:$0xf0]  ;;  %v1230_v60 = vrot.slane %v1228_v53, 1  ;;  %v3960_v61 = vpack.c.b16 %v1466_v54, %v1466_v54  ;;  %v3146_v4 = vld [vmem:[#allocation3 + $0xc] sm:$0xe]  ;;  %1682 = vrot.lane.b32.xlu2 %v3962_v62, %s3445_s29  ;;  %vm1361_vm14 = vcmask 1046528   ;;  %v1209_v9 = vunpack.c.l.b16 %v1079_v3 }
 0x1fc   : > { %v1233_v0 = vshll.u32 %v1216_v56, 16  ;;  %v1602_v8 = vrot.slane %v3144_v1, 1  ;;  %v1362_v12 = vrot.slane %v2987_v2, 1  ;;  %v1363_v13 = vrot.slane %v1216_v56, 1  ;;  %s3446_s9 = smov 32   ;;  %v1130_v30 = vld [vmem:[#allocation3 + $0x24] sm:$0xff]  }
 0x1fd   : > { %v1231_v5 = vor.u32 %v1230_v60, %v1226_v52  ;;  %v1603_v6 = vrot.slane %v3960_v61, 1  ;;  %v3147_v16 = vor.u32 %v3146_v4, %v3145_v59  ;;  %v1725_v17 = vshll.u32 %v3962_v62, 16  ;;  %v1144_v20 = vld [vmem:[#allocation3 + $0x20] sm:$0x1]  ;;  %v3978_v31 = vld [vmem:[#allocation3 + $0x24] sm:$0xf0] }
 0x1fe   : > { %v1235_v7 = vrot.slane %v1233_v0, 1  ;;  %v1217_v18 = vpack.c.b16 %v1209_v9, %v1209_v9  ;;  %v1240_v19 = vshll.u32 %v3958_v58, 16  ;;  %v1364_v21 = vsel %vm1361_vm14, %v1362_v12, %v1363_v13  ;;  %v1112_v29 = vld [vmem:[#allocation3 + $0x20] sm:$0x1]  ;;  %v2997_v39 = vld [vmem:[#allocation3 + $0x18] sm:$0xf0] }
 0x1ff   : > { %v1604_v15 = vsel %vm1361_vm14, %v1602_v8, %v1603_v6  ;;  %v1365_v22 = vrot.slane %v3147_v16, 1  ;;  %v1723_v24 = vshrl.u32 %v3962_v62, 16  ;;  %v1727_v25 = vrot.slane %v1725_v17, 1  ;;  %v2998_v40 = vld [vmem:[#allocation3 + $0x18] sm:$0xe]  ;;  %v1069_v8 = vld [vmem:[#allocation3 + $0x24] sm:$0xff]  }
 0x200   : > { %v1236_v11 = vsel %vm1224_vm13, %v1231_v5, %v1235_v7  ;;  %1626 = vrot.lane.b32.xlu1 %v1604_v15, %s3446_s9  ;;  %v1366_v23 = vrot.slane %v1217_v18, 1  ;;  %v1238_v26 = vshrl.u32 %v3958_v58, 16  ;;  %v1242_v27 = vrot.slane %v1240_v19, 1  ;;  %v1080_v42 = vld [vmem:[#allocation3 + $0x20] sm:$0x1]  ;;  %v1100_v5 = vld [vmem:[#allocation3 + $0x24] sm:$0xff]  }
 0x201   : > { %1321 = vrot.lane.b32.xlu0 %v1236_v11, %s3446_s9  ;;  %v1245_v28 = vshll.u32 %v1217_v18, 16  ;;  %v1706_v32 = vunpack.c.l.b16 %v1144_v20  ;;  %v3984_v35 = vor.u32 %v1727_v25, %v1723_v24  ;;  %v1467_v36 = vunpack.c.l.b16 %v1112_v29  ;;  %v1145_v63 = vld [vmem:[#allocation3 + $0x2c] sm:$0x1]  ;;  %v2988_v49 = vld [vmem:[#allocation3 + $0x18] sm:$0xf0]  ;;  %s4548_s8 = sld [smem:[#allocation28_spill]] }
 0x202   : > { %v1367_v34 = vsel %vm1361_vm14, %v1365_v22, %v1366_v23  ;;  %v1243_v37 = vor.u32 %v1242_v27, %v1238_v26  ;;  %v2999_v48 = vor.u32 %v2998_v40, %v2997_v39  ;;  %v1210_v47 = vunpack.c.l.b16 %v1080_v42  ;;  %v2989_v50 = vld [vmem:[#allocation3 + $0x18] sm:$0xe]  ;;  %v1113_v6 = vld [vmem:[#allocation3 + $0x2c] sm:$0x1]  ;;  %v1121_v7 = vld [vmem:[#allocation3 + $0x24] sm:$0xe] }
 0x203   : > { %v3980_v33 = vpack.c.b16 %v1706_v32, %v1706_v32  ;;  %v1247_v38 = vrot.slane %v1245_v28, 1  ;;  %v3988_v44 = vpack.c.b16 %v1467_v36, %v1467_v36  ;;  %v1737_v51 = vshll.u32 %v1130_v30, 16  ;;  %v1146_v16 = vld [vmem:[#allocation3 + $0x38] sm:$0x1]  ;;  %v1081_v19 = vld [vmem:[#allocation3 + $0x2c] sm:$0x1] }
 0x204   : > { %v1707_v52 = vunpack.c.l.b16 %v1145_v63  ;;  %v2990_v53 = vor.u32 %v2989_v50, %v2988_v49  ;;  %v1605_v54 = vrot.slane %v2999_v48, 1  ;;  %v1218_v56 = vpack.c.b16 %v1210_v47, %v1210_v47  ;;  %v1089_v22 = vld [vmem:[#allocation3 + $0x24] sm:$0xe]  ;;  %s2926_s21 = sshll.u32 %s3424_s27, 4  ;;  %s4549_s24 = sld [smem:[#allocation26_spill]] }
 0x205   : > { %v1730_v41 = vshll.u32 %v3980_v33, 16  ;;  %v1248_v10 = vsel %vm1224_vm13, %v1243_v37, %v1247_v38  ;;  %v1606_v55 = vrot.slane %v3988_v44, 1  ;;  %v1735_v59 = vshrl.u32 %v1130_v30, 16  ;;  %s4550_s18 = sld [smem:[#allocation37_spill]]  ;;  %s2521_s27 = sshll.u32 %s3721_s7, 4  ;;  %s2522_s27 = int_to_ptr.vmem [resolvable:$true] %s2521_s27 }
 0x206   : > { %v3996_v57 = vpack.c.b16 %v1707_v52, %v1707_v52  ;;  %v1739_v60 = vrot.slane %v1737_v51, 1  ;;  %v1368_v1 = vrot.slane %v2990_v53, 1  ;;  %v1369_v2 = vrot.slane %v1218_v56, 1  ;;  %v1114_v53 = vld [vmem:[#allocation3 + $0x38] sm:$0x1] }
 0x207   : > { %v1732_v43 = vrot.slane %v1730_v41, 1  ;;  %v1607_v3 = vsel %vm1361_vm14, %v1605_v54, %v1606_v55  ;;  %v1257_v4 = vshll.u32 %v1218_v56, 16  ;;  %v1423_v13 = vunpack.c.h.b16 %v1100_v5  ;;  %v1134_v54 = vld [vmem:[#allocation3 + $0x3c] sm:$0xff]   ;;  %s2883_s16 = sshll.u32 %s4548_s8, 5 }
 0x208   : > { %1388 = vrot.lane.b32.xlu1 %v1367_v34, %s3445_s29  ;;  %v1742_v0 = vshll.u32 %v3996_v57, 16  ;;  %v1740_v9 = vor.u32 %v1739_v60, %v1735_v59  ;;  %v1370_v12 = vsel %vm1361_vm14, %v1368_v1, %v1369_v2  ;;  %v1468_v15 = vunpack.c.l.b16 %v1113_v6  ;;  %v4014_v34 = vld [vmem:[#allocation3 + $0x30] sm:$0xff]   ;;  %v4030_v55 = vld [vmem:[#allocation3 + $0x3c] sm:$0xf0]  ;;  %v1147_v1 = vld [vmem:[#allocation3 + $0x44] sm:$0x1]  ;;  %s2518_s17 = sadd.s32 %s2926_s21, %s2883_s16 }
 0x209   : > { %1386 = vrot.lane.b32.xlu0 %v1364_v21, %s3445_s29  ;;  %v1733_v45 = vsel %vm1224_vm13, %v3984_v35, %v1732_v43  ;;  %v1259_v17 = vrot.slane %v1257_v4, 1  ;;  %v1588_v18 = vunpack.c.l.b16 %v1121_v7  ;;  %v1182_v20 = vunpack.c.l.b16 %v1100_v5  ;;  %v1082_v4 = vld [vmem:[#allocation3 + $0x38] sm:$0x1]  ;;  %v3000_v5 = vld [vmem:[#allocation3 + $0x30] sm:$0xf0]  ;;  %s2884_s25 = sshll.u32 %s2518_s17, 3 }
 0x20a   : > { %1818 = vrot.lane.b32.xlu2 %v1733_v45, %s3444_s11  ;;  %v1744_v11 = vrot.slane %v1742_v0, 1  ;;  %v1183_v21 = vunpack.c.h.b16 %v1069_v8  ;;  %v1708_v24 = vunpack.c.l.b16 %v1146_v16  ;;  %v1211_v25 = vunpack.c.l.b16 %v1081_v19  ;;  %v3001_v6 = vld [vmem:[#allocation3 + $0x30] sm:$0xe] }
 0x20b   : > { %v1348_v26 = vunpack.c.l.b16 %v1089_v22  ;;  %v1260_v27 = vsel %vm1224_vm13, %v3984_v35, %v1259_v17  ;;  %v4009_v28 = vpack.c.b16 %v1468_v15, %v1468_v15  ;;  %v1596_v29 = vpack.c.b16 %v1423_v13, %v1588_v18  ;;  %v2991_v15 = vld [vmem:[#allocation3 + $0x30] sm:$0xf0]  ;;  %v2992_v16 = vld [vmem:[#allocation3 + $0x30] sm:$0xe]  ;;  %s2520_s23 = scalar_lea.hbm %s4550_s18, %s2884_s25  ;;  %s3356_s13 = scalar_lea.hbm %s4550_s18, 512 }
 0x20c   : > { %v1745_v23 = vsel %vm1224_vm13, %v1740_v9, %v1744_v11  ;;  %v1422_v32 = vunpack.c.l.b16 %v1069_v8  ;;  %v4016_v36 = vpack.c.b16 %v1708_v24, %v1708_v24  ;;  %v1749_v37 = vshll.u32 %v4014_v34, 16 }
 0x20d   : > { %v1219_v38 = vpack.c.b16 %v1211_v25, %v1211_v25  ;;  %v1356_v39 = vpack.c.b16 %v1183_v21, %v1348_v26  ;;  %v1608_v40 = vrot.slane %v1596_v29, 1  ;;  %v1609_v41 = vrot.slane %v4009_v28, 1 }
 0x20e   : > { %v4022_v43 = vpack.c.b16 %v1423_v13, %v1422_v32  ;;  %v1747_v48 = vshrl.u32 %v4014_v34, 16  ;;  %v1754_v63 = vshll.u32 %v4016_v36, 16  ;;  %v1709_v8 = vunpack.c.l.b16 %v1147_v1 }
 0x20f   : > { %v1269_v45 = vshll.u32 %v1219_v38, 16  ;;  %v1371_v47 = vrot.slane %v1356_v39, 1  ;;  %v1372_v49 = vrot.slane %v1219_v38, 1  ;;  %v1610_v50 = vsel %vm1361_vm14, %v1608_v40, %v1609_v41  ;;  %v1115_v38 = vld [vmem:[#allocation3 + $0x44] sm:$0x1]  ;;  %v1073_v40 = vld [vmem:[#allocation3 + $0x3c] sm:$0xff]  }
 0x210   : > { %1684 = vrot.lane.b32.xlu1 %v1130_v30, %s3445_s29  ;;  %v4011_v30 = vpack.c.b16 %v1183_v21, %v1182_v20  ;;  %v1756_v56 = vrot.slane %v1754_v63, 1  ;;  %v1212_v9 = vunpack.c.l.b16 %v1082_v4  ;;  %v3002_v13 = vor.u32 %v3001_v6, %v3000_v5  ;;  %v1123_v39 = vld [vmem:[#allocation3 + $0x3c] sm:$0xe] }
 0x211   : > { %1323 = vrot.lane.b32.xlu0 %v1248_v10, %s3446_s9  ;;  %v1751_v10 = vrot.slane %v1749_v37, 1  ;;  %v1271_v60 = vrot.slane %v1269_v45, 1  ;;  %v1373_v0 = vsel %vm1361_vm14, %v1371_v47, %v1372_v49  ;;  %v1761_v17 = vshll.u32 %v1134_v54, 16  ;;  %v1104_v37 = vld [vmem:[#allocation3 + $0x3c] sm:$0xff]  }
 0x212   : > { %1444 = vrot.lane.b32.xlu2 %v3962_v62, %s3444_s11  ;;  %v1264_v42 = vshll.u32 %v4011_v30, 16  ;;  %v1262_v51 = vshrl.u32 %v4011_v30, 16  ;;  %v4045_v18 = vpack.c.b16 %v1709_v8, %v1709_v8  ;;  %v1220_v19 = vpack.c.b16 %v1212_v9, %v1212_v9  ;;  %v2921_v45 = vld [vmem:[%s4492_s3 + $0x78] sm:$0xff]  ;;  %v4074_v9 = vld [vmem:[#allocation3 + $0x48] sm:$0xff]  }
 0x213   : > { %v4035_v59 = vor.u32 %v1751_v10, %v1747_v48  ;;  %v2993_v20 = vor.u32 %v2992_v16, %v2991_v15  ;;  %v1611_v21 = vrot.slane %v3002_v13, 1  ;;  %v1763_v24 = vrot.slane %v1761_v17, 1  ;;  %v2913_v47 = vld [vmem:[%s4492_s3 + $0x38] sm:$0xff]  ;;  %2226 = vmatpush.bf16.msra.mxu2 %v2921_v45  ;;  %v2912_v17 = vld [vmem:[%s4492_s3 + $0x30] sm:$0xff] }
 0x214   : > { %v1266_v52 = vrot.slane %v1264_v42, 1  ;;  %v1766_v25 = vshll.u32 %v4045_v18, 16  ;;  %v1281_v26 = vshll.u32 %v1220_v19, 16  ;;  %v1375_v29 = vrot.slane %v1220_v19, 1  ;;  %2177 = vmatpush.bf16.msra.mxu1 %v2913_v47  ;;  %v2919_v19 = vld [vmem:[%s4492_s3 + $0x68] sm:$0xff] }
 0x215   : > { %v1757_v7 = vsel %vm1224_vm13, %v4035_v59, %v1756_v56  ;;  %v1427_v10 = vunpack.c.h.b16 %v1104_v37  ;;  %v1470_v49 = vunpack.c.l.b16 %v1115_v38  ;;  %v1148_v56 = vld [vmem:[#allocation3 + $0x50] sm:$0x1]  ;;  %v1426_v8 = vunpack.c.l.b16 %v1073_v40 }
 0x216   : > { %v1267_v2 = vor.u32 %v1266_v52, %v1262_v51  ;;  %v1768_v42 = vrot.slane %v1766_v25, 1  ;;  %v1283_v48 = vrot.slane %v1281_v26, 1  ;;  %v1083_v51 = vld [vmem:[#allocation3 + $0x44] sm:$0x1]  ;;  %v1186_v52 = vunpack.c.l.b16 %v1104_v37 }
 0x217   : > { %v1710_v1 = vunpack.c.l.b16 %v1148_v56  ;;  %v4069_v5 = vpack.c.b16 %v1470_v49, %v1470_v49  ;;  %v1773_v13 = vshll.u32 %v4074_v9, 16  ;;  %v1771_v25 = vshrl.u32 %v4074_v9, 16  ;;  %v1149_v56 = vld [vmem:[#allocation3 + $0x5c] sm:$0x1] }
 0x218   : > { %1390 = vrot.lane.b32.xlu1 %v1370_v12, %s3445_s29  ;;  %v1272_v11 = vsel %vm1224_vm13, %v1267_v2, %v1271_v60  ;;  %v2920_v60 = vld [vmem:[%s4492_s3 + $0x70] sm:$0xff]  ;;  %v1213_v2 = vunpack.c.l.b16 %v1083_v51  ;;  %v1284_v4 = vsel %vm1224_vm13, %v4035_v59, %v1283_v48  ;;  %2178 = vmatpush.bf16.msra.mxu1 %v2912_v17  ;;  %v2917_v51 = vld [vmem:[%s4492_s3 + $0x58] sm:$0xff]  ;;  %v2995_v17 = vld [vmem:[#allocation3 + $0x48] sm:$0xe]  ;;  %vm1899_vm15 = vcmask 523264  }
 0x219   : > { %1628 = vrot.lane.b32.xlu0 %v1607_v3, %s3446_s9  ;;  %v1469_v3 = vunpack.c.l.b16 %v1114_v53  ;;  %v1187_v53 = vunpack.c.h.b16 %v1073_v40  ;;  %2227 = vmatpush.bf16.msra.mxu2 %v2920_v60  ;;  %v1138_v48 = vld [vmem:[#allocation3 + $0x54] sm:$0xff]   ;;  %v3003_v60 = vld [vmem:[#allocation3 + $0x48] sm:$0xf0]  ;;  %vm1882_vm0 = vcmask 261120   ;;  %vm1916_vm1 = vcmask 785408  }
 0x21a   : > { %1820 = vrot.lane.b32.xlu2 %v1745_v23, %s3444_s11  ;;  %v1759_v23 = vshrl.u32 %v1134_v54, 16  ;;  %v1221_v15 = vpack.c.b16 %v1213_v2, %v1213_v2  ;;  %v1711_v2 = vunpack.c.l.b16 %v1149_v56 }
 0x21b   : > { %v4042_v12 = vpack.c.b16 %v1469_v3, %v1469_v3 }
 0x21c   : > { %v1764_v41 = vor.u32 %v1763_v24, %v1759_v23  ;;  %v4088_v23 = vpack.c.b16 %v1427_v10, %v1426_v8  ;;  %v2911_v24 = vld [vmem:[%s4492_s3 + $0x28] sm:$0xff]  ;;  %v1378_v38 = vrot.slane %v1221_v15, 1 }
 0x21d   : > { %v1612_v22 = vrot.slane %v4042_v12, 1  ;;  %2228 = vmatpush.bf16.msra.mxu2 %v2919_v19  ;;  %2179 = vmatpush.bf16.msra.mxu1 %v2911_v24  ;;  %v1785_v19 = vshll.u32 %v1138_v48, 16  ;;  %v2908_v24 = vld [vmem:[%s4492_s3 + $0x10] sm:$0xff] }
 0x21f   : > { %v1613_v32 = vsel %vm1361_vm14, %v1611_v21, %v1612_v22  ;;  %v1615_v21 = vrot.slane %v4069_v5, 1 }
 0x220   : > { %1686 = vrot.lane.b32.xlu1 %v4014_v34, %s3445_s29 }
 0x221   : > { %1325 = vrot.lane.b32.xlu0 %v1260_v27, %s3446_s9  ;;  %v1374_v27 = vrot.slane %v2993_v20, 1 }
 0x222   : > { %1446 = vrot.lane.b32.xlu2 %v4022_v43, %s3444_s11 }
 0x223   : > { %v1376_v63 = vsel %vm1361_vm14, %v1374_v27, %v1375_v29  ;;  %v2918_v27 = vld [vmem:[%s4492_s3 + $0x60] sm:$0xff]  ;;  %v1775_v29 = vrot.slane %v1773_v13, 1 }
 0x224   : > { %2229 = vmatpush.bf16.msra.mxu2 %v2918_v27 }
 0x225   : > { %v4107_v45 = vor.u32 %v1775_v29, %v1771_v25  ;;  %v2915_v25 = vld [vmem:[%s4492_s3 + $0x48] sm:$0xff]  ;;  %v1783_v29 = vshrl.u32 %v1138_v48, 16 }
 0x228   : > { %1392 = vrot.lane.b32.xlu1 %v1373_v0, %s3445_s29  ;;  %v1769_v0 = vsel %vm1224_vm13, %v1764_v41, %v1768_v42  ;;  %v1116_v42 = vld [vmem:[#allocation3 + $0x50] sm:$0x1]  ;;  %2230 = vmatpush.bf16.msra.mxu2 %v2917_v51 }
 0x229   : > { %1630 = vrot.lane.b32.xlu0 %v1610_v50, %s3446_s9  ;;  %v1590_v50 = vunpack.c.l.b16 %v1123_v39 }
 0x22a   : > { %1822 = vrot.lane.b32.xlu2 %v1757_v7, %s3444_s11  ;;  %v4071_v7 = vpack.c.b16 %v1187_v53, %v1186_v52 }
 0x22b   : > { %v1598_v6 = vpack.c.b16 %v1427_v10, %v1590_v50  ;;  %v2910_v50 = vld [vmem:[%s4492_s3 + $0x20] sm:$0xff] }
 0x22c   : > { %v1288_v22 = vshll.u32 %v4071_v7, 16  ;;  %v1286_v40 = vshrl.u32 %v4071_v7, 16  ;;  %2180 = vmatpush.bf16.msra.mxu1 %v2910_v50  ;;  %v1125_v50 = vld [vmem:[#allocation3 + $0x54] sm:$0xe] }
 0x22d   : > { %v1614_v20 = vrot.slane %v1598_v6, 1  ;;  %v2916_v6 = vld [vmem:[%s4492_s3 + $0x50] sm:$0xff] }
 0x22e   : > { %v1290_v41 = vrot.slane %v1288_v22, 1  ;;  %2231 = vmatpush.bf16.msra.mxu2 %v2916_v6 }
 0x22f   : > { %v1616_v39 = vsel %vm1361_vm14, %v1614_v20, %v1615_v21  ;;  %v4129_v20 = vpack.c.b16 %v1711_v2, %v1711_v2  ;;  %v1592_v2 = vunpack.c.l.b16 %v1125_v50 }
 0x230   : > { %1688 = vrot.lane.b32.xlu1 %v1134_v54, %s3445_s29  ;;  %v1091_v54 = vld [vmem:[#allocation3 + $0x3c] sm:$0xe]  ;;  %v1291_v52 = vor.u32 %v1290_v41, %v1286_v40  ;;  %v2907_v41 = vld [vmem:[%s4492_s3 + $0x8] sm:$0xff] }
 0x231   : > { %1327 = vrot.lane.b32.xlu0 %v1272_v11, %s3446_s9  ;;  %v1350_v3 = vunpack.c.l.b16 %v1091_v54  ;;  %v4076_v11 = vpack.c.b16 %v1710_v1, %v1710_v1  ;;  %v1084_v54 = vld [vmem:[#allocation3 + $0x50] sm:$0x1] }
 0x232   : > { %1448 = vrot.lane.b32.xlu2 %v4014_v34, %s3444_s11  ;;  %2232 = vmatpush.bf16.msra.mxu2 %v2915_v25 }
 0x233   : > { %v1358_v16 = vpack.c.b16 %v1187_v53, %v1350_v3  ;;  %v1778_v26 = vshll.u32 %v4076_v11, 16  ;;  %v1471_v53 = vunpack.c.l.b16 %v1116_v42  ;;  %v1214_v3 = vunpack.c.l.b16 %v1084_v54  ;;  %v2914_v42 = vld [vmem:[%s4492_s3 + $0x40] sm:$0xff] }
 0x235   : > { %v1377_v37 = vrot.slane %v1358_v16, 1  ;;  %v1780_v10 = vrot.slane %v1778_v26, 1  ;;  %v4126_v13 = vpack.c.b16 %v1471_v53, %v1471_v53  ;;  %v2994_v16 = vld [vmem:[#allocation3 + $0x48] sm:$0xf0]  ;;  %v1222_v21 = vpack.c.b16 %v1214_v3, %v1214_v3  ;;  %v1085_v3 = vld [vmem:[#allocation3 + $0x5c] sm:$0x1] }
 0x236   : > { %v2996_v22 = vor.u32 %v2995_v17, %v2994_v16  ;;  %2233 = vmatpush.bf16.msra.mxu2 %v2914_v42  ;;  %v1215_v17 = vunpack.c.l.b16 %v1085_v3  ;;  %v1485_v3 = vshll.u32 %v3952_v14, 16 }
 0x237   : > { %v1379_v49 = vsel %vm1361_vm14, %v1377_v37, %v1378_v38  ;;  %v1781_v1 = vsel %vm1224_vm13, %v4107_v45, %v1780_v10  ;;  %v1618_v27 = vrot.slane %v4126_v13, 1  ;;  %v1790_v37 = vshll.u32 %v4129_v20, 16 }
 0x238   : > { %1394 = vrot.lane.b32.xlu1 %v1376_v63, %s3445_s29  ;;  %v4102_v63 = vld [vmem:[#allocation3 + $0x54] sm:$0xf0]  ;;  %v1305_v38 = vshll.u32 %v1222_v21, 16  ;;  %v1381_v40 = vrot.slane %v1222_v21, 1 }
 0x239   : > { %1632 = vrot.lane.b32.xlu0 %v1613_v32, %s3446_s9  ;;  %v1293_v32 = vshll.u32 %v1221_v15, 16 }
 0x23a   : > { %1824 = vrot.lane.b32.xlu2 %v1769_v0, %s3444_s11  ;;  %v3004_v0 = vld [vmem:[#allocation3 + $0x48] sm:$0xe]  ;;  %v1307_v53 = vrot.slane %v1305_v38, 1 }
 0x23b   : > { %v1295_v47 = vrot.slane %v1293_v32, 1  ;;  %v3005_v15 = vor.u32 %v3004_v0, %v3003_v60  ;;  %v1787_v32 = vrot.slane %v1785_v19, 1  ;;  %v2906_v60 = vld [vmem:[%s4492_s3] sm:$0xff]  ;;  %v1150_v0 = vld [vmem:[#allocation3 + $0x68] sm:$0x1] }
 0x23c   : > { %v1712_v16 = vunpack.c.l.b16 %v1150_v0  ;;  %v1308_v21 = vsel %vm1224_vm13, %v4107_v45, %v1307_v53 }
 0x23d   : > { %v1296_v8 = vsel %vm1224_vm13, %v1291_v52, %v1295_v47  ;;  %v1617_v26 = vrot.slane %v3005_v15, 1  ;;  %v1108_v47 = vld [vmem:[#allocation3 + $0x54] sm:$0xff]   ;;  %v1788_v51 = vor.u32 %v1787_v32, %v1783_v29  ;;  %v1792_v52 = vrot.slane %v1790_v37, 1 }
 0x23e   : > { %v1431_v56 = vunpack.c.h.b16 %v1108_v47  ;;  %v4172_v38 = vpack.c.b16 %v1712_v16, %v1712_v16 }
 0x23f   : > { %v1619_v10 = vsel %vm1361_vm14, %v1617_v26, %v1618_v27  ;;  %v1793_v15 = vsel %vm1224_vm13, %v1788_v51, %v1792_v52  ;;  %v2923_v26 = vld [vmem:[%s4492_s3 + $0x88] sm:$0xff]  ;;  %v4166_v27 = vld [vmem:[#allocation3 + $0x60] sm:$0xff]  }
 0x240   : > { %1690 = vrot.lane.b32.xlu1 %v4074_v9, %s3445_s29  ;;  %v1797_v37 = vshll.u32 %v4166_v27, 16  ;;  %3021 = vmatpush.bf16.msrb.mxu2 %v2923_v26 }
 0x241   : > { %1329 = vrot.lane.b32.xlu0 %v1284_v4, %s3446_s9  ;;  %v2909_v4 = vld [vmem:[%s4492_s3 + $0x18] sm:$0xff]  ;;  %3022 = vmatpush.bf16.msra.mxu3 %v2923_v26 }
 0x242   : > { %1450 = vrot.lane.b32.xlu2 %v4088_v23, %s3444_s11  ;;  %2181 = vmatpush.bf16.msra.mxu1 %v2909_v4  ;;  %v1190_v4 = vunpack.c.l.b16 %v1108_v47  ;;  %v1799_v50 = vrot.slane %v1797_v37, 1  ;;  %v1487_v37 = vrot.slane %v1485_v3, 1 }
 0x246   : > { %2182 = vmatpush.bf16.msra.mxu1 %v2908_v24  ;;  %v1600_v24 = vpack.c.b16 %v1431_v56, %v1592_v2  ;;  %v1142_v2 = vld [vmem:[#allocation3 + $0x6c] sm:$0xff]  }
 0x248   : > { %1396 = vrot.lane.b32.xlu1 %v1379_v49, %s3445_s29  ;;  %v1117_v49 = vld [vmem:[#allocation3 + $0x5c] sm:$0x1] }
 0x249   : > { %1634 = vrot.lane.b32.xlu0 %v1616_v39, %s3446_s9  ;;  %v1380_v39 = vrot.slane %v2996_v22, 1 }
 0x24a   : > { %1826 = vrot.lane.b32.xlu2 %v1781_v1, %s3444_s11  ;;  %2183 = vmatpush.bf16.msra.mxu1 %v2907_v41  ;;  %v1472_v1 = vunpack.c.l.b16 %v1117_v49  ;;  %v1620_v41 = vrot.slane %v1600_v24, 1  ;;  %v1795_v49 = vshrl.u32 %v4166_v27, 16  ;;  %v1483_v24 = vshrl.u32 %v3952_v14, 16 }
 0x24b   : > { %v1382_v54 = vsel %vm1361_vm14, %v1380_v39, %v1381_v40  ;;  %v1223_v39 = vpack.c.b16 %v1215_v17, %v1215_v17  ;;  %v1151_v17 = vld [vmem:[#allocation3 + $0x74] sm:$0x1] }
 0x24c   : > { %v4159_v22 = vpack.c.b16 %v1472_v1, %v1472_v1  ;;  %v1118_v1 = vld [vmem:[#allocation3 + $0x68] sm:$0x1] }
 0x24d   : > { %v1317_v51 = vshll.u32 %v1223_v39, 16  ;;  %v1384_v53 = vrot.slane %v1223_v39, 1  ;;  %v1490_v39 = vshll.u32 %v3960_v61, 16 }
 0x24e   : > { %2184 = vmatpush.bf16.msra.mxu1 %v2906_v60  ;;  %v1621_v42 = vrot.slane %v4159_v22, 1 }
 0x24f   : > { %v1492_v14 = vrot.slane %v1490_v39, 1 }
 0x250   : > { %1692 = vrot.lane.b32.xlu1 %v1138_v48, %s3445_s29  ;;  %v1077_v48 = vld [vmem:[#allocation3 + $0x54] sm:$0xff]  }
 0x251   : > { %1331 = vrot.lane.b32.xlu0 %v1296_v8, %s3446_s9  ;;  %v1191_v6 = vunpack.c.h.b16 %v1077_v48  ;;  %v1093_v8 = vld [vmem:[#allocation3 + $0x54] sm:$0xe]  ;;  %v1430_v32 = vunpack.c.l.b16 %v1077_v48  ;;  %v1802_v48 = vshll.u32 %v4172_v38, 16 }
 0x252   : > { %1452 = vrot.lane.b32.xlu2 %v4074_v9, %s3444_s11  ;;  %v1352_v19 = vunpack.c.l.b16 %v1093_v8  ;;  %2281 = vmatpush.bf16.msrb.mxu1 %v2923_v26  ;;  %v1319_v8 = vrot.slane %v1317_v51, 1  ;;  %v3006_v26 = vld [vmem:[#allocation3 + $0x60] sm:$0xf0]  ;;  %v1809_v51 = vshll.u32 %v1142_v2, 16 }
 0x253   : > { %v4161_v25 = vpack.c.b16 %v1191_v6, %v1190_v4  ;;  %v4177_v47 = vpack.c.b16 %v1431_v56, %v1430_v32  ;;  %v4185_v56 = vld [vmem:[#allocation3 + $0x6c] sm:$0xf0]  ;;  %v4190_v4 = vor.u32 %v1799_v50, %v1795_v49  ;;  %v3007_v32 = vld [vmem:[#allocation3 + $0x60] sm:$0xe] }
 0x254   : > { %v1360_v40 = vpack.c.b16 %v1191_v6, %v1352_v19  ;;  %v1804_v6 = vrot.slane %v1802_v48, 1  ;;  %v3008_v50 = vor.u32 %v3007_v32, %v3006_v26  ;;  %v1488_v48 = vor.u32 %v1487_v37, %v1483_v24 }
 0x255   : > { %v4168_v29 = vpop.permute.xlu2 %1682  ;;  %v1310_v60 = vshrl.u32 %v4161_v25, 16  ;;  %v1811_v3 = vrot.slane %v1809_v51, 1 }
 0x256   : > { %v1383_v52 = vrot.slane %v1360_v40, 1  ;;  %v1805_v40 = vsel %vm1224_vm13, %v4190_v4, %v1804_v6 }
 0x258   : > { %1398 = vrot.lane.b32.xlu1 %v1382_v54, %s3445_s29  ;;  %v1622_v54 = vsel %vm1361_vm14, %v1620_v41, %v1621_v42  ;;  %v1713_v41 = vunpack.c.l.b16 %v1151_v17 }
 0x259   : > { %1636 = vrot.lane.b32.xlu0 %v1619_v10, %s3446_s9  ;;  %v1312_v10 = vshll.u32 %v4161_v25, 16 }
 0x25a   : > { %1828 = vrot.lane.b32.xlu2 %v1793_v15, %s3444_s11  ;;  %v1385_v15 = vsel %vm1361_vm14, %v1383_v52, %v1384_v53  ;;  %v4203_v52 = vpack.c.b16 %v1713_v41, %v1713_v41  ;;  %v1623_v53 = vrot.slane %v3008_v50, 1  ;;  %v1502_v41 = vshll.u32 %v3988_v44, 16 }
 0x25b   : > { %v1314_v0 = vrot.slane %v1312_v10, 1  ;;  %v1509_v44 = vshll.u32 %v4022_v43, 16 }
 0x25c   : > { %v1814_v6 = vshll.u32 %v4203_v52, 16 }
 0x25d   : > { %v1315_v19 = vor.u32 %v1314_v0, %v1310_v60  ;;  %v1493_v0 = vsel %vm1224_vm13, %v1488_v48, %v1492_v14  ;;  %v1504_v14 = vrot.slane %v1502_v41, 1 }
 0x25e   : > { %v1816_v24 = vrot.slane %v1814_v6, 1  ;;  %v1511_v6 = vrot.slane %v1509_v44, 1 }
 0x25f   : > { %v1320_v10 = vsel %vm1224_vm13, %v1315_v19, %v1319_v8  ;;  %v1505_v51 = vsel %vm1224_vm13, %v3984_v35, %v1504_v14  ;;  %v1514_v35 = vshll.u32 %v4009_v28, 16  ;;  %v1526_v14 = vshll.u32 %v4042_v12, 16 }
 0x260   : > { %1694 = vrot.lane.b32.xlu1 %v4166_v27, %s3445_s29 }
 0x261   : > { %1333 = vrot.lane.b32.xlu0 %v1308_v21, %s3446_s9  ;;  %v1473_v21 = vunpack.c.l.b16 %v1118_v1  ;;  %v1807_v1 = vshrl.u32 %v1142_v2, 16 }
 0x262   : > { %1454 = vrot.lane.b32.xlu2 %v4177_v47, %s3444_s11 }
 0x263   : > { %v4200_v49 = vpack.c.b16 %v1473_v21, %v1473_v21  ;;  %v1812_v21 = vor.u32 %v1811_v3, %v1807_v1  ;;  %v1507_v3 = vshrl.u32 %v4022_v43, 16  ;;  %v3015_v43 = vld [vmem:[#allocation3 + $0x48] sm:$0xf0] }
 0x264   : > { %v1819_v16 = vpop.permute.xlu2 %1818 }
 0x268   : > { %1400 = vrot.lane.b32.xlu1 %v1385_v15, %s3445_s29 }
 0x269   : > { %1638 = vrot.lane.b32.xlu0 %v1622_v54, %s3446_s9  ;;  %v1624_v54 = vrot.slane %v4200_v49, 1 }
 0x26a   : > { %v1443_v42 = vpop.permute.xlu1 %1442  ;;  %1830 = vrot.lane.b32.xlu2 %v1805_v40, %s3444_s11  ;;  %v1817_v40 = vsel %vm1224_vm13, %v1812_v21, %v1816_v24 }
 0x26b   : > { %v1625_v15 = vsel %vm1361_vm14, %v1623_v53, %v1624_v54 }
 0x26c   : > { %v1445_v61 = vpop.permute.xlu2 %1444 }
 0x270   : > { %1696 = vrot.lane.b32.xlu1 %v1142_v2, %s3445_s29  ;;  %s4552_s29 = sand.u32 1, %s4549_s24  }
 0x271   : > { %1335 = vrot.lane.b32.xlu0 %v1320_v10, %s3446_s9 }
 0x272   : > { %v1627_v8 = vpop.permute.xlu1 %1626  ;;  %1456 = vrot.lane.b32.xlu2 %v4166_v27, %s3444_s11 }
 0x273   : > { %v1322_v60 = vpop.permute.xlu0 %1321  ;;  %v1943_v17 = vsel %vm1882_vm0, %v1493_v0, %v1627_v8 }
 0x274   : > { %v1966_v19 = vsel %vm1899_vm15, %v1943_v17, %v4168_v29  ;;  %v1821_v26 = vpop.permute.xlu2 %1820  ;;  %v1884_v32 = vsel %vm1882_vm0, %v3954_v46, %v1322_v60  ;;  %v1512_v17 = vor.u32 %v1511_v6, %v1507_v3 }
 0x275   : > { %v1982_v2 = vsel %vm1916_vm1, %v1966_v19, %v1819_v16  ;;  %v1516_v19 = vrot.slane %v1514_v35, 1 }
 0x276   : > { %2234 = vmatmul.bf16.vlgmr.msra.gmra.mxu2 %v1982_v2 }
 0x277   : > { %v1517_v2 = vsel %vm1224_vm13, %v1512_v17, %v1516_v19 }
 0x279   : > { %1640 = vrot.lane.b32.xlu0 %v1625_v15, %s3446_s9  ;;  %s2506_s9 = scalar_lea.sflag [#allocation6], %s4552_s29 }
 0x27a   : > { %v1389_v29 = vpop.permute.xlu1 %1388  ;;  %1832 = vrot.lane.b32.xlu2 %v1817_v40, %s3444_s11  ;;  %v2922_v40 = vld [vmem:[%s4492_s3 + $0x80] sm:$0xff]  ;;  %s2523_s11 = sshll.u32 %s2520_s23, 4  ;;  %s2524_s11 = int_to_ptr.hbm [resolvable:$true] %s2523_s11 }
 0x27b   : > { %v1387_v37 = vpop.permute.xlu0 %1386  ;;  %3024 = vmatpush.bf16.msra.mxu3 %v2922_v40  ;;  %2282 = vmatpush.bf16.msrb.mxu1 %v2922_v40  ;;  %s3350_s10 = sshra.s32 %s2524_s11, 4  ;;  %s3351_s10 = int_to_ptr.hbm [resolvable:$true] %s3350_s10 }
 0x27c   : > { %v1901_v39 = vsel %vm1899_vm15, %v1884_v32, %v1387_v37  ;;  %v1447_v10 = vpop.permute.xlu2 %1446  ;;  %3023 = vmatpush.bf16.msrb.mxu2 %v2922_v40  ;;  %s3352_s14 = scalar_lea.hbm %s3351_s10, 128  ;;  %p3357_p13 = scmp.lt.s32.totalorder %s3351_s10, %s4550_s18 }
 0x27d   : > { %v1918_v27 = vsel %vm1916_vm1, %v1901_v39, %v1443_v42  ;;  %v3016_v39 = vld [vmem:[#allocation3 + $0x48] sm:$0xe]  ;;  %p3353_p12 = scmp.ne.s32.totalorder %s3351_s10, %s3352_s14  ;;  %p3358_p5 = scmp.lt.s32.totalorder %s3356_s13, %s3352_s14 }
 0x27e   : > { %2185 = vmatmul.bf16.vlgmr.msra.gmra.mxu1 %v1918_v27 }
 0x27f   : > { %p3354_p4 = pnand %p3353_p12, %p3540_p3  ;;  %p3359_p1 = por %p3358_p5, %p3357_p13 }
 0x281   : > { %p3355_p0 = pneg %p3354_p4 }
 0x282   : > { %v1685_v46 = vpop.permute.xlu1 %1684 }
 0x283   : > { %v1324_v16 = vpop.permute.xlu0 %1323  ;;  %p3360_p6 = pnand %p3359_p1, %p3355_p0 }
 0x284   : > { %v1886_v50 = vsel %vm1882_vm0, %v3958_v58, %v1324_v16  ;;  %v1823_v53 = vpop.permute.xlu2 %1822 }
 0x285   : > { %v1903_v48 = vsel %vm1899_vm15, %v1886_v50, %v1389_v29 }
 0x286   : > { %v1921_v54 = vsel %vm1916_vm1, %v1903_v48, %v1445_v61 }
 0x28a   : > { %v1391_v1 = vpop.permute.xlu1 %1390 }
 0x28b   : > { %v1629_v42 = vpop.permute.xlu0 %1628 }
 0x28c   : > { %v1946_v60 = vsel %vm1882_vm0, %v1505_v51, %v1629_v42  ;;  %v1449_v8 = vpop.permute.xlu2 %1448  ;;  %v1528_v51 = vrot.slane %v1526_v14, 1 }
 0x28d   : > { %v1968_v0 = vsel %vm1899_vm15, %v1946_v60, %v1685_v46  ;;  %v3149_v60 = vld [vmem:[#allocation3 + $0x54] sm:$0xe] }
 0x28e   : > { %2190 = vmatmul.bf16.gmra.mxu1 %v1921_v54  ;;  %v1985_v58 = vsel %vm1916_vm1, %v1968_v0, %v1821_v26 }
 0x28f   : > { %2239 = vmatmul.bf16.gmra.mxu2 %v1985_v58  ;;  %v3150_v58 = vor.u32 %v3149_v60, %v4102_v63  ;;  %v1538_v63 = vshll.u32 %v4069_v5, 16 }
 0x291   : > { %v1873_v35 = vrot.slane %v3150_v58, 1 }
 0x292   : > { %v1687_v21 = vpop.permute.xlu1 %1686 }
 0x293   : > { %v1326_v15 = vpop.permute.xlu0 %1325 }
 0x294   : > { %v1888_v61 = vsel %vm1882_vm0, %v3962_v62, %v1326_v15  ;;  %v1825_v37 = vpop.permute.xlu2 %1824  ;;  %v3017_v62 = vor.u32 %v3016_v39, %v3015_v43  ;;  %v1874_v15 = vrot.slane %v4129_v20, 1  ;;  %v3018_v39 = vld [vmem:[#allocation3 + $0x60] sm:$0xf0] }
 0x295   : > { %v1905_v24 = vsel %vm1899_vm15, %v1888_v61, %v1391_v1  ;;  %v1533_v1 = vshll.u32 %v4088_v23, 16 }
 0x296   : > { %v1924_v32 = vsel %vm1916_vm1, %v1905_v24, %v1447_v10  ;;  %v1870_v16 = vrot.slane %v3017_v62, 1  ;;  %v1871_v10 = vrot.slane %v4076_v11, 1  ;;  %v1529_v11 = vsel %vm1224_vm13, %v4035_v59, %v1528_v51 }
 0x297   : > { %v1875_v61 = vsel %vm1361_vm14, %v1873_v35, %v1874_v15  ;;  %v1535_v17 = vrot.slane %v1533_v1, 1 }
 0x298   : > { %v1872_v50 = vsel %vm1361_vm14, %v1870_v16, %v1871_v10  ;;  %v1550_v10 = vshll.u32 %v4126_v13, 16 }
 0x299   : > { %2844 = vmatmul.msk.bf16.vlgmr.msra.gmra.mxu3 %vm1882_vm0, %v1872_v50 }
 0x29a   : > { %v1393_v41 = vpop.permute.xlu1 %1392 }
 0x29b   : > { %v1631_v26 = vpop.permute.xlu0 %1630 }
 0x29c   : > { %v1949_v28 = vsel %vm1882_vm0, %v1517_v2, %v1631_v26  ;;  %v1540_v2 = vrot.slane %v1538_v63, 1 }
 0x29d   : > { %v1970_v27 = vsel %vm1899_vm15, %v1949_v28, %v1687_v21  ;;  %v3019_v28 = vld [vmem:[#allocation3 + $0x60] sm:$0xe] }
 0x29e   : > { %2195 = vmatmul.bf16.gmra.mxu1 %v1924_v32  ;;  %v1988_v29 = vsel %vm1916_vm1, %v1970_v27, %v1823_v53  ;;  %v1451_v53 = vpop.permute.xlu2 %1450  ;;  %v3020_v40 = vor.u32 %v3019_v28, %v3018_v39 }
 0x29f   : > { %2244 = vmatmul.bf16.gmra.mxu2 %v1988_v29 }
 0x2a0   : > { %v1876_v29 = vrot.slane %v3020_v40, 1 }
 0x2a2   : > { %v1689_v42 = vpop.permute.xlu1 %1688 }
 0x2a3   : > { %v1328_v46 = vpop.permute.xlu0 %1327 }
 0x2a4   : > { %v1890_v48 = vsel %vm1882_vm0, %v4011_v30, %v1328_v46 }
 0x2a5   : > { %v1907_v54 = vsel %vm1899_vm15, %v1890_v48, %v1393_v41  ;;  %v1877_v41 = vrot.slane %v4172_v38, 1  ;;  %v1552_v48 = vrot.slane %v1550_v10, 1  ;;  %v3152_v38 = vld [vmem:[#allocation3 + $0x6c] sm:$0xe]  ;;  %v1859_v10 = vrot.slane %v3980_v33, 1 }
 0x2a6   : > { %v1927_v0 = vsel %vm1916_vm1, %v1907_v54, %v1449_v8  ;;  %v1827_v59 = vpop.permute.xlu2 %1826  ;;  %v1531_v8 = vshrl.u32 %v4088_v23, 16  ;;  %v3153_v60 = vor.u32 %v3152_v38, %v4185_v56  ;;  %v1562_v56 = vshll.u32 %v4159_v22, 16  ;;  %v3012_v33 = vld [vmem:[#allocation3 + $0x30] sm:$0xf0] }
 0x2a7   : > { %v1878_v16 = vsel %vm1361_vm14, %v1876_v29, %v1877_v41  ;;  %v3010_v29 = vld [vmem:[#allocation3 + $0x18] sm:$0xe] }
 0x2a8   : > { %v1536_v24 = vor.u32 %v1535_v17, %v1531_v8  ;;  %v1879_v1 = vrot.slane %v3153_v60, 1 }
 0x2a9   : > { %2845 = vmatmul.msk.bf16.gmra.mxu3 %vm1882_vm0, %v1875_v61  ;;  %v1564_v61 = vrot.slane %v1562_v56, 1 }
 0x2aa   : > { %v1395_v6 = vpop.permute.xlu1 %1394  ;;  %v1541_v32 = vsel %vm1224_vm13, %v1536_v24, %v1540_v2 }
 0x2ab   : > { %v1633_v44 = vpop.permute.xlu0 %1632 }
 0x2ac   : > { %v1952_v12 = vsel %vm1882_vm0, %v1529_v11, %v1633_v44  ;;  %v1557_v44 = vshll.u32 %v4177_v47, 16 }
 0x2ad   : > { %v1972_v30 = vsel %vm1899_vm15, %v1952_v12, %v1689_v42  ;;  %v1553_v42 = vsel %vm1224_vm13, %v4107_v45, %v1552_v48  ;;  %v1880_v45 = vrot.slane %v4203_v52, 1 }
 0x2ae   : > { %2200 = vmatmul.bf16.gmra.mxu1 %v1927_v0  ;;  %v1991_v3 = vsel %vm1916_vm1, %v1972_v30, %v1825_v37  ;;  %v1453_v37 = vpop.permute.xlu2 %1452 }
 0x2af   : > { %2249 = vmatmul.bf16.gmra.mxu2 %v1991_v3  ;;  %v1881_v30 = vsel %vm1361_vm14, %v1879_v1, %v1880_v45  ;;  %v1555_v3 = vshrl.u32 %v4177_v47, 16  ;;  %v3158_v1 = vld [vmem:[#allocation3 + $0x3c] sm:$0xe] }
 0x2b0   : > { %v3159_v56 = vor.u32 %v3158_v1, %v4030_v55 }
 0x2b2   : > { %v1691_v26 = vpop.permute.xlu1 %1690 }
 0x2b3   : > { %v1330_v19 = vpop.permute.xlu0 %1329 }
 0x2b4   : > { %v1892_v21 = vsel %vm1882_vm0, %v4014_v34, %v1330_v19 }
 0x2b5   : > { %v1909_v20 = vsel %vm1899_vm15, %v1892_v21, %v1395_v6  ;;  %v1559_v6 = vrot.slane %v1557_v44, 1 }
 0x2b6   : > { %v1930_v23 = vsel %vm1916_vm1, %v1909_v20, %v1451_v53  ;;  %v1829_v14 = vpop.permute.xlu2 %1828 }
 0x2b9   : > { %2846 = vmatmul.msk.bf16.gmra.mxu3 %vm1882_vm0, %v1878_v16 }
 0x2ba   : > { %v1397_v27 = vpop.permute.xlu1 %1396 }
 0x2bb   : > { %v1635_v43 = vpop.permute.xlu0 %1634 }
 0x2bc   : > { %v1955_v5 = vsel %vm1882_vm0, %v1541_v32, %v1635_v43 }
 0x2bd   : > { %v1974_v62 = vsel %vm1899_vm15, %v1955_v5, %v1691_v26  ;;  %v1574_v26 = vshll.u32 %v4200_v49, 16 }
 0x2be   : > { %2205 = vmatmul.bf16.gmra.mxu1 %v1930_v23  ;;  %v1994_v34 = vsel %vm1916_vm1, %v1974_v62, %v1827_v59  ;;  %v1560_v59 = vor.u32 %v1559_v6, %v1555_v3 }
 0x2bf   : > { %2254 = vmatmul.bf16.gmra.mxu2 %v1994_v34  ;;  %v3155_v34 = vld [vmem:[#allocation3 + $0x24] sm:$0xe] }
 0x2c0   : > { %v1565_v63 = vsel %vm1224_vm13, %v1560_v59, %v1564_v61  ;;  %v3156_v16 = vor.u32 %v3155_v34, %v3978_v31 }
 0x2c2   : > { %v1693_v51 = vpop.permute.xlu1 %1692 }
 0x2c3   : > { %v1332_v50 = vpop.permute.xlu0 %1331 }
 0x2c4   : > { %v1894_v46 = vsel %vm1882_vm0, %v4071_v7, %v1332_v50  ;;  %v1455_v7 = vpop.permute.xlu2 %1454  ;;  %v4319_v50 = vld [vmem:[%s4493_s4] ss:$0 sm:$0xff] }
 0x2c5   : > { %v1911_v53 = vsel %vm1899_vm15, %v1894_v46, %v1397_v27  ;;  %v1862_v46 = vrot.slane %v3996_v57, 1 }
 0x2c6   : > { %v1933_v11 = vsel %vm1916_vm1, %v1911_v53, %v1453_v37  ;;  %v1576_v37 = vrot.slane %v1574_v26, 1 }
 0x2c8   : > { %v1577_v23 = vsel %vm1224_vm13, %v4190_v4, %v1576_v37 }
 0x2c9   : > { %2847 = vmatmul.msk.bf16.gmra.mxu3 %vm1882_vm0, %v1881_v30 }
 0x2ca   : > { %v1399_v58 = vpop.permute.xlu1 %1398 }
 0x2cb   : > { %v1637_v54 = vpop.permute.xlu0 %1636 }
 0x2cc   : > { %v1958_v13 = vsel %vm1882_vm0, %v1553_v42, %v1637_v54  ;;  %v1831_v17 = vpop.permute.xlu2 %1830  ;;  %v3013_v54 = vld [vmem:[#allocation3 + $0x30] sm:$0xe] }
 0x2cd   : > { %v1976_v0 = vsel %vm1899_vm15, %v1958_v13, %v1693_v51  ;;  %v3014_v57 = vor.u32 %v3013_v54, %v3012_v33 }
 0x2ce   : > { %2210 = vmatmul.bf16.gmra.mxu1 %v1933_v11  ;;  %v1997_v12 = vsel %vm1916_vm1, %v1976_v0, %v1829_v14  ;;  %v1861_v14 = vrot.slane %v3156_v16, 1 }
 0x2cf   : > { %2259 = vmatmul.bf16.gmra.mxu2 %v1997_v12  ;;  %v1864_v0 = vrot.slane %v3014_v57, 1 }
 0x2d0   : > { %v1863_v42 = vsel %vm1361_vm14, %v1861_v14, %v1862_v46 }
 0x2d2   : > { %v1695_v8 = vpop.permute.xlu1 %1694 }
 0x2d3   : > { %v1334_v35 = vpop.permute.xlu0 %1333 }
 0x2d4   : > { %v1896_v15 = vsel %vm1882_vm0, %v4074_v9, %v1334_v35  ;;  %v1457_v2 = vpop.permute.xlu2 %1456  ;;  %v1867_v35 = vrot.slane %v3159_v56, 1 }
 0x2d5   : > { %v1913_v52 = vsel %vm1899_vm15, %v1896_v15, %v1399_v58  ;;  %v1868_v15 = vrot.slane %v4045_v18, 1 }
 0x2d6   : > { %v1936_v47 = vsel %vm1916_vm1, %v1913_v52, %v1455_v7  ;;  %v1865_v7 = vrot.slane %v4016_v36, 1 }
 0x2d8   : > { %v1866_v58 = vsel %vm1361_vm14, %v1864_v0, %v1865_v7 }
 0x2da   : > { %v1401_v9 = vpop.permute.xlu1 %1400 }
 0x2db   : > { %v1639_v19 = vpop.permute.xlu0 %1638 }
 0x2dc   : > { %v1961_v21 = vsel %vm1882_vm0, %v1565_v63, %v1639_v19  ;;  %v1833_v5 = vpop.permute.xlu2 %1832 }
 0x2dd   : > { %v1978_v22 = vsel %vm1899_vm15, %v1961_v21, %v1695_v8 }
 0x2de   : > { %2215 = vmatmul.bf16.gmra.mxu1 %v1936_v47  ;;  %v2000_v24 = vsel %vm1916_vm1, %v1978_v22, %v1831_v17  ;;  %v1869_v17 = vsel %vm1361_vm14, %v1867_v35, %v1868_v15 }
 0x2df   : > { %2264 = vmatmul.bf16.gmra.mxu2 %v2000_v24  ;;  %v2925_v24 = vld [vmem:[%s4494_s5 + $0x8] sm:$0xff] }
 0x2e0   : > { %2414 = vmatpush.bf16.msrb.mxu3 %v2925_v24 }
 0x2e2   : > { %v1697_v39 = vpop.permute.xlu1 %1696 }
 0x2e3   : > { %v1336_v20 = vpop.permute.xlu0 %1335 }
 0x2e4   : > { %v1898_v32 = vsel %vm1882_vm0, %v4161_v25, %v1336_v20  ;;  %v3009_v25 = vld [vmem:[#allocation3 + $0x18] sm:$0xf0] }
 0x2e5   : > { %v1915_v43 = vsel %vm1899_vm15, %v1898_v32, %v1401_v9  ;;  %v3011_v41 = vor.u32 %v3010_v29, %v3009_v25 }
 0x2e6   : > { %v1939_v40 = vsel %vm1916_vm1, %v1915_v43, %v1457_v2 }
 0x2e7   : > { %v1858_v4 = vrot.slane %v3011_v41, 1 }
 0x2e9   : > { %v1860_v51 = vsel %vm1361_vm14, %v1858_v4, %v1859_v10  ;;  %v2924_v4 = vld [vmem:[%s4494_s5] sm:$0xff] }
 0x2ea   : > { %2415 = vmatpush.bf16.msrb.mxu3 %v2924_v4 }
 0x2eb   : > { %v1641_v28 = vpop.permute.xlu0 %1640 }
 0x2ec   : > { %v1964_v62 = vsel %vm1882_vm0, %v1577_v23, %v1641_v28 }
 0x2ed   : > { %v1980_v49 = vsel %vm1899_vm15, %v1964_v62, %v1697_v39 }
 0x2ee   : > { %2220 = vmatmul.bf16.gmra.mxu1 %v1939_v40  ;;  %v2003_v27 = vsel %vm1916_vm1, %v1980_v49, %v1833_v5 }
 0x2ef   : > { %2269 = vmatmul.bf16.gmra.mxu2 %v2003_v27 }
 0x2f9   : > { %v2235_v38 = vpop.f32.mrf.mxu2 }
 0x2fb   : > { %v2186_v48 = vpop.f32.mrf.mxu1 }
 0x2fc   : > { %v2187_v53 = vadd.f32 %v4319_v50, %v2186_v48 }
 0x2fe   : > { %v4325_v31 = vadd.f32 %v2235_v38, %v2187_v53  ;;  %2840 = vmatmul.msk.bf16.vlgmr.msrb.gmra.mxu1 %vm1882_vm0, %v1860_v51 }
 0x2ff   : > { %2841 = vmatmul.msk.bf16.vlgmr.msrb.gmra.mxu2 %vm1882_vm0, %v1863_v42 }
 0x301   : > { %v2237_v60 = vpop.f32.mrf.mxu2 }
 0x303   : > { %v2188_v11 = vpop.f32.mrf.mxu1 }
 0x304   : > { %v2189_v13 = vadd.f32 %v4319_v50, %v2188_v11 }
 0x306   : > { %v4330_v44 = vadd.f32 %v2237_v60, %v2189_v13 }
 0x30b   : > { %v2191_v12 = vpop.f32.mrf.mxu1 }
 0x30c   : > { %v2192_v45 = vadd.f32 %v4319_v50, %v2191_v12 }
 0x30f   : > { %2842 = vmatmul.msk.bf16.gmra.mxu2 %vm1882_vm0, %v1866_v58 }
 0x312   : > { %v2240_v30 = vpop.f32.mrf.mxu2 }
 0x313   : > { %v4336_v3 = vadd.f32 %v2240_v30, %v2192_v45  ;;  %v2193_v6 = vpop.f32.mrf.mxu1 }
 0x314   : > { %v2194_v59 = vadd.f32 %v4319_v50, %v2193_v6 }
 0x31a   : > { %v2242_v36 = vpop.f32.mrf.mxu2 }
 0x31b   : > { %v4341_v61 = vadd.f32 %v2242_v36, %v2194_v59  ;;  %v2196_v8 = vpop.f32.mrf.mxu1 }
 0x31c   : > { %v2197_v52 = vadd.f32 %v4319_v50, %v2196_v8  ;;  %v2304_v32 = vpop.f32.mrf.mxu3 }
 0x31f   : > { %2843 = vmatmul.msk.bf16.gmra.mxu2 %vm1882_vm0, %v1869_v17 }
 0x322   : > { %v2245_v63 = vpop.f32.mrf.mxu2 }
 0x323   : > { %v4346_v19 = vadd.f32 %v2245_v63, %v2197_v52  ;;  %v2198_v47 = vpop.f32.mrf.mxu1 }
 0x324   : > { %v2199_v55 = vadd.f32 %v4319_v50, %v2198_v47  ;;  %v2306_v28 = vpop.f32.mrf.mxu3 }
 0x32a   : > { %v2247_v21 = vpop.f32.mrf.mxu2 }
 0x32b   : > { %v4349_v18 = vadd.f32 %v2247_v21, %v2199_v55  ;;  %v2201_v22 = vpop.f32.mrf.mxu1 }
 0x32c   : > { %v2202_v9 = vadd.f32 %v4319_v50, %v2201_v22  ;;  %v2309_v49 = vpop.f32.mrf.mxu3 }
 0x332   : > { %v2250_v2 = vpop.f32.mrf.mxu2 }
 0x333   : > { %v4355_v26 = vadd.f32 %v2250_v2, %v2202_v9  ;;  %v2203_v20 = vpop.f32.mrf.mxu1 }
 0x334   : > { %v2204_v37 = vadd.f32 %v4319_v50, %v2203_v20  ;;  %v2311_v42 = vpop.f32.mrf.mxu3 }
 0x33a   : > { %v2252_v43 = vpop.f32.mrf.mxu2 }
 0x33b   : > { %v4358_v23 = vadd.f32 %v2252_v43, %v2204_v37  ;;  %v2206_v39 = vpop.f32.mrf.mxu1 }
 0x33c   : > { %v2207_v5 = vadd.f32 %v4319_v50, %v2206_v39  ;;  %v2314_v0 = vpop.f32.mrf.mxu3 }
 0x342   : > { %v2255_v40 = vpop.f32.mrf.mxu2 }
 0x343   : > { %v2256_v62 = vadd.f32 %v2255_v40, %v2207_v5  ;;  %v2208_v34 = vpop.f32.mrf.mxu1 }
 0x344   : > { %v2209_v27 = vadd.f32 %v4319_v50, %v2208_v34  ;;  %v2316_v35 = vpop.f32.mrf.mxu3 }
 0x345   : > { %v2305_v29 = vadd.f32 %v2304_v32, %v2256_v62 }
 0x347   : > { %v2332_v14 = vmax.f32 %v2305_v29, 0.0 }
 0x34a   : > { %v2257_v25 = vpop.f32.mrf.mxu2 }
 0x34b   : > { %v2258_v41 = vadd.f32 %v2257_v25, %v2209_v27  ;;  %v2211_v16 = vpop.f32.mrf.mxu1 }
 0x34c   : > { %v2212_v48 = vadd.f32 %v4319_v50, %v2211_v16  ;;  %v2319_v55 = vpop.f32.mrf.mxu3 }
 0x34d   : > { %v2307_v10 = vadd.f32 %v2306_v28, %v2258_v41 }
 0x34f   : > { %v2333_v46 = vmax.f32 %v2307_v10, 0.0 }
 0x351   : > { %v4366_v51 = vpack.c.bf16 %v2333_v46, %v2332_v14 }
 0x352   : > { %v2260_v53 = vpop.f32.mrf.mxu2 }
 0x353   : > { %v2261_v38 = vadd.f32 %v2260_v53, %v2212_v48  ;;  %v2213_v33 = vpop.f32.mrf.mxu1 }
 0x354   : > { %v2214_v54 = vadd.f32 %v4319_v50, %v2213_v33  ;;  %v2321_v37 = vpop.f32.mrf.mxu3 }
 0x355   : > { %v2310_v13 = vadd.f32 %v2309_v49, %v2261_v38 }
 0x357   : > { %v2334_v12 = vmax.f32 %v2310_v13, 0.0 }
 0x35a   : > { %v2262_v11 = vpop.f32.mrf.mxu2 }
 0x35b   : > { %v2263_v57 = vadd.f32 %v2262_v11, %v2214_v54  ;;  %v2216_v60 = vpop.f32.mrf.mxu1 }
 0x35c   : > { %v2217_v1 = vadd.f32 %v4319_v50, %v2216_v60 }
 0x35d   : > { %v2312_v7 = vadd.f32 %v2311_v42, %v2263_v57 }
 0x35f   : > { %v2335_v58 = vmax.f32 %v2312_v7, 0.0 }
 0x361   : > { %v2345_v45 = vpack.c.bf16 %v2335_v58, %v2334_v12  ;;  %v2849_v58 = vld [vmem:[%s3583_s30 + $0x18] sm:$0xff] }
 0x362   : > { %v2265_v30 = vpop.f32.mrf.mxu2 }
 0x363   : > { %v2266_v6 = vadd.f32 %v2265_v30, %v2217_v1  ;;  %v2218_v56 = vpop.f32.mrf.mxu1 }
 0x364   : > { %v2219_v15 = vadd.f32 %v4319_v50, %v2218_v56  ;;  %v2850_v56 = vld [vmem:[%s3583_s30 + $0x20] sm:$0xff] }
 0x365   : > { %v2315_v36 = vadd.f32 %v2314_v0, %v2266_v6 }
 0x367   : > { %v2336_v63 = vmax.f32 %v2315_v36, 0.0 }
 0x36a   : > { %v2267_v59 = vpop.f32.mrf.mxu2 }
 0x36b   : > { %v2268_v8 = vadd.f32 %v2267_v59, %v2219_v15  ;;  %v2221_v17 = vpop.f32.mrf.mxu1 }
 0x36c   : > { %v2222_v21 = vadd.f32 %v4319_v50, %v2221_v17 }
 0x36d   : > { %v2317_v52 = vadd.f32 %v2316_v35, %v2268_v8  ;;  %v2851_v8 = vld [vmem:[%s3583_s30 + $0x28] sm:$0xff] }
 0x36f   : > { %v2337_v47 = vmax.f32 %v2317_v52, 0.0 }
 0x371   : > { %v2346_v22 = vpack.c.bf16 %v2337_v47, %v2336_v63 }
 0x372   : > { %v2270_v24 = vpop.f32.mrf.mxu2 }
 0x373   : > { %v2271_v9 = vadd.f32 %v2270_v24, %v2222_v21  ;;  %v2223_v2 = vpop.f32.mrf.mxu1 }
 0x374   : > { %v2224_v20 = vadd.f32 %v4319_v50, %v2223_v2  ;;  %v2853_v2 = vld [vmem:[%s3583_s30 + $0x38] sm:$0xff] }
 0x375   : > { %v2320_v43 = vadd.f32 %v2319_v55, %v2271_v9  ;;  %v2852_v55 = vld [vmem:[%s3583_s30 + $0x30] sm:$0xff] }
 0x377   : > { %v2338_v40 = vmax.f32 %v2320_v43, 0.0 }
 0x37a   : > { %v2272_v32 = vpop.f32.mrf.mxu2 }
 0x37b   : > { %v2273_v39 = vadd.f32 %v2272_v32, %v2224_v20  ;;  %v2284_v28 = vpop.f32.mrf.mxu1 }
 0x37c   : > { %v2285_v49 = vadd.f32 %v2284_v28, %v4325_v31 }
 0x37d   : > { %v2322_v5 = vadd.f32 %v2321_v37, %v2273_v39  ;;  %v2854_v39 = vld [vmem:[%s3583_s30 + $0x40] sm:$0xff] }
 0x37e   : > { %v2324_v41 = vmax.f32 %v2285_v49, 0.0 }
 0x37f   : > { %v2339_v62 = vmax.f32 %v2322_v5, 0.0 }
 0x381   : > { %v2347_v34 = vpack.c.bf16 %v2339_v62, %v2338_v40 }
 0x382   : > { %v2289_v27 = vpop.f32.mrf.mxu2 }
 0x383   : > { %v2286_v25 = vpop.f32.mrf.mxu1  ;;  %v2290_v50 = vadd.f32 %v2289_v27, %v4336_v3 }
 0x384   : > { %v2287_v29 = vadd.f32 %v2286_v25, %v4330_v44 }
 0x385   : > { %v2326_v46 = vmax.f32 %v2290_v50, 0.0 }
 0x386   : > { %v2325_v16 = vmax.f32 %v2287_v29, 0.0 }
 0x388   : > { %v2340_v4 = vpack.c.bf16 %v2325_v16, %v2324_v41  ;;  %v2856_v41 = vld [vmem:[%s3583_s30 + $0x50] sm:$0xff] }
 0x38a   : > { %v2291_v10 = vpop.f32.mrf.mxu2  ;;  %2872 = vmatmul.msk.bf16.vlgmr.msrb.gmra.mxu3 %vm1882_vm0, %v2340_v4 }
 0x38b   : > { %v2292_v14 = vadd.f32 %v2291_v10, %v4341_v61 }
 0x38d   : > { %v2327_v48 = vmax.f32 %v2292_v14, 0.0  ;;  %v2857_v14 = vld [vmem:[%s3583_s30 + $0x58] sm:$0xff] }
 0x38f   : > { %v2341_v53 = vpack.c.bf16 %v2327_v48, %v2326_v46 }
 0x392   : > { %v2294_v42 = vpop.f32.mrf.mxu2 }
 0x393   : > { %v2295_v31 = vadd.f32 %v2294_v42, %v4346_v19 }
 0x395   : > { %v2328_v33 = vmax.f32 %v2295_v31, 0.0  ;;  %v2858_v31 = vld [vmem:[%s3583_s30 + $0x60] sm:$0xff] }
 0x39a   : > { %v2296_v38 = vpop.f32.mrf.mxu2  ;;  %2873 = vmatmul.msk.bf16.gmra.mxu3 %vm1882_vm0, %v2341_v53 }
 0x39b   : > { %v2297_v44 = vadd.f32 %v2296_v38, %v4349_v18  ;;  %v4393_v18 = vld [vmem:[%s4495_s6] ss:$0 sm:$0xff] }
 0x39d   : > { %v2329_v54 = vmax.f32 %v2297_v44, 0.0 }
 0x39f   : > { %v2342_v3 = vpack.c.bf16 %v2329_v54, %v2328_v33 }
 0x3a2   : > { %v2299_v11 = vpop.f32.mrf.mxu2 }
 0x3a3   : > { %v2300_v13 = vadd.f32 %v2299_v11, %v4355_v26  ;;  %v2848_v26 = vld [vmem:[%s3583_s30 + $0x10] sm:$0xff] }
 0x3a5   : > { %v2330_v19 = vmax.f32 %v2300_v13, 0.0 }
 0x3aa   : > { %v2301_v57 = vpop.f32.mrf.mxu2  ;;  %2874 = vmatmul.msk.bf16.gmra.mxu3 %vm1882_vm0, %v2342_v3  ;;  %v2859_v3 = vld [vmem:[%s3583_s30 + $0x68] sm:$0xff] }
 0x3ab   : > { %v2302_v61 = vadd.f32 %v2301_v57, %v4358_v23 }
 0x3ad   : > { %v2331_v60 = vmax.f32 %v2302_v61, 0.0 }
 0x3af   : > { %v2343_v0 = vpack.c.bf16 %v2331_v60, %v2330_v19  ;;  %v2860_v19 = vld [vmem:[%s3583_s30 + $0x70] sm:$0xff] }
 0x3ba   : > { %2875 = vmatmul.msk.bf16.gmra.mxu3 %vm1882_vm0, %v2343_v0 }
 0x3ca   : > { %2876 = vmatmul.msk.bf16.gmra.mxu3 %vm1882_vm0, %v4366_v51 }
 0x3da   : > { %2877 = vmatmul.msk.bf16.gmra.mxu3 %vm1882_vm0, %v2345_v45 }
 0x3ea   : > { %2878 = vmatmul.msk.bf16.gmra.mxu3 %vm1882_vm0, %v2346_v22 }
 0x3fa   : > { %2879 = vmatmul.msk.bf16.gmra.mxu3 %vm1882_vm0, %v2347_v34  ;;  %v2855_v34 = vld [vmem:[%s3583_s30 + $0x48] sm:$0xff] }
 0x40d   : > { %v2417_v23 = vpop.f32.mrf.mxu3 }
 0x40e   : > { %v2418_v7 = vadd.f32 %v4393_v18, %v2417_v23 }
 0x410   : > { %v2457_v51 = vadd.f32 %v2848_v26, %v2418_v7  ;;  %v2861_v7 = vld [vmem:[%s3583_s30 + $0x78] sm:$0xff] }
 0x412   : > { %v2473_v12 = vmax.f32 %v2457_v51, 0.0 }
 0x414   : > { %2489 = vst [vmem:[%s3721_s7] sm:$0xff] %v2473_v12 }
 0x415   : > { %v2419_v1 = vpop.f32.mrf.mxu3 }
 0x416   : > { %v2420_v45 = vadd.f32 %v4393_v18, %v2419_v1 }
 0x418   : > { %v2458_v30 = vadd.f32 %v2849_v58, %v2420_v45  ;;  %v2862_v45 = vld [vmem:[%s3583_s30 + $0x80] sm:$0xff] }
 0x41a   : > { %v2474_v6 = vmax.f32 %v2458_v30, 0.0 }
 0x41c   : > { %2490 = vst [vmem:[%s3721_s7 + $0x8] sm:$0xff] %v2474_v6 }
 0x41d   : > { %v2422_v35 = vpop.f32.mrf.mxu3 }
 0x41e   : > { %v2423_v15 = vadd.f32 %v4393_v18, %v2422_v35 }
 0x420   : > { %v2459_v59 = vadd.f32 %v2850_v56, %v2423_v15  ;;  %v2863_v15 = vld [vmem:[%s3583_s30 + $0x88] sm:$0xff] }
 0x422   : > { %v2475_v36 = vmax.f32 %v2459_v59, 0.0 }
 0x424   : > { %2491 = vst [vmem:[%s3721_s7 + $0x10] sm:$0xff] %v2475_v36 }
 0x425   : > { %v2424_v17 = vpop.f32.mrf.mxu3 }
 0x426   : > { %v2425_v52 = vadd.f32 %v4393_v18, %v2424_v17 }
 0x428   : > { %v2460_v63 = vadd.f32 %v2851_v8, %v2425_v52 }
 0x42a   : > { %v2476_v47 = vmax.f32 %v2460_v63, 0.0 }
 0x42c   : > { %2492 = vst [vmem:[%s3721_s7 + $0x18] sm:$0xff] %v2476_v47 }
 0x42d   : > { %v2427_v21 = vpop.f32.mrf.mxu3 }
 0x42e   : > { %v2428_v22 = vadd.f32 %v4393_v18, %v2427_v21 }
 0x430   : > { %v2461_v24 = vadd.f32 %v2852_v55, %v2428_v22 }
 0x432   : > { %v2477_v9 = vmax.f32 %v2461_v24, 0.0 }
 0x434   : > { %2493 = vst [vmem:[%s3721_s7 + $0x20] sm:$0xff] %v2477_v9 }
 0x435   : > { %v2429_v20 = vpop.f32.mrf.mxu3 }
 0x436   : > { %v2430_v32 = vadd.f32 %v4393_v18, %v2429_v20 }
 0x438   : > { %v2462_v37 = vadd.f32 %v2853_v2, %v2430_v32 }
 0x43a   : > { %v2478_v43 = vmax.f32 %v2462_v37, 0.0 }
 0x43c   : > { %2494 = vst [vmem:[%s3721_s7 + $0x28] sm:$0xff] %v2478_v43 }
 0x43d   : > { %v2432_v28 = vpop.f32.mrf.mxu3 }
 0x43e   : > { %v2433_v5 = vadd.f32 %v4393_v18, %v2432_v28 }
 0x440   : > { %v2463_v40 = vadd.f32 %v2854_v39, %v2433_v5 }
 0x442   : > { %v2479_v62 = vmax.f32 %v2463_v40, 0.0 }
 0x444   : > { %2495 = vst [vmem:[%s3721_s7 + $0x30] sm:$0xff] %v2479_v62 }
 0x445   : > { %v2434_v49 = vpop.f32.mrf.mxu3 }
 0x446   : > { %v2435_v27 = vadd.f32 %v4393_v18, %v2434_v49 }
 0x448   : > { %v2464_v25 = vadd.f32 %v2855_v34, %v2435_v27 }
 0x44a   : > { %v2480_v29 = vmax.f32 %v2464_v25, 0.0 }
 0x44c   : > { %2496 = vst [vmem:[%s3721_s7 + $0x38] sm:$0xff] %v2480_v29 }
 0x44d   : > { %v2437_v16 = vpop.f32.mrf.mxu3 }
 0x44e   : > { %v2438_v4 = vadd.f32 %v4393_v18, %v2437_v16 }
 0x450   : > { %v2465_v50 = vadd.f32 %v2856_v41, %v2438_v4 }
 0x452   : > { %v2481_v10 = vmax.f32 %v2465_v50, 0.0 }
 0x454   : > { %2497 = vst [vmem:[%s3721_s7 + $0x40] sm:$0xff] %v2481_v10 }
 0x455   : > { %v2439_v46 = vpop.f32.mrf.mxu3 }
 0x456   : > { %v2440_v48 = vadd.f32 %v4393_v18, %v2439_v46 }
 0x458   : > { %v2466_v53 = vadd.f32 %v2857_v14, %v2440_v48 }
 0x45a   : > { %v2482_v42 = vmax.f32 %v2466_v53, 0.0 }
 0x45c   : > { %2498 = vst [vmem:[%s3721_s7 + $0x48] sm:$0xff] %v2482_v42 }
 0x45d   : > { %v2442_v38 = vpop.f32.mrf.mxu3 }
 0x45e   : > { %v2443_v44 = vadd.f32 %v4393_v18, %v2442_v38 }
 0x460   : > { %v2467_v33 = vadd.f32 %v2858_v31, %v2443_v44 }
 0x462   : > { %v2483_v54 = vmax.f32 %v2467_v33, 0.0 }
 0x464   : > { %2499 = vst [vmem:[%s3721_s7 + $0x50] sm:$0xff] %v2483_v54 }
 0x465   : > { %v2444_v11 = vpop.f32.mrf.mxu3 }
 0x466   : > { %v2445_v13 = vadd.f32 %v4393_v18, %v2444_v11 }
 0x468   : > { %v2468_v57 = vadd.f32 %v2859_v3, %v2445_v13 }
 0x46a   : > { %v2484_v61 = vmax.f32 %v2468_v57, 0.0 }
 0x46c   : > { %2500 = vst [vmem:[%s3721_s7 + $0x58] sm:$0xff] %v2484_v61 }
 0x46d   : > { %v2447_v60 = vpop.f32.mrf.mxu3 }
 0x46e   : > { %v2448_v0 = vadd.f32 %v4393_v18, %v2447_v60 }
 0x470   : > { %v2469_v26 = vadd.f32 %v2860_v19, %v2448_v0 }
 0x472   : > { %v2485_v23 = vmax.f32 %v2469_v26, 0.0 }
 0x474   : > { %2501 = vst [vmem:[%s3721_s7 + $0x60] sm:$0xff] %v2485_v23 }
 0x475   : > { %v2449_v51 = vpop.f32.mrf.mxu3 }
 0x476   : > { %v2450_v12 = vadd.f32 %v4393_v18, %v2449_v51 }
 0x478   : > { %v2470_v58 = vadd.f32 %v2861_v7, %v2450_v12 }
 0x47a   : > { %v2486_v1 = vmax.f32 %v2470_v58, 0.0 }
 0x47c   : > { %2502 = vst [vmem:[%s3721_s7 + $0x68] sm:$0xff] %v2486_v1 }
 0x47d   : > { %v2452_v30 = vpop.f32.mrf.mxu3 }
 0x47e   : > { %v2453_v6 = vadd.f32 %v4393_v18, %v2452_v30 }
 0x480   : > { %v2471_v56 = vadd.f32 %v2862_v45, %v2453_v6 }
 0x482   : > { %v2487_v35 = vmax.f32 %v2471_v56, 0.0 }
 0x484   : > { %2503 = vst [vmem:[%s3721_s7 + $0x70] sm:$0xff] %v2487_v35 }
 0x485   : > { %v2454_v59 = vpop.f32.mrf.mxu3 }
 0x486   : > { %v2455_v36 = vadd.f32 %v4393_v18, %v2454_v59 }
 0x488   : > { %v2472_v8 = vadd.f32 %v2863_v15, %v2455_v36 }
 0x48a   : > { %v2488_v17 = vmax.f32 %v2472_v8, 0.0 }
 0x48c   : > { %2504 = vst [vmem:[%s3721_s7 + $0x78] sm:$0xff] %v2488_v17 }
 0x48d   : > { %3363 = shalt.err (!%p3360_p6)
}
 0x48e   : > { %s3447_s7 = smov 128   ;;  %s3448_s12 = smov 8  }
 0x48f   : > { %3037 = dma.vmem_to_hbm [thread:$0]  (%p3540_p3), %s2522_s27, 2048, %s2524_s11, %s2506_s9, %s3447_s7, %s3447_s7, %s3448_s12  }
 0x490 PF: > { %s4553_s8 = sld [smem:[#allocation31_spill]] }
 0x491   : > { %s4554_s21 = sld [smem:[#allocation25_spill]] }
 0x496   : > { %p3067_p10 = scmp.ge.s32.totalorder %s4553_s8, 2 }
 0x497   : > { %s2538_s17 = sand.u32 1, %s4554_s21  }
 0x498   : > { %p3056_p7 = pnand %p3067_p10, %p3549_p8  ;;  %s2539_s24 = scalar_lea.sflag [#allocation6], %s2538_s17 }
 0x49a   : > { %p3057_p11 = pneg %p3056_p7 }
 0x49c   : > { %3407 = dma.done.wait (%p3057_p11), %s2539_s24, 2048  }
 0x49d   : > { %3409 = vsyncadd (%p3057_p11), %s2539_s24, 4294965248  ;;  %s20_s8 = sadd.s32 1, %s4553_s8   ;;  %s4556_s24 = sld [smem:[#allocation26_spill]] }
 0x49e   : > { %p17_p9 = scmp.ge.s32.totalorder %s20_s8, 6   ;;  %s4557_s25 = sld [smem:[#allocation27_spill]] }
 0x49f   : > { %s4558_s26 = sld [smem:[#allocation36_spill]] }
 0x4a0   : > { %s4559_s27 = sld [smem:[#allocation29_spill]]  ;;  %19 = sbr.rel (!%p17_p9) target bundleno = 7 (0x7), region = 175 }
 0x4a1   : > { %s4560_s28 = sld [smem:[#allocation30_spill]] }
 0x4a2   : > { %s4561_s29 = sld [smem:[#allocation32_spill]] }
 0x4a3   : > { %s4562_s30 = sld [smem:[#allocation34_spill]] }
 0x4a5   :  { %2545 = vsyncpa [#allocation6], 1 }
 0x4a6   :  { %2547 = vsyncpa [#allocation6 + $0x1], 1 }
 0x4a7   :  { %2548 = vsyncmov [#allocation4] }
 0x4aa   :  { %s2549_s19 = vpop.sfrf %2548 }
 0x4ab   :  { %p2887_p3 = scmp.ne.s32.totalorder %s2549_s19, 0 }
 0x4ad   :  { %2553 = shalt.err (%p2887_p3)  }
 0x4ae   :  { %2555 = vsyncmov [#allocation4 + $0x1] }
 0x4b1   :  { %s2556_s23 = vpop.sfrf %2555 }
 0x4b2   :  { %p2888_p8 = scmp.ne.s32.totalorder %s2556_s23, 0 }
 0x4b4   :  { %2560 = shalt.err (%p2888_p8)  }
 0x4b5   :  { %2562 = vsyncmov [#allocation4 + $0x2] }
 0x4b8   :  { %s2563_s15 = vpop.sfrf %2562 }
 0x4b9   :  { %p2889_p2 = scmp.ne.s32.totalorder %s2563_s15, 0 }
 0x4bb   :  { %2567 = shalt.err (%p2889_p2)  }
 0x4bc   :  { %2569 = vsyncmov [#allocation4 + $0x3] }
 0x4bf   :  { %s2570_s11 = vpop.sfrf %2569 }
 0x4c0   :  { %p2890_p12 = scmp.ne.s32.totalorder %s2570_s11, 0 }
 0x4c2   :  { %2574 = shalt.err (%p2890_p12)  }
 0x4c3   :  { %2576 = vsyncmov [#allocation4 + $0x4] }
 0x4c6   :  { %s2577_s9 = vpop.sfrf %2576 }
 0x4c7   :  { %p2891_p4 = scmp.ne.s32.totalorder %s2577_s9, 0 }
 0x4c9   :  { %2581 = shalt.err (%p2891_p4)  }
 0x4ca   :  { %2583 = vsyncmov [#allocation4 + $0x5] }
 0x4cd   :  { %s2584_s0 = vpop.sfrf %2583 }
 0x4ce   :  { %p2892_p0 = scmp.ne.s32.totalorder %s2584_s0, 0 }
 0x4d0   :  { %2588 = shalt.err (%p2892_p0)  }

</bundles_post_ra>
